<compile_context>
chip_gen: v7x
topology: tpu7x:2x2x1
jax: 0.10.0
libtpu: 0.0.40
codegen_flags: <defaults>
</compile_context>

<pallas_src>
import jax
import jax.numpy as jnp
import numpy as np
from jax.experimental import pallas as pl
from jax.experimental.pallas import tpu as pltpu


# ----------------------------- helpers -----------------------------------------

def _sigmoid(x):
    # Exact identity sigmoid(x) = 0.5*(tanh(x/2) + 1): one EUP op, no exp+divide.
    return 0.5 * (jnp.tanh(0.5 * x) + 1.0)


def _pick_time_chunk(seq_len, max_chunk=64):
    """Largest divisor of seq_len that is <= max_chunk (bounds per-chunk VMEM)."""
    tc = min(seq_len, max_chunk)
    while seq_len % tc:
        tc -= 1
    return tc


def _nbytes(shape, dtype):
    n = 1
    for d in shape:
        n *= int(d)
    return n * np.dtype(dtype).itemsize


# ----------------------------- fused kernel -------------------------------------

def _make_fused_kernel(n_layers, time_chunk, batch_p, hidden, emb_dim, vocab, unroll):
    Tc, Bp, H, D = time_chunk, batch_p, hidden, emb_dim
    four_h = 4 * H

    def kernel(*refs):
        tok_ref, emb_ref = refs[0], refs[1]
        layer_refs = refs[2:2 + 3 * n_layers]
        hw_ref, hb_ref, o_ref, h_sc, c_sc, seq_sc, gp_sc = refs[2 + 3 * n_layers:]

        ci = pl.program_id(0)

        # Zero the per-layer (h, c) carries at the first time chunk.
        @pl.when(ci == 0)
        def _init():
            h_sc[...] = jnp.zeros_like(h_sc)
            c_sc[...] = jnp.zeros_like(c_sc)

        # Fused-gate activation constants (hoisted out of all loops).
        col = jax.lax.broadcasted_iota(jnp.int32, (1, four_h), 1)
        is_g = jnp.logical_and(col >= 2 * H, col < 3 * H)   # tanh-gate columns (g)
        pre_scale = jnp.where(is_g, 1.0, 0.5)                # 0.5 for sigmoid gates

        # In-kernel embedding lookup for this chunk: one-hot gather on the MXU.
        tok = tok_ref[...]                                           # (Tc*Bp, 1) i32
        lane = jax.lax.broadcasted_iota(jnp.int32, (Tc * Bp, vocab), 1)
        onehot = jnp.where(lane == tok, 1.0, 0.0).astype(jnp.bfloat16)
        x0 = jnp.dot(onehot, emb_ref[...],
                     preferred_element_type=jnp.float32).astype(jnp.bfloat16)

        def run_layer(l, xin_flat, wx_ref, wh_ref, b_ref, write_seq):
            # Chunk-wide input projection: one big MXU matmul, off the serial path.
            gp = jnp.dot(xin_flat, wx_ref[...],
                         preferred_element_type=jnp.float32) + b_ref[...]
            gp_sc[...] = gp.reshape(Tc, Bp, four_h)

            # Hoist the recurrent weight load out of the step loop: W_hh stays in
            # vregs across all Tc timesteps (H=32 bf16 -> a couple of vregs).
            wh = wh_ref[...]

            def step(t, carry):
                h, c = carry
                gates = gp_sc[t] + jnp.dot(h.astype(jnp.bfloat16), wh,
                                           preferred_element_type=jnp.float32)
                # One tanh covers all four gates: sigmoid(x) = 0.5*tanh(0.5x)+0.5.
                y = jnp.tanh(gates * pre_scale)
                act = jnp.where(is_g, y, 0.5 * y + 0.5)
                i_g = act[:, 0 * H:1 * H]
                f_g = act[:, 1 * H:2 * H]
                g_g = act[:, 2 * H:3 * H]
                o_g = act[:, 3 * H:4 * H]
                c_new = f_g * c + i_g * g_g
                h_new = o_g * jnp.tanh(c_new)
                if write_seq:   # only layers that feed another layer record h_t
                    seq_sc[t] = h_new
                return (h_new, c_new)

            h_fin, c_fin = jax.lax.fori_loop(0, Tc, step, (h_sc[l], c_sc[l]),
                                             unroll=unroll)
            h_sc[l] = h_fin
            c_sc[l] = c_fin
            return h_fin

        # Layer 0 reads the embedded chunk; layers 1.. read/overwrite seq_sc.
        h_last = run_layer(0, x0, *layer_refs[0:3], write_seq=(n_layers > 1))
        for l in range(1, n_layers):
            # seq_sc is fully consumed by the batched matmul (into gp_sc) before
            # this layer's loop overwrites it -> no RAW hazard within a chunk.
            xin = seq_sc[...].reshape(Tc * Bp, H).astype(jnp.bfloat16)
            h_last = run_layer(l, xin, *layer_refs[3 * l:3 * l + 3],
                               write_seq=(l < n_layers - 1))

        # Linear(H -> 1) + sigmoid head on the final hidden state of the last
        # layer, only at the last time chunk. VPU multiply + XLU lane reduce.
        @pl.when(ci == pl.num_programs(0) - 1)
        def _head():
            logits = (jnp.sum(h_last * hw_ref[...], axis=-1, keepdims=True)
                      + hb_ref[0, 0])
            o_ref[...] = _sigmoid(logits)

    return kernel


def critic_fused_call(tok_col, emb, lstm_params, head_w, head_b, *, batch_padded):
    """tok_col: (T*Bp, 1) int32 time-major padded tokens -> (Bp, 1) f32 output."""
    TBp = tok_col.shape[0]
    Bp = batch_padded
    T = TBp // Bp
    L = len(lstm_params)
    H = lstm_params[0]["wh"].shape[0]
    vocab, D = emb.shape
    Tc = _pick_time_chunk(T)
    n_chunks = T // Tc
    unroll = Tc if Tc <= 16 else 8     # partial unroll for long chunks (vregs/imem)

    in_specs = [
        pl.BlockSpec((Tc * Bp, 1), lambda c: (c, 0)),           # tokens, per chunk
        pl.BlockSpec((vocab, D), lambda c: (0, 0)),             # embedding (resident)
    ]
    flat_weights = []
    for lp in lstm_params:
        din = lp["wx"].shape[0]
        in_specs += [
            pl.BlockSpec((din, 4 * H), lambda c: (0, 0)),       # W_ih^T  (bf16)
            pl.BlockSpec((H, 4 * H), lambda c: (0, 0)),         # W_hh^T  (bf16)
            pl.BlockSpec((1, 4 * H), lambda c: (0, 0)),         # bias    (f32)
        ]
        flat_weights += [lp["wx"], lp["wh"], lp["b"]]
    in_specs += [
        pl.BlockSpec((1, H), lambda c: (0, 0)),                        # head weight
        pl.BlockSpec(memory_space=pltpu.MemorySpace.SMEM),             # head bias
    ]

    scratch_shapes = [
        pltpu.VMEM((L, Bp, H), jnp.float32),        # per-layer h carry (across chunks)
        pltpu.VMEM((L, Bp, H), jnp.float32),        # per-layer c carry (across chunks)
        pltpu.VMEM((Tc, Bp, H), jnp.float32),       # inter-layer activations (chunk)
        pltpu.VMEM((Tc, Bp, 4 * H), jnp.float32),   # gate pre-activations (chunk)
    ]

    # VMEM budget: weights + chunk-bounded scratch + double-buffered streamed blocks.
    est = 2 * _nbytes((Tc * Bp, 1), jnp.int32) + _nbytes(emb.shape, emb.dtype)
    for lp in lstm_params:
        est += (_nbytes(lp["wx"].shape, lp["wx"].dtype)
                + _nbytes(lp["wh"].shape, lp["wh"].dtype)
                + _nbytes(lp["b"].shape, lp["b"].dtype))
    est += _nbytes(head_w.shape, head_w.dtype) + 2 * _nbytes((Bp, 1), jnp.float32)
    est += (2 * _nbytes((L, Bp, H), jnp.float32)
            + _nbytes((Tc, Bp, H), jnp.float32)
            + _nbytes((Tc, Bp, 4 * H), jnp.float32))
    vmem_limit = int(min(64 << 20, max(16 << 20, 2 * est)))

    return pl.pallas_call(
        _make_fused_kernel(L, Tc, Bp, H, D, vocab, unroll),
        out_shape=jax.ShapeDtypeStruct((Bp, 1), jnp.float32),
        grid=(n_chunks,),
        in_specs=in_specs,
        out_specs=pl.BlockSpec((Bp, 1), lambda c: (0, 0)),
        scratch_shapes=scratch_shapes,
        compiler_params=pltpu.CompilerParams(
            dimension_semantics=("arbitrary",),   # time chunks are a serial recurrence
            vmem_limit_bytes=vmem_limit,
        ),
    )(tok_col, emb, *flat_weights, head_w, head_b)


# ----------------------------- model wrapper ------------------------------------

def init_params(key, vocab_size, embedding_dim, n_hidden, n_layers):
    """nn.Embedding default N(0,1); LSTM/Linear uniform(-1/sqrt(H), 1/sqrt(H)).
    MXU-operand tensors (embedding, W_ih, W_hh) are stored in bf16."""
    params = {}
    key, k_emb = jax.random.split(key)
    emb = jax.random.normal(k_emb, (vocab_size, embedding_dim), jnp.float32)
    params["embedding"] = emb.astype(jnp.bfloat16)
    bound = 1.0 / (n_hidden ** 0.5)
    lstm = []
    for layer in range(n_layers):
        din = embedding_dim if layer == 0 else n_hidden
        key, k1, k2, k3, k4 = jax.random.split(key, 5)
        w_ih = jax.random.uniform(k1, (4 * n_hidden, din), jnp.float32, -bound, bound)
        w_hh = jax.random.uniform(k2, (4 * n_hidden, n_hidden), jnp.float32, -bound, bound)
        b_ih = jax.random.uniform(k3, (4 * n_hidden,), jnp.float32, -bound, bound)
        b_hh = jax.random.uniform(k4, (4 * n_hidden,), jnp.float32, -bound, bound)
        lstm.append({
            "wx": w_ih.T.astype(jnp.bfloat16),               # (D_in, 4H) bf16
            "wh": w_hh.T.astype(jnp.bfloat16),                # (H, 4H)   bf16
            "b": (b_ih + b_hh).reshape(1, 4 * n_hidden),      # (1, 4H)   f32
        })
    params["lstm"] = lstm
    key, k5, k6 = jax.random.split(key, 3)
    params["head_w"] = jax.random.uniform(k5, (1, n_hidden), jnp.float32, -bound, bound)
    params["head_b"] = jax.random.uniform(k6, (1, 1), jnp.float32, -bound, bound)
    return params


@jax.jit
def critic_forward(params, tokens):
    """tokens: (B, T) int32 -> (B, 1) f32 sigmoid outputs."""
    B, T = tokens.shape
    Bp = max(8, ((B + 7) // 8) * 8)                # pad batch to sublane multiple
    tok_tm = jnp.transpose(tokens)                  # (T, B) time-major
    tok_tm = jnp.pad(tok_tm, ((0, 0), (0, Bp - B)))  # (T, Bp), pad rows use token 0
    tok_col = tok_tm.reshape(T * Bp, 1).astype(jnp.int32)
    out = critic_fused_call(tok_col, params["embedding"], params["lstm"],
                            params["head_w"], params["head_b"], batch_padded=Bp)
    return out[:B]


# ------------------------ pure-JAX reference (check) -----------------------------
# Mirrors the kernel's precision scheme (bf16 MXU operands, f32 accumulate,
# f32 elementwise, bf16 inter-layer activations) so the tolerance stays tight.

def _reference_forward(params, tokens):
    emb = jnp.take(params["embedding"], tokens, axis=0)     # (B, T, D) bf16
    x = jnp.transpose(emb, (1, 0, 2))                        # (T, B, D) bf16
    B = tokens.shape[0]
    h_fin = None
    for lp in params["lstm"]:
        H = lp["wh"].shape[0]
        h0 = jnp.zeros((B, H), jnp.float32)
        c0 = jnp.zeros((B, H), jnp.float32)

        def step(carry, x_t, lp=lp, H=H):
            h, c = carry
            gates = (jnp.dot(x_t, lp["wx"], preferred_element_type=jnp.float32)
                     + jnp.dot(h.astype(jnp.bfloat16), lp["wh"],
                               preferred_element_type=jnp.float32)
                     + lp["b"])
            i = jax.nn.sigmoid(gates[:, 0 * H:1 * H])
            f = jax.nn.sigmoid(gates[:, 1 * H:2 * H])
            g = jnp.tanh(gates[:, 2 * H:3 * H])
            o = jax.nn.sigmoid(gates[:, 3 * H:4 * H])
            c = f * c + i * g
            h = o * jnp.tanh(c)
            return (h, c), h.astype(jnp.bfloat16)

        (h_fin, _), hs = jax.lax.scan(step, (h0, c0), x)
        x = hs                                              # (T, B, H) bf16
    out = h_fin @ params["head_w"].T + params["head_b"]
    return jax.nn.sigmoid(out)


if __name__ == "__main__":
    vocab_size = 32
    embedding_dim = 16
    n_hidden = 32
    n_layers = 3
    batch = 2
    seq = 8

    key = jax.random.PRNGKey(0)
    key, k_params, k_tok = jax.random.split(key, 3)
    params = init_params(k_params, vocab_size, embedding_dim, n_hidden, n_layers)
    tokens = jax.random.randint(k_tok, (batch, seq), 0, vocab_size, dtype=jnp.int32)

    out = jax.block_until_ready(critic_forward(params, tokens))
    ref = jax.block_until_ready(_reference_forward(params, tokens))

    assert out.shape == (batch, 1), out.shape
    assert jnp.allclose(out, ref, atol=2e-3, rtol=2e-3), (out, ref)

    print("KERNEL_OK")
</pallas_src>

<mosaic_0001>
module attributes {stable_mosaic.version = 11 : i64} {
  func.func @kernel(%arg0: i32, %arg1: memref<64x1xi32, #tpu.memory_space<vmem>>, %arg2: memref<32x16xbf16, #tpu.memory_space<vmem>>, %arg3: memref<16x128xbf16, #tpu.memory_space<vmem>>, %arg4: memref<32x128xbf16, #tpu.memory_space<vmem>>, %arg5: memref<1x128xf32, #tpu.memory_space<vmem>>, %arg6: memref<32x128xbf16, #tpu.memory_space<vmem>>, %arg7: memref<32x128xbf16, #tpu.memory_space<vmem>>, %arg8: memref<1x128xf32, #tpu.memory_space<vmem>>, %arg9: memref<32x128xbf16, #tpu.memory_space<vmem>>, %arg10: memref<32x128xbf16, #tpu.memory_space<vmem>>, %arg11: memref<1x128xf32, #tpu.memory_space<vmem>>, %arg12: memref<1x32xf32, #tpu.memory_space<vmem>>, %arg13: memref<1x1xf32, #tpu.memory_space<smem>>, %arg14: memref<8x1xf32, #tpu.memory_space<vmem>>, %arg15: memref<3x8x32xf32, #tpu.memory_space<vmem>>, %arg16: memref<3x8x32xf32, #tpu.memory_space<vmem>>, %arg17: memref<8x8x32xf32, #tpu.memory_space<vmem>>, %arg18: memref<8x8x128xf32, #tpu.memory_space<vmem>>) attributes {dimension_semantics = [#tpu.dimension_semantics<arbitrary>], iteration_bounds = array<i64: 1>, scalar_prefetch = 0 : i64, scratch_operands = 4 : i64, tpu.core_type = #tpu.core_type<tc>, window_params = [{transform_indices = @transform_0, window_bounds = array<i64: 64, 1>}, {pipeline_mode = #tpu.pipeline_mode<synchronous>, transform_indices = @transform_1, window_bounds = array<i64: 32, 16>}, {pipeline_mode = #tpu.pipeline_mode<synchronous>, transform_indices = @transform_2, window_bounds = array<i64: 16, 128>}, {pipeline_mode = #tpu.pipeline_mode<synchronous>, transform_indices = @transform_3, window_bounds = array<i64: 32, 128>}, {pipeline_mode = #tpu.pipeline_mode<synchronous>, transform_indices = @transform_4, window_bounds = array<i64: 1, 128>}, {pipeline_mode = #tpu.pipeline_mode<synchronous>, transform_indices = @transform_5, window_bounds = array<i64: 32, 128>}, {pipeline_mode = #tpu.pipeline_mode<synchronous>, transform_indices = @transform_6, window_bounds = array<i64: 32, 128>}, {pipeline_mode = #tpu.pipeline_mode<synchronous>, transform_indices = @transform_7, window_bounds = array<i64: 1, 128>}, {pipeline_mode = #tpu.pipeline_mode<synchronous>, transform_indices = @transform_8, window_bounds = array<i64: 32, 128>}, {pipeline_mode = #tpu.pipeline_mode<synchronous>, transform_indices = @transform_9, window_bounds = array<i64: 32, 128>}, {pipeline_mode = #tpu.pipeline_mode<synchronous>, transform_indices = @transform_10, window_bounds = array<i64: 1, 128>}, {pipeline_mode = #tpu.pipeline_mode<synchronous>, transform_indices = @transform_11, window_bounds = array<i64: 1, 32>}, {transform_indices = @transform_12, window_bounds = array<i64: 1, 1>}, {pipeline_mode = #tpu.pipeline_mode<synchronous>, transform_indices = @transform_13, window_bounds = array<i64: 8, 1>}]} {
    %c0_i32 = arith.constant 0 : i32
    %0 = arith.cmpi eq, %arg0, %c0_i32 : i32
    %1 = arith.extui %0 : i1 to i32
    %c0_i32_0 = arith.constant 0 : i32
    %2 = arith.cmpi ne, %1, %c0_i32_0 : i32
    scf.if %2 {
      %cst_251 = arith.constant 0.000000e+00 : f32
      %750 = vector.broadcast %cst_251 : f32 to vector<3x8x32xf32>
      %c0_252 = arith.constant 0 : index
      %c0_253 = arith.constant 0 : index
      %c0_254 = arith.constant 0 : index
      %751 = vector.load %arg15[%c0_252, %c0_253, %c0_254] : memref<3x8x32xf32, #tpu.memory_space<vmem>>, vector<3x8x32xf32>
      tpu.vector_store %arg15[%c0_252, %c0_253, %c0_254], %750 {strides = array<i32>} : memref<3x8x32xf32, #tpu.memory_space<vmem>>, vector<3x8x32xf32>,
      %cst_255 = arith.constant 0.000000e+00 : f32
      %752 = vector.broadcast %cst_255 : f32 to vector<3x8x32xf32>
      %c0_256 = arith.constant 0 : index
      %c0_257 = arith.constant 0 : index
      %c0_258 = arith.constant 0 : index
      %753 = vector.load %arg16[%c0_256, %c0_257, %c0_258] : memref<3x8x32xf32, #tpu.memory_space<vmem>>, vector<3x8x32xf32>
      tpu.vector_store %arg16[%c0_256, %c0_257, %c0_258], %752 {strides = array<i32>} : memref<3x8x32xf32, #tpu.memory_space<vmem>>, vector<3x8x32xf32>,
    } else {
    }
    %3 = tpu.iota {dimensions = array<i32: 1>} : vector<1x128xi32>
    %c64_i32 = arith.constant 64 : i32
    %4 = vector.broadcast %c64_i32 : i32 to vector<1x128xi32>
    %5 = arith.cmpi sge, %3, %4 : vector<1x128xi32>
    %c96_i32 = arith.constant 96 : i32
    %6 = vector.broadcast %c96_i32 : i32 to vector<1x128xi32>
    %7 = arith.cmpi slt, %3, %6 : vector<1x128xi32>
    %8 = arith.andi %5, %7 : vector<1x128xi1>
    %cst = arith.constant 1.000000e+00 : f32
    %cst_1 = arith.constant 5.000000e-01 : f32
    %9 = vector.broadcast %cst : f32 to vector<1x128xf32>
    %10 = vector.broadcast %cst_1 : f32 to vector<1x128xf32>
    %11 = arith.select %8, %9, %10 : vector<1x128xi1>, vector<1x128xf32>
    %c0 = arith.constant 0 : index
    %c0_2 = arith.constant 0 : index
    %12 = vector.load %arg1[%c0, %c0_2] : memref<64x1xi32, #tpu.memory_space<vmem>>, vector<64x1xi32>
    %13 = tpu.iota {dimensions = array<i32: 1>} : vector<64x32xi32>
    %14 = vector.broadcast %12 : vector<64x1xi32> to vector<64x32xi32>
    %15 = arith.cmpi eq, %13, %14 : vector<64x32xi32>
    %cst_3 = arith.constant 1.000000e+00 : f32
    %cst_4 = arith.constant 0.000000e+00 : f32
    %16 = vector.broadcast %cst_3 : f32 to vector<64x32xf32>
    %17 = vector.broadcast %cst_4 : f32 to vector<64x32xf32>
    %18 = arith.select %15, %16, %17 : vector<64x32xi1>, vector<64x32xf32>
    %19 = arith.truncf %18 : vector<64x32xf32> to vector<64x32xbf16>
    %c0_5 = arith.constant 0 : index
    %c0_6 = arith.constant 0 : index
    %20 = vector.load %arg2[%c0_5, %c0_6] : memref<32x16xbf16, #tpu.memory_space<vmem>>, vector<32x16xbf16>
    %cst_7 = arith.constant dense<0.000000e+00> : vector<64x16xf32>
    %21 = tpu.matmul %19, %20, %cst_7 {dimension_numbers = #tpu.dot_dimension_numbers<[1], [0], [0], [1], [0, 0, 1, 1], [], []>} : vector<64x32xbf16>, vector<32x16xbf16>, vector<64x16xf32> -> vector<64x16xf32>
    %22 = arith.truncf %21 : vector<64x16xf32> to vector<64x16xbf16>
    %c0_8 = arith.constant 0 : index
    %c0_9 = arith.constant 0 : index
    %23 = vector.load %arg3[%c0_8, %c0_9] : memref<16x128xbf16, #tpu.memory_space<vmem>>, vector<16x128xbf16>
    %cst_10 = arith.constant dense<0.000000e+00> : vector<64x128xf32>
    %24 = tpu.matmul %22, %23, %cst_10 {dimension_numbers = #tpu.dot_dimension_numbers<[1], [0], [0], [1], [0, 0, 1, 1], [], []>} : vector<64x16xbf16>, vector<16x128xbf16>, vector<64x128xf32> -> vector<64x128xf32>
    %c0_11 = arith.constant 0 : index
    %c0_12 = arith.constant 0 : index
    %25 = vector.load %arg5[%c0_11, %c0_12] : memref<1x128xf32, #tpu.memory_space<vmem>>, vector<1x128xf32>
    %26 = vector.broadcast %25 : vector<1x128xf32> to vector<64x128xf32>
    %27 = arith.addf %24, %26 : vector<64x128xf32>
    %28 = vector.shape_cast %27 : vector<64x128xf32> to vector<8x8x128xf32>
    %c0_13 = arith.constant 0 : index
    %c0_14 = arith.constant 0 : index
    %c0_15 = arith.constant 0 : index
    %29 = vector.load %arg18[%c0_13, %c0_14, %c0_15] : memref<8x8x128xf32, #tpu.memory_space<vmem>>, vector<8x8x128xf32>
    tpu.vector_store %arg18[%c0_13, %c0_14, %c0_15], %28 {strides = array<i32>} : memref<8x8x128xf32, #tpu.memory_space<vmem>>, vector<8x8x128xf32>,
    %c0_16 = arith.constant 0 : index
    %c0_17 = arith.constant 0 : index
    %30 = vector.load %arg4[%c0_16, %c0_17] : memref<32x128xbf16, #tpu.memory_space<vmem>>, vector<32x128xbf16>
    %c0_18 = arith.constant 0 : index
    %c0_19 = arith.constant 0 : index
    %c0_20 = arith.constant 0 : index
    %31 = vector.load %arg15[%c0_18, %c0_19, %c0_20] : memref<3x8x32xf32, #tpu.memory_space<vmem>>, vector<1x8x32xf32>
    %32 = vector.shape_cast %31 : vector<1x8x32xf32> to vector<8x32xf32>
    %c0_21 = arith.constant 0 : index
    %c0_22 = arith.constant 0 : index
    %c0_23 = arith.constant 0 : index
    %33 = vector.load %arg16[%c0_21, %c0_22, %c0_23] : memref<3x8x32xf32, #tpu.memory_space<vmem>>, vector<1x8x32xf32>
    %34 = vector.shape_cast %33 : vector<1x8x32xf32> to vector<8x32xf32>
    %c0_i32_24 = arith.constant 0 : i32
    %35 = arith.index_cast %c0_i32_24 : i32 to index
    %c0_25 = arith.constant 0 : index
    %c0_26 = arith.constant 0 : index
    %36 = vector.load %arg18[%35, %c0_25, %c0_26] : memref<8x8x128xf32, #tpu.memory_space<vmem>>, vector<1x8x128xf32>
    %37 = vector.shape_cast %36 : vector<1x8x128xf32> to vector<8x128xf32>
    %38 = arith.truncf %32 : vector<8x32xf32> to vector<8x32xbf16>
    %cst_27 = arith.constant dense<0.000000e+00> : vector<8x128xf32>
    %39 = tpu.matmul %38, %30, %cst_27 {dimension_numbers = #tpu.dot_dimension_numbers<[1], [0], [0], [1], [0, 0, 1, 1], [], []>} : vector<8x32xbf16>, vector<32x128xbf16>, vector<8x128xf32> -> vector<8x128xf32>
    %40 = arith.addf %37, %39 : vector<8x128xf32>
    %41 = vector.broadcast %11 : vector<1x128xf32> to vector<8x128xf32>
    %42 = arith.mulf %40, %41 : vector<8x128xf32>
    %43 = math.tanh %42 : vector<8x128xf32>
    %cst_28 = arith.constant 5.000000e-01 : f32
    %44 = vector.broadcast %cst_28 : f32 to vector<8x128xf32>
    %45 = arith.mulf %44, %43 : vector<8x128xf32>
    %cst_29 = arith.constant 5.000000e-01 : f32
    %46 = vector.broadcast %cst_29 : f32 to vector<8x128xf32>
    %47 = arith.addf %45, %46 : vector<8x128xf32>
    %48 = vector.shape_cast %8 : vector<1x128xi1> to vector<1x128xi1>
    %49 = vector.broadcast %48 : vector<1x128xi1> to vector<8x128xi1>
    %50 = arith.select %49, %43, %47 : vector<8x128xi1>, vector<8x128xf32>
    %51 = vector.extract_strided_slice %50 {offsets = [0, 0], sizes = [8, 32], strides = [1, 1]} : vector<8x128xf32> to vector<8x32xf32>
    %52 = vector.extract_strided_slice %50 {offsets = [0, 32], sizes = [8, 32], strides = [1, 1]} : vector<8x128xf32> to vector<8x32xf32>
    %53 = vector.extract_strided_slice %50 {offsets = [0, 64], sizes = [8, 32], strides = [1, 1]} : vector<8x128xf32> to vector<8x32xf32>
    %54 = vector.extract_strided_slice %50 {offsets = [0, 96], sizes = [8, 32], strides = [1, 1]} : vector<8x128xf32> to vector<8x32xf32>
    %55 = arith.mulf %52, %34 : vector<8x32xf32>
    %56 = arith.mulf %51, %53 : vector<8x32xf32>
    %57 = arith.addf %55, %56 : vector<8x32xf32>
    %58 = math.tanh %57 : vector<8x32xf32>
    %59 = arith.mulf %54, %58 : vector<8x32xf32>
    %60 = arith.index_cast %c0_i32_24 : i32 to index
    %c0_30 = arith.constant 0 : index
    %c0_31 = arith.constant 0 : index
    %61 = vector.load %arg17[%60, %c0_30, %c0_31] : memref<8x8x32xf32, #tpu.memory_space<vmem>>, vector<1x8x32xf32>
    %62 = vector.shape_cast %61 : vector<1x8x32xf32> to vector<8x32xf32>
    %63 = vector.shape_cast %59 : vector<8x32xf32> to vector<1x8x32xf32>
    tpu.vector_store %arg17[%60, %c0_30, %c0_31], %63 {strides = array<i32>} : memref<8x8x32xf32, #tpu.memory_space<vmem>>, vector<1x8x32xf32>,
    %c1_i32 = arith.constant 1 : i32
    %64 = arith.index_cast %c1_i32 : i32 to index
    %c0_32 = arith.constant 0 : index
    %c0_33 = arith.constant 0 : index
    %65 = vector.load %arg18[%64, %c0_32, %c0_33] : memref<8x8x128xf32, #tpu.memory_space<vmem>>, vector<1x8x128xf32>
    %66 = vector.shape_cast %65 : vector<1x8x128xf32> to vector<8x128xf32>
    %67 = arith.truncf %59 : vector<8x32xf32> to vector<8x32xbf16>
    %cst_34 = arith.constant dense<0.000000e+00> : vector<8x128xf32>
    %68 = tpu.matmul %67, %30, %cst_34 {dimension_numbers = #tpu.dot_dimension_numbers<[1], [0], [0], [1], [0, 0, 1, 1], [], []>} : vector<8x32xbf16>, vector<32x128xbf16>, vector<8x128xf32> -> vector<8x128xf32>
    %69 = arith.addf %66, %68 : vector<8x128xf32>
    %70 = vector.broadcast %11 : vector<1x128xf32> to vector<8x128xf32>
    %71 = arith.mulf %69, %70 : vector<8x128xf32>
    %72 = math.tanh %71 : vector<8x128xf32>
    %cst_35 = arith.constant 5.000000e-01 : f32
    %73 = vector.broadcast %cst_35 : f32 to vector<8x128xf32>
    %74 = arith.mulf %73, %72 : vector<8x128xf32>
    %cst_36 = arith.constant 5.000000e-01 : f32
    %75 = vector.broadcast %cst_36 : f32 to vector<8x128xf32>
    %76 = arith.addf %74, %75 : vector<8x128xf32>
    %77 = vector.shape_cast %8 : vector<1x128xi1> to vector<1x128xi1>
    %78 = vector.broadcast %77 : vector<1x128xi1> to vector<8x128xi1>
    %79 = arith.select %78, %72, %76 : vector<8x128xi1>, vector<8x128xf32>
    %80 = vector.extract_strided_slice %79 {offsets = [0, 0], sizes = [8, 32], strides = [1, 1]} : vector<8x128xf32> to vector<8x32xf32>
    %81 = vector.extract_strided_slice %79 {offsets = [0, 32], sizes = [8, 32], strides = [1, 1]} : vector<8x128xf32> to vector<8x32xf32>
    %82 = vector.extract_strided_slice %79 {offsets = [0, 64], sizes = [8, 32], strides = [1, 1]} : vector<8x128xf32> to vector<8x32xf32>
    %83 = vector.extract_strided_slice %79 {offsets = [0, 96], sizes = [8, 32], strides = [1, 1]} : vector<8x128xf32> to vector<8x32xf32>
    %84 = arith.mulf %81, %57 : vector<8x32xf32>
    %85 = arith.mulf %80, %82 : vector<8x32xf32>
    %86 = arith.addf %84, %85 : vector<8x32xf32>
    %87 = math.tanh %86 : vector<8x32xf32>
    %88 = arith.mulf %83, %87 : vector<8x32xf32>
    %89 = arith.index_cast %c1_i32 : i32 to index
    %c0_37 = arith.constant 0 : index
    %c0_38 = arith.constant 0 : index
    %90 = vector.load %arg17[%89, %c0_37, %c0_38] : memref<8x8x32xf32, #tpu.memory_space<vmem>>, vector<1x8x32xf32>
    %91 = vector.shape_cast %90 : vector<1x8x32xf32> to vector<8x32xf32>
    %92 = vector.shape_cast %88 : vector<8x32xf32> to vector<1x8x32xf32>
    tpu.vector_store %arg17[%89, %c0_37, %c0_38], %92 {strides = array<i32>} : memref<8x8x32xf32, #tpu.memory_space<vmem>>, vector<1x8x32xf32>,
    %c2_i32 = arith.constant 2 : i32
    %93 = arith.index_cast %c2_i32 : i32 to index
    %c0_39 = arith.constant 0 : index
    %c0_40 = arith.constant 0 : index
    %94 = vector.load %arg18[%93, %c0_39, %c0_40] : memref<8x8x128xf32, #tpu.memory_space<vmem>>, vector<1x8x128xf32>
    %95 = vector.shape_cast %94 : vector<1x8x128xf32> to vector<8x128xf32>
    %96 = arith.truncf %88 : vector<8x32xf32> to vector<8x32xbf16>
    %cst_41 = arith.constant dense<0.000000e+00> : vector<8x128xf32>
    %97 = tpu.matmul %96, %30, %cst_41 {dimension_numbers = #tpu.dot_dimension_numbers<[1], [0], [0], [1], [0, 0, 1, 1], [], []>} : vector<8x32xbf16>, vector<32x128xbf16>, vector<8x128xf32> -> vector<8x128xf32>
    %98 = arith.addf %95, %97 : vector<8x128xf32>
    %99 = vector.broadcast %11 : vector<1x128xf32> to vector<8x128xf32>
    %100 = arith.mulf %98, %99 : vector<8x128xf32>
    %101 = math.tanh %100 : vector<8x128xf32>
    %cst_42 = arith.constant 5.000000e-01 : f32
    %102 = vector.broadcast %cst_42 : f32 to vector<8x128xf32>
    %103 = arith.mulf %102, %101 : vector<8x128xf32>
    %cst_43 = arith.constant 5.000000e-01 : f32
    %104 = vector.broadcast %cst_43 : f32 to vector<8x128xf32>
    %105 = arith.addf %103, %104 : vector<8x128xf32>
    %106 = vector.shape_cast %8 : vector<1x128xi1> to vector<1x128xi1>
    %107 = vector.broadcast %106 : vector<1x128xi1> to vector<8x128xi1>
    %108 = arith.select %107, %101, %105 : vector<8x128xi1>, vector<8x128xf32>
    %109 = vector.extract_strided_slice %108 {offsets = [0, 0], sizes = [8, 32], strides = [1, 1]} : vector<8x128xf32> to vector<8x32xf32>
    %110 = vector.extract_strided_slice %108 {offsets = [0, 32], sizes = [8, 32], strides = [1, 1]} : vector<8x128xf32> to vector<8x32xf32>
    %111 = vector.extract_strided_slice %108 {offsets = [0, 64], sizes = [8, 32], strides = [1, 1]} : vector<8x128xf32> to vector<8x32xf32>
    %112 = vector.extract_strided_slice %108 {offsets = [0, 96], sizes = [8, 32], strides = [1, 1]} : vector<8x128xf32> to vector<8x32xf32>
    %113 = arith.mulf %110, %86 : vector<8x32xf32>
    %114 = arith.mulf %109, %111 : vector<8x32xf32>
    %115 = arith.addf %113, %114 : vector<8x32xf32>
    %116 = math.tanh %115 : vector<8x32xf32>
    %117 = arith.mulf %112, %116 : vector<8x32xf32>
    %118 = arith.index_cast %c2_i32 : i32 to index
    %c0_44 = arith.constant 0 : index
    %c0_45 = arith.constant 0 : index
    %119 = vector.load %arg17[%118, %c0_44, %c0_45] : memref<8x8x32xf32, #tpu.memory_space<vmem>>, vector<1x8x32xf32>
    %120 = vector.shape_cast %119 : vector<1x8x32xf32> to vector<8x32xf32>
    %121 = vector.shape_cast %117 : vector<8x32xf32> to vector<1x8x32xf32>
    tpu.vector_store %arg17[%118, %c0_44, %c0_45], %121 {strides = array<i32>} : memref<8x8x32xf32, #tpu.memory_space<vmem>>, vector<1x8x32xf32>,
    %c3_i32 = arith.constant 3 : i32
    %122 = arith.index_cast %c3_i32 : i32 to index
    %c0_46 = arith.constant 0 : index
    %c0_47 = arith.constant 0 : index
    %123 = vector.load %arg18[%122, %c0_46, %c0_47] : memref<8x8x128xf32, #tpu.memory_space<vmem>>, vector<1x8x128xf32>
    %124 = vector.shape_cast %123 : vector<1x8x128xf32> to vector<8x128xf32>
    %125 = arith.truncf %117 : vector<8x32xf32> to vector<8x32xbf16>
    %cst_48 = arith.constant dense<0.000000e+00> : vector<8x128xf32>
    %126 = tpu.matmul %125, %30, %cst_48 {dimension_numbers = #tpu.dot_dimension_numbers<[1], [0], [0], [1], [0, 0, 1, 1], [], []>} : vector<8x32xbf16>, vector<32x128xbf16>, vector<8x128xf32> -> vector<8x128xf32>
    %127 = arith.addf %124, %126 : vector<8x128xf32>
    %128 = vector.broadcast %11 : vector<1x128xf32> to vector<8x128xf32>
    %129 = arith.mulf %127, %128 : vector<8x128xf32>
    %130 = math.tanh %129 : vector<8x128xf32>
    %cst_49 = arith.constant 5.000000e-01 : f32
    %131 = vector.broadcast %cst_49 : f32 to vector<8x128xf32>
    %132 = arith.mulf %131, %130 : vector<8x128xf32>
    %cst_50 = arith.constant 5.000000e-01 : f32
    %133 = vector.broadcast %cst_50 : f32 to vector<8x128xf32>
    %134 = arith.addf %132, %133 : vector<8x128xf32>
    %135 = vector.shape_cast %8 : vector<1x128xi1> to vector<1x128xi1>
    %136 = vector.broadcast %135 : vector<1x128xi1> to vector<8x128xi1>
    %137 = arith.select %136, %130, %134 : vector<8x128xi1>, vector<8x128xf32>
    %138 = vector.extract_strided_slice %137 {offsets = [0, 0], sizes = [8, 32], strides = [1, 1]} : vector<8x128xf32> to vector<8x32xf32>
    %139 = vector.extract_strided_slice %137 {offsets = [0, 32], sizes = [8, 32], strides = [1, 1]} : vector<8x128xf32> to vector<8x32xf32>
    %140 = vector.extract_strided_slice %137 {offsets = [0, 64], sizes = [8, 32], strides = [1, 1]} : vector<8x128xf32> to vector<8x32xf32>
    %141 = vector.extract_strided_slice %137 {offsets = [0, 96], sizes = [8, 32], strides = [1, 1]} : vector<8x128xf32> to vector<8x32xf32>
    %142 = arith.mulf %139, %115 : vector<8x32xf32>
    %143 = arith.mulf %138, %140 : vector<8x32xf32>
    %144 = arith.addf %142, %143 : vector<8x32xf32>
    %145 = math.tanh %144 : vector<8x32xf32>
    %146 = arith.mulf %141, %145 : vector<8x32xf32>
    %147 = arith.index_cast %c3_i32 : i32 to index
    %c0_51 = arith.constant 0 : index
    %c0_52 = arith.constant 0 : index
    %148 = vector.load %arg17[%147, %c0_51, %c0_52] : memref<8x8x32xf32, #tpu.memory_space<vmem>>, vector<1x8x32xf32>
    %149 = vector.shape_cast %148 : vector<1x8x32xf32> to vector<8x32xf32>
    %150 = vector.shape_cast %146 : vector<8x32xf32> to vector<1x8x32xf32>
    tpu.vector_store %arg17[%147, %c0_51, %c0_52], %150 {strides = array<i32>} : memref<8x8x32xf32, #tpu.memory_space<vmem>>, vector<1x8x32xf32>,
    %c4_i32 = arith.constant 4 : i32
    %151 = arith.index_cast %c4_i32 : i32 to index
    %c0_53 = arith.constant 0 : index
    %c0_54 = arith.constant 0 : index
    %152 = vector.load %arg18[%151, %c0_53, %c0_54] : memref<8x8x128xf32, #tpu.memory_space<vmem>>, vector<1x8x128xf32>
    %153 = vector.shape_cast %152 : vector<1x8x128xf32> to vector<8x128xf32>
    %154 = arith.truncf %146 : vector<8x32xf32> to vector<8x32xbf16>
    %cst_55 = arith.constant dense<0.000000e+00> : vector<8x128xf32>
    %155 = tpu.matmul %154, %30, %cst_55 {dimension_numbers = #tpu.dot_dimension_numbers<[1], [0], [0], [1], [0, 0, 1, 1], [], []>} : vector<8x32xbf16>, vector<32x128xbf16>, vector<8x128xf32> -> vector<8x128xf32>
    %156 = arith.addf %153, %155 : vector<8x128xf32>
    %157 = vector.broadcast %11 : vector<1x128xf32> to vector<8x128xf32>
    %158 = arith.mulf %156, %157 : vector<8x128xf32>
    %159 = math.tanh %158 : vector<8x128xf32>
    %cst_56 = arith.constant 5.000000e-01 : f32
    %160 = vector.broadcast %cst_56 : f32 to vector<8x128xf32>
    %161 = arith.mulf %160, %159 : vector<8x128xf32>
    %cst_57 = arith.constant 5.000000e-01 : f32
    %162 = vector.broadcast %cst_57 : f32 to vector<8x128xf32>
    %163 = arith.addf %161, %162 : vector<8x128xf32>
    %164 = vector.shape_cast %8 : vector<1x128xi1> to vector<1x128xi1>
    %165 = vector.broadcast %164 : vector<1x128xi1> to vector<8x128xi1>
    %166 = arith.select %165, %159, %163 : vector<8x128xi1>, vector<8x128xf32>
    %167 = vector.extract_strided_slice %166 {offsets = [0, 0], sizes = [8, 32], strides = [1, 1]} : vector<8x128xf32> to vector<8x32xf32>
    %168 = vector.extract_strided_slice %166 {offsets = [0, 32], sizes = [8, 32], strides = [1, 1]} : vector<8x128xf32> to vector<8x32xf32>
    %169 = vector.extract_strided_slice %166 {offsets = [0, 64], sizes = [8, 32], strides = [1, 1]} : vector<8x128xf32> to vector<8x32xf32>
    %170 = vector.extract_strided_slice %166 {offsets = [0, 96], sizes = [8, 32], strides = [1, 1]} : vector<8x128xf32> to vector<8x32xf32>
    %171 = arith.mulf %168, %144 : vector<8x32xf32>
    %172 = arith.mulf %167, %169 : vector<8x32xf32>
    %173 = arith.addf %171, %172 : vector<8x32xf32>
    %174 = math.tanh %173 : vector<8x32xf32>
    %175 = arith.mulf %170, %174 : vector<8x32xf32>
    %176 = arith.index_cast %c4_i32 : i32 to index
    %c0_58 = arith.constant 0 : index
    %c0_59 = arith.constant 0 : index
    %177 = vector.load %arg17[%176, %c0_58, %c0_59] : memref<8x8x32xf32, #tpu.memory_space<vmem>>, vector<1x8x32xf32>
    %178 = vector.shape_cast %177 : vector<1x8x32xf32> to vector<8x32xf32>
    %179 = vector.shape_cast %175 : vector<8x32xf32> to vector<1x8x32xf32>
    tpu.vector_store %arg17[%176, %c0_58, %c0_59], %179 {strides = array<i32>} : memref<8x8x32xf32, #tpu.memory_space<vmem>>, vector<1x8x32xf32>,
    %c5_i32 = arith.constant 5 : i32
    %180 = arith.index_cast %c5_i32 : i32 to index
    %c0_60 = arith.constant 0 : index
    %c0_61 = arith.constant 0 : index
    %181 = vector.load %arg18[%180, %c0_60, %c0_61] : memref<8x8x128xf32, #tpu.memory_space<vmem>>, vector<1x8x128xf32>
    %182 = vector.shape_cast %181 : vector<1x8x128xf32> to vector<8x128xf32>
    %183 = arith.truncf %175 : vector<8x32xf32> to vector<8x32xbf16>
    %cst_62 = arith.constant dense<0.000000e+00> : vector<8x128xf32>
    %184 = tpu.matmul %183, %30, %cst_62 {dimension_numbers = #tpu.dot_dimension_numbers<[1], [0], [0], [1], [0, 0, 1, 1], [], []>} : vector<8x32xbf16>, vector<32x128xbf16>, vector<8x128xf32> -> vector<8x128xf32>
    %185 = arith.addf %182, %184 : vector<8x128xf32>
    %186 = vector.broadcast %11 : vector<1x128xf32> to vector<8x128xf32>
    %187 = arith.mulf %185, %186 : vector<8x128xf32>
    %188 = math.tanh %187 : vector<8x128xf32>
    %cst_63 = arith.constant 5.000000e-01 : f32
    %189 = vector.broadcast %cst_63 : f32 to vector<8x128xf32>
    %190 = arith.mulf %189, %188 : vector<8x128xf32>
    %cst_64 = arith.constant 5.000000e-01 : f32
    %191 = vector.broadcast %cst_64 : f32 to vector<8x128xf32>
    %192 = arith.addf %190, %191 : vector<8x128xf32>
    %193 = vector.shape_cast %8 : vector<1x128xi1> to vector<1x128xi1>
    %194 = vector.broadcast %193 : vector<1x128xi1> to vector<8x128xi1>
    %195 = arith.select %194, %188, %192 : vector<8x128xi1>, vector<8x128xf32>
    %196 = vector.extract_strided_slice %195 {offsets = [0, 0], sizes = [8, 32], strides = [1, 1]} : vector<8x128xf32> to vector<8x32xf32>
    %197 = vector.extract_strided_slice %195 {offsets = [0, 32], sizes = [8, 32], strides = [1, 1]} : vector<8x128xf32> to vector<8x32xf32>
    %198 = vector.extract_strided_slice %195 {offsets = [0, 64], sizes = [8, 32], strides = [1, 1]} : vector<8x128xf32> to vector<8x32xf32>
    %199 = vector.extract_strided_slice %195 {offsets = [0, 96], sizes = [8, 32], strides = [1, 1]} : vector<8x128xf32> to vector<8x32xf32>
    %200 = arith.mulf %197, %173 : vector<8x32xf32>
    %201 = arith.mulf %196, %198 : vector<8x32xf32>
    %202 = arith.addf %200, %201 : vector<8x32xf32>
    %203 = math.tanh %202 : vector<8x32xf32>
    %204 = arith.mulf %199, %203 : vector<8x32xf32>
    %205 = arith.index_cast %c5_i32 : i32 to index
    %c0_65 = arith.constant 0 : index
    %c0_66 = arith.constant 0 : index
    %206 = vector.load %arg17[%205, %c0_65, %c0_66] : memref<8x8x32xf32, #tpu.memory_space<vmem>>, vector<1x8x32xf32>
    %207 = vector.shape_cast %206 : vector<1x8x32xf32> to vector<8x32xf32>
    %208 = vector.shape_cast %204 : vector<8x32xf32> to vector<1x8x32xf32>
    tpu.vector_store %arg17[%205, %c0_65, %c0_66], %208 {strides = array<i32>} : memref<8x8x32xf32, #tpu.memory_space<vmem>>, vector<1x8x32xf32>,
    %c6_i32 = arith.constant 6 : i32
    %209 = arith.index_cast %c6_i32 : i32 to index
    %c0_67 = arith.constant 0 : index
    %c0_68 = arith.constant 0 : index
    %210 = vector.load %arg18[%209, %c0_67, %c0_68] : memref<8x8x128xf32, #tpu.memory_space<vmem>>, vector<1x8x128xf32>
    %211 = vector.shape_cast %210 : vector<1x8x128xf32> to vector<8x128xf32>
    %212 = arith.truncf %204 : vector<8x32xf32> to vector<8x32xbf16>
    %cst_69 = arith.constant dense<0.000000e+00> : vector<8x128xf32>
    %213 = tpu.matmul %212, %30, %cst_69 {dimension_numbers = #tpu.dot_dimension_numbers<[1], [0], [0], [1], [0, 0, 1, 1], [], []>} : vector<8x32xbf16>, vector<32x128xbf16>, vector<8x128xf32> -> vector<8x128xf32>
    %214 = arith.addf %211, %213 : vector<8x128xf32>
    %215 = vector.broadcast %11 : vector<1x128xf32> to vector<8x128xf32>
    %216 = arith.mulf %214, %215 : vector<8x128xf32>
    %217 = math.tanh %216 : vector<8x128xf32>
    %cst_70 = arith.constant 5.000000e-01 : f32
    %218 = vector.broadcast %cst_70 : f32 to vector<8x128xf32>
    %219 = arith.mulf %218, %217 : vector<8x128xf32>
    %cst_71 = arith.constant 5.000000e-01 : f32
    %220 = vector.broadcast %cst_71 : f32 to vector<8x128xf32>
    %221 = arith.addf %219, %220 : vector<8x128xf32>
    %222 = vector.shape_cast %8 : vector<1x128xi1> to vector<1x128xi1>
    %223 = vector.broadcast %222 : vector<1x128xi1> to vector<8x128xi1>
    %224 = arith.select %223, %217, %221 : vector<8x128xi1>, vector<8x128xf32>
    %225 = vector.extract_strided_slice %224 {offsets = [0, 0], sizes = [8, 32], strides = [1, 1]} : vector<8x128xf32> to vector<8x32xf32>
    %226 = vector.extract_strided_slice %224 {offsets = [0, 32], sizes = [8, 32], strides = [1, 1]} : vector<8x128xf32> to vector<8x32xf32>
    %227 = vector.extract_strided_slice %224 {offsets = [0, 64], sizes = [8, 32], strides = [1, 1]} : vector<8x128xf32> to vector<8x32xf32>
    %228 = vector.extract_strided_slice %224 {offsets = [0, 96], sizes = [8, 32], strides = [1, 1]} : vector<8x128xf32> to vector<8x32xf32>
    %229 = arith.mulf %226, %202 : vector<8x32xf32>
    %230 = arith.mulf %225, %227 : vector<8x32xf32>
    %231 = arith.addf %229, %230 : vector<8x32xf32>
    %232 = math.tanh %231 : vector<8x32xf32>
    %233 = arith.mulf %228, %232 : vector<8x32xf32>
    %234 = arith.index_cast %c6_i32 : i32 to index
    %c0_72 = arith.constant 0 : index
    %c0_73 = arith.constant 0 : index
    %235 = vector.load %arg17[%234, %c0_72, %c0_73] : memref<8x8x32xf32, #tpu.memory_space<vmem>>, vector<1x8x32xf32>
    %236 = vector.shape_cast %235 : vector<1x8x32xf32> to vector<8x32xf32>
    %237 = vector.shape_cast %233 : vector<8x32xf32> to vector<1x8x32xf32>
    tpu.vector_store %arg17[%234, %c0_72, %c0_73], %237 {strides = array<i32>} : memref<8x8x32xf32, #tpu.memory_space<vmem>>, vector<1x8x32xf32>,
    %c7_i32 = arith.constant 7 : i32
    %238 = arith.index_cast %c7_i32 : i32 to index
    %c0_74 = arith.constant 0 : index
    %c0_75 = arith.constant 0 : index
    %239 = vector.load %arg18[%238, %c0_74, %c0_75] : memref<8x8x128xf32, #tpu.memory_space<vmem>>, vector<1x8x128xf32>
    %240 = vector.shape_cast %239 : vector<1x8x128xf32> to vector<8x128xf32>
    %241 = arith.truncf %233 : vector<8x32xf32> to vector<8x32xbf16>
    %cst_76 = arith.constant dense<0.000000e+00> : vector<8x128xf32>
    %242 = tpu.matmul %241, %30, %cst_76 {dimension_numbers = #tpu.dot_dimension_numbers<[1], [0], [0], [1], [0, 0, 1, 1], [], []>} : vector<8x32xbf16>, vector<32x128xbf16>, vector<8x128xf32> -> vector<8x128xf32>
    %243 = arith.addf %240, %242 : vector<8x128xf32>
    %244 = vector.broadcast %11 : vector<1x128xf32> to vector<8x128xf32>
    %245 = arith.mulf %243, %244 : vector<8x128xf32>
    %246 = math.tanh %245 : vector<8x128xf32>
    %cst_77 = arith.constant 5.000000e-01 : f32
    %247 = vector.broadcast %cst_77 : f32 to vector<8x128xf32>
    %248 = arith.mulf %247, %246 : vector<8x128xf32>
    %cst_78 = arith.constant 5.000000e-01 : f32
    %249 = vector.broadcast %cst_78 : f32 to vector<8x128xf32>
    %250 = arith.addf %248, %249 : vector<8x128xf32>
    %251 = vector.shape_cast %8 : vector<1x128xi1> to vector<1x128xi1>
    %252 = vector.broadcast %251 : vector<1x128xi1> to vector<8x128xi1>
    %253 = arith.select %252, %246, %250 : vector<8x128xi1>, vector<8x128xf32>
    %254 = vector.extract_strided_slice %253 {offsets = [0, 0], sizes = [8, 32], strides = [1, 1]} : vector<8x128xf32> to vector<8x32xf32>
    %255 = vector.extract_strided_slice %253 {offsets = [0, 32], sizes = [8, 32], strides = [1, 1]} : vector<8x128xf32> to vector<8x32xf32>
    %256 = vector.extract_strided_slice %253 {offsets = [0, 64], sizes = [8, 32], strides = [1, 1]} : vector<8x128xf32> to vector<8x32xf32>
    %257 = vector.extract_strided_slice %253 {offsets = [0, 96], sizes = [8, 32], strides = [1, 1]} : vector<8x128xf32> to vector<8x32xf32>
    %258 = arith.mulf %255, %231 : vector<8x32xf32>
    %259 = arith.mulf %254, %256 : vector<8x32xf32>
    %260 = arith.addf %258, %259 : vector<8x32xf32>
    %261 = math.tanh %260 : vector<8x32xf32>
    %262 = arith.mulf %257, %261 : vector<8x32xf32>
    %263 = arith.index_cast %c7_i32 : i32 to index
    %c0_79 = arith.constant 0 : index
    %c0_80 = arith.constant 0 : index
    %264 = vector.load %arg17[%263, %c0_79, %c0_80] : memref<8x8x32xf32, #tpu.memory_space<vmem>>, vector<1x8x32xf32>
    %265 = vector.shape_cast %264 : vector<1x8x32xf32> to vector<8x32xf32>
    %266 = vector.shape_cast %262 : vector<8x32xf32> to vector<1x8x32xf32>
    tpu.vector_store %arg17[%263, %c0_79, %c0_80], %266 {strides = array<i32>} : memref<8x8x32xf32, #tpu.memory_space<vmem>>, vector<1x8x32xf32>,
    %c8_i32 = arith.constant 8 : i32
    %c0_81 = arith.constant 0 : index
    %c0_82 = arith.constant 0 : index
    %c0_83 = arith.constant 0 : index
    %267 = vector.load %arg15[%c0_81, %c0_82, %c0_83] : memref<3x8x32xf32, #tpu.memory_space<vmem>>, vector<1x8x32xf32>
    %268 = vector.shape_cast %267 : vector<1x8x32xf32> to vector<8x32xf32>
    %269 = vector.shape_cast %262 : vector<8x32xf32> to vector<1x8x32xf32>
    tpu.vector_store %arg15[%c0_81, %c0_82, %c0_83], %269 {strides = array<i32>} : memref<3x8x32xf32, #tpu.memory_space<vmem>>, vector<1x8x32xf32>,
    %c0_84 = arith.constant 0 : index
    %c0_85 = arith.constant 0 : index
    %c0_86 = arith.constant 0 : index
    %270 = vector.load %arg16[%c0_84, %c0_85, %c0_86] : memref<3x8x32xf32, #tpu.memory_space<vmem>>, vector<1x8x32xf32>
    %271 = vector.shape_cast %270 : vector<1x8x32xf32> to vector<8x32xf32>
    %272 = vector.shape_cast %260 : vector<8x32xf32> to vector<1x8x32xf32>
    tpu.vector_store %arg16[%c0_84, %c0_85, %c0_86], %272 {strides = array<i32>} : memref<3x8x32xf32, #tpu.memory_space<vmem>>, vector<1x8x32xf32>,
    %c0_87 = arith.constant 0 : index
    %c0_88 = arith.constant 0 : index
    %c0_89 = arith.constant 0 : index
    %273 = vector.load %arg17[%c0_87, %c0_88, %c0_89] : memref<8x8x32xf32, #tpu.memory_space<vmem>>, vector<8x8x32xf32>
    %274 = vector.shape_cast %273 : vector<8x8x32xf32> to vector<64x32xf32>
    %275 = arith.truncf %274 : vector<64x32xf32> to vector<64x32xbf16>
    %c0_90 = arith.constant 0 : index
    %c0_91 = arith.constant 0 : index
    %276 = vector.load %arg6[%c0_90, %c0_91] : memref<32x128xbf16, #tpu.memory_space<vmem>>, vector<32x128xbf16>
    %cst_92 = arith.constant dense<0.000000e+00> : vector<64x128xf32>
    %277 = tpu.matmul %275, %276, %cst_92 {dimension_numbers = #tpu.dot_dimension_numbers<[1], [0], [0], [1], [0, 0, 1, 1], [], []>} : vector<64x32xbf16>, vector<32x128xbf16>, vector<64x128xf32> -> vector<64x128xf32>
    %c0_93 = arith.constant 0 : index
    %c0_94 = arith.constant 0 : index
    %278 = vector.load %arg8[%c0_93, %c0_94] : memref<1x128xf32, #tpu.memory_space<vmem>>, vector<1x128xf32>
    %279 = vector.broadcast %278 : vector<1x128xf32> to vector<64x128xf32>
    %280 = arith.addf %277, %279 : vector<64x128xf32>
    %281 = vector.shape_cast %280 : vector<64x128xf32> to vector<8x8x128xf32>
    %c0_95 = arith.constant 0 : index
    %c0_96 = arith.constant 0 : index
    %c0_97 = arith.constant 0 : index
    %282 = vector.load %arg18[%c0_95, %c0_96, %c0_97] : memref<8x8x128xf32, #tpu.memory_space<vmem>>, vector<8x8x128xf32>
    tpu.vector_store %arg18[%c0_95, %c0_96, %c0_97], %281 {strides = array<i32>} : memref<8x8x128xf32, #tpu.memory_space<vmem>>, vector<8x8x128xf32>,
    %c0_98 = arith.constant 0 : index
    %c0_99 = arith.constant 0 : index
    %283 = vector.load %arg7[%c0_98, %c0_99] : memref<32x128xbf16, #tpu.memory_space<vmem>>, vector<32x128xbf16>
    %c1 = arith.constant 1 : index
    %c0_100 = arith.constant 0 : index
    %c0_101 = arith.constant 0 : index
    %284 = vector.load %arg15[%c1, %c0_100, %c0_101] : memref<3x8x32xf32, #tpu.memory_space<vmem>>, vector<1x8x32xf32>
    %285 = vector.shape_cast %284 : vector<1x8x32xf32> to vector<8x32xf32>
    %c1_102 = arith.constant 1 : index
    %c0_103 = arith.constant 0 : index
    %c0_104 = arith.constant 0 : index
    %286 = vector.load %arg16[%c1_102, %c0_103, %c0_104] : memref<3x8x32xf32, #tpu.memory_space<vmem>>, vector<1x8x32xf32>
    %287 = vector.shape_cast %286 : vector<1x8x32xf32> to vector<8x32xf32>
    %c0_i32_105 = arith.constant 0 : i32
    %288 = arith.index_cast %c0_i32_105 : i32 to index
    %c0_106 = arith.constant 0 : index
    %c0_107 = arith.constant 0 : index
    %289 = vector.load %arg18[%288, %c0_106, %c0_107] : memref<8x8x128xf32, #tpu.memory_space<vmem>>, vector<1x8x128xf32>
    %290 = vector.shape_cast %289 : vector<1x8x128xf32> to vector<8x128xf32>
    %291 = arith.truncf %285 : vector<8x32xf32> to vector<8x32xbf16>
    %cst_108 = arith.constant dense<0.000000e+00> : vector<8x128xf32>
    %292 = tpu.matmul %291, %283, %cst_108 {dimension_numbers = #tpu.dot_dimension_numbers<[1], [0], [0], [1], [0, 0, 1, 1], [], []>} : vector<8x32xbf16>, vector<32x128xbf16>, vector<8x128xf32> -> vector<8x128xf32>
    %293 = arith.addf %290, %292 : vector<8x128xf32>
    %294 = vector.broadcast %11 : vector<1x128xf32> to vector<8x128xf32>
    %295 = arith.mulf %293, %294 : vector<8x128xf32>
    %296 = math.tanh %295 : vector<8x128xf32>
    %cst_109 = arith.constant 5.000000e-01 : f32
    %297 = vector.broadcast %cst_109 : f32 to vector<8x128xf32>
    %298 = arith.mulf %297, %296 : vector<8x128xf32>
    %cst_110 = arith.constant 5.000000e-01 : f32
    %299 = vector.broadcast %cst_110 : f32 to vector<8x128xf32>
    %300 = arith.addf %298, %299 : vector<8x128xf32>
    %301 = vector.shape_cast %8 : vector<1x128xi1> to vector<1x128xi1>
    %302 = vector.broadcast %301 : vector<1x128xi1> to vector<8x128xi1>
    %303 = arith.select %302, %296, %300 : vector<8x128xi1>, vector<8x128xf32>
    %304 = vector.extract_strided_slice %303 {offsets = [0, 0], sizes = [8, 32], strides = [1, 1]} : vector<8x128xf32> to vector<8x32xf32>
    %305 = vector.extract_strided_slice %303 {offsets = [0, 32], sizes = [8, 32], strides = [1, 1]} : vector<8x128xf32> to vector<8x32xf32>
    %306 = vector.extract_strided_slice %303 {offsets = [0, 64], sizes = [8, 32], strides = [1, 1]} : vector<8x128xf32> to vector<8x32xf32>
    %307 = vector.extract_strided_slice %303 {offsets = [0, 96], sizes = [8, 32], strides = [1, 1]} : vector<8x128xf32> to vector<8x32xf32>
    %308 = arith.mulf %305, %287 : vector<8x32xf32>
    %309 = arith.mulf %304, %306 : vector<8x32xf32>
    %310 = arith.addf %308, %309 : vector<8x32xf32>
    %311 = math.tanh %310 : vector<8x32xf32>
    %312 = arith.mulf %307, %311 : vector<8x32xf32>
    %313 = arith.index_cast %c0_i32_105 : i32 to index
    %c0_111 = arith.constant 0 : index
    %c0_112 = arith.constant 0 : index
    %314 = vector.load %arg17[%313, %c0_111, %c0_112] : memref<8x8x32xf32, #tpu.memory_space<vmem>>, vector<1x8x32xf32>
    %315 = vector.shape_cast %314 : vector<1x8x32xf32> to vector<8x32xf32>
    %316 = vector.shape_cast %312 : vector<8x32xf32> to vector<1x8x32xf32>
    tpu.vector_store %arg17[%313, %c0_111, %c0_112], %316 {strides = array<i32>} : memref<8x8x32xf32, #tpu.memory_space<vmem>>, vector<1x8x32xf32>,
    %c1_i32_113 = arith.constant 1 : i32
    %317 = arith.index_cast %c1_i32_113 : i32 to index
    %c0_114 = arith.constant 0 : index
    %c0_115 = arith.constant 0 : index
    %318 = vector.load %arg18[%317, %c0_114, %c0_115] : memref<8x8x128xf32, #tpu.memory_space<vmem>>, vector<1x8x128xf32>
    %319 = vector.shape_cast %318 : vector<1x8x128xf32> to vector<8x128xf32>
    %320 = arith.truncf %312 : vector<8x32xf32> to vector<8x32xbf16>
    %cst_116 = arith.constant dense<0.000000e+00> : vector<8x128xf32>
    %321 = tpu.matmul %320, %283, %cst_116 {dimension_numbers = #tpu.dot_dimension_numbers<[1], [0], [0], [1], [0, 0, 1, 1], [], []>} : vector<8x32xbf16>, vector<32x128xbf16>, vector<8x128xf32> -> vector<8x128xf32>
    %322 = arith.addf %319, %321 : vector<8x128xf32>
    %323 = vector.broadcast %11 : vector<1x128xf32> to vector<8x128xf32>
    %324 = arith.mulf %322, %323 : vector<8x128xf32>
    %325 = math.tanh %324 : vector<8x128xf32>
    %cst_117 = arith.constant 5.000000e-01 : f32
    %326 = vector.broadcast %cst_117 : f32 to vector<8x128xf32>
    %327 = arith.mulf %326, %325 : vector<8x128xf32>
    %cst_118 = arith.constant 5.000000e-01 : f32
    %328 = vector.broadcast %cst_118 : f32 to vector<8x128xf32>
    %329 = arith.addf %327, %328 : vector<8x128xf32>
    %330 = vector.shape_cast %8 : vector<1x128xi1> to vector<1x128xi1>
    %331 = vector.broadcast %330 : vector<1x128xi1> to vector<8x128xi1>
    %332 = arith.select %331, %325, %329 : vector<8x128xi1>, vector<8x128xf32>
    %333 = vector.extract_strided_slice %332 {offsets = [0, 0], sizes = [8, 32], strides = [1, 1]} : vector<8x128xf32> to vector<8x32xf32>
    %334 = vector.extract_strided_slice %332 {offsets = [0, 32], sizes = [8, 32], strides = [1, 1]} : vector<8x128xf32> to vector<8x32xf32>
    %335 = vector.extract_strided_slice %332 {offsets = [0, 64], sizes = [8, 32], strides = [1, 1]} : vector<8x128xf32> to vector<8x32xf32>
    %336 = vector.extract_strided_slice %332 {offsets = [0, 96], sizes = [8, 32], strides = [1, 1]} : vector<8x128xf32> to vector<8x32xf32>
    %337 = arith.mulf %334, %310 : vector<8x32xf32>
    %338 = arith.mulf %333, %335 : vector<8x32xf32>
    %339 = arith.addf %337, %338 : vector<8x32xf32>
    %340 = math.tanh %339 : vector<8x32xf32>
    %341 = arith.mulf %336, %340 : vector<8x32xf32>
    %342 = arith.index_cast %c1_i32_113 : i32 to index
    %c0_119 = arith.constant 0 : index
    %c0_120 = arith.constant 0 : index
    %343 = vector.load %arg17[%342, %c0_119, %c0_120] : memref<8x8x32xf32, #tpu.memory_space<vmem>>, vector<1x8x32xf32>
    %344 = vector.shape_cast %343 : vector<1x8x32xf32> to vector<8x32xf32>
    %345 = vector.shape_cast %341 : vector<8x32xf32> to vector<1x8x32xf32>
    tpu.vector_store %arg17[%342, %c0_119, %c0_120], %345 {strides = array<i32>} : memref<8x8x32xf32, #tpu.memory_space<vmem>>, vector<1x8x32xf32>,
    %c2_i32_121 = arith.constant 2 : i32
    %346 = arith.index_cast %c2_i32_121 : i32 to index
    %c0_122 = arith.constant 0 : index
    %c0_123 = arith.constant 0 : index
    %347 = vector.load %arg18[%346, %c0_122, %c0_123] : memref<8x8x128xf32, #tpu.memory_space<vmem>>, vector<1x8x128xf32>
    %348 = vector.shape_cast %347 : vector<1x8x128xf32> to vector<8x128xf32>
    %349 = arith.truncf %341 : vector<8x32xf32> to vector<8x32xbf16>
    %cst_124 = arith.constant dense<0.000000e+00> : vector<8x128xf32>
    %350 = tpu.matmul %349, %283, %cst_124 {dimension_numbers = #tpu.dot_dimension_numbers<[1], [0], [0], [1], [0, 0, 1, 1], [], []>} : vector<8x32xbf16>, vector<32x128xbf16>, vector<8x128xf32> -> vector<8x128xf32>
    %351 = arith.addf %348, %350 : vector<8x128xf32>
    %352 = vector.broadcast %11 : vector<1x128xf32> to vector<8x128xf32>
    %353 = arith.mulf %351, %352 : vector<8x128xf32>
    %354 = math.tanh %353 : vector<8x128xf32>
    %cst_125 = arith.constant 5.000000e-01 : f32
    %355 = vector.broadcast %cst_125 : f32 to vector<8x128xf32>
    %356 = arith.mulf %355, %354 : vector<8x128xf32>
    %cst_126 = arith.constant 5.000000e-01 : f32
    %357 = vector.broadcast %cst_126 : f32 to vector<8x128xf32>
    %358 = arith.addf %356, %357 : vector<8x128xf32>
    %359 = vector.shape_cast %8 : vector<1x128xi1> to vector<1x128xi1>
    %360 = vector.broadcast %359 : vector<1x128xi1> to vector<8x128xi1>
    %361 = arith.select %360, %354, %358 : vector<8x128xi1>, vector<8x128xf32>
    %362 = vector.extract_strided_slice %361 {offsets = [0, 0], sizes = [8, 32], strides = [1, 1]} : vector<8x128xf32> to vector<8x32xf32>
    %363 = vector.extract_strided_slice %361 {offsets = [0, 32], sizes = [8, 32], strides = [1, 1]} : vector<8x128xf32> to vector<8x32xf32>
    %364 = vector.extract_strided_slice %361 {offsets = [0, 64], sizes = [8, 32], strides = [1, 1]} : vector<8x128xf32> to vector<8x32xf32>
    %365 = vector.extract_strided_slice %361 {offsets = [0, 96], sizes = [8, 32], strides = [1, 1]} : vector<8x128xf32> to vector<8x32xf32>
    %366 = arith.mulf %363, %339 : vector<8x32xf32>
    %367 = arith.mulf %362, %364 : vector<8x32xf32>
    %368 = arith.addf %366, %367 : vector<8x32xf32>
    %369 = math.tanh %368 : vector<8x32xf32>
    %370 = arith.mulf %365, %369 : vector<8x32xf32>
    %371 = arith.index_cast %c2_i32_121 : i32 to index
    %c0_127 = arith.constant 0 : index
    %c0_128 = arith.constant 0 : index
    %372 = vector.load %arg17[%371, %c0_127, %c0_128] : memref<8x8x32xf32, #tpu.memory_space<vmem>>, vector<1x8x32xf32>
    %373 = vector.shape_cast %372 : vector<1x8x32xf32> to vector<8x32xf32>
    %374 = vector.shape_cast %370 : vector<8x32xf32> to vector<1x8x32xf32>
    tpu.vector_store %arg17[%371, %c0_127, %c0_128], %374 {strides = array<i32>} : memref<8x8x32xf32, #tpu.memory_space<vmem>>, vector<1x8x32xf32>,
    %c3_i32_129 = arith.constant 3 : i32
    %375 = arith.index_cast %c3_i32_129 : i32 to index
    %c0_130 = arith.constant 0 : index
    %c0_131 = arith.constant 0 : index
    %376 = vector.load %arg18[%375, %c0_130, %c0_131] : memref<8x8x128xf32, #tpu.memory_space<vmem>>, vector<1x8x128xf32>
    %377 = vector.shape_cast %376 : vector<1x8x128xf32> to vector<8x128xf32>
    %378 = arith.truncf %370 : vector<8x32xf32> to vector<8x32xbf16>
    %cst_132 = arith.constant dense<0.000000e+00> : vector<8x128xf32>
    %379 = tpu.matmul %378, %283, %cst_132 {dimension_numbers = #tpu.dot_dimension_numbers<[1], [0], [0], [1], [0, 0, 1, 1], [], []>} : vector<8x32xbf16>, vector<32x128xbf16>, vector<8x128xf32> -> vector<8x128xf32>
    %380 = arith.addf %377, %379 : vector<8x128xf32>
    %381 = vector.broadcast %11 : vector<1x128xf32> to vector<8x128xf32>
    %382 = arith.mulf %380, %381 : vector<8x128xf32>
    %383 = math.tanh %382 : vector<8x128xf32>
    %cst_133 = arith.constant 5.000000e-01 : f32
    %384 = vector.broadcast %cst_133 : f32 to vector<8x128xf32>
    %385 = arith.mulf %384, %383 : vector<8x128xf32>
    %cst_134 = arith.constant 5.000000e-01 : f32
    %386 = vector.broadcast %cst_134 : f32 to vector<8x128xf32>
    %387 = arith.addf %385, %386 : vector<8x128xf32>
    %388 = vector.shape_cast %8 : vector<1x128xi1> to vector<1x128xi1>
    %389 = vector.broadcast %388 : vector<1x128xi1> to vector<8x128xi1>
    %390 = arith.select %389, %383, %387 : vector<8x128xi1>, vector<8x128xf32>
    %391 = vector.extract_strided_slice %390 {offsets = [0, 0], sizes = [8, 32], strides = [1, 1]} : vector<8x128xf32> to vector<8x32xf32>
    %392 = vector.extract_strided_slice %390 {offsets = [0, 32], sizes = [8, 32], strides = [1, 1]} : vector<8x128xf32> to vector<8x32xf32>
    %393 = vector.extract_strided_slice %390 {offsets = [0, 64], sizes = [8, 32], strides = [1, 1]} : vector<8x128xf32> to vector<8x32xf32>
    %394 = vector.extract_strided_slice %390 {offsets = [0, 96], sizes = [8, 32], strides = [1, 1]} : vector<8x128xf32> to vector<8x32xf32>
    %395 = arith.mulf %392, %368 : vector<8x32xf32>
    %396 = arith.mulf %391, %393 : vector<8x32xf32>
    %397 = arith.addf %395, %396 : vector<8x32xf32>
    %398 = math.tanh %397 : vector<8x32xf32>
    %399 = arith.mulf %394, %398 : vector<8x32xf32>
    %400 = arith.index_cast %c3_i32_129 : i32 to index
    %c0_135 = arith.constant 0 : index
    %c0_136 = arith.constant 0 : index
    %401 = vector.load %arg17[%400, %c0_135, %c0_136] : memref<8x8x32xf32, #tpu.memory_space<vmem>>, vector<1x8x32xf32>
    %402 = vector.shape_cast %401 : vector<1x8x32xf32> to vector<8x32xf32>
    %403 = vector.shape_cast %399 : vector<8x32xf32> to vector<1x8x32xf32>
    tpu.vector_store %arg17[%400, %c0_135, %c0_136], %403 {strides = array<i32>} : memref<8x8x32xf32, #tpu.memory_space<vmem>>, vector<1x8x32xf32>,
    %c4_i32_137 = arith.constant 4 : i32
    %404 = arith.index_cast %c4_i32_137 : i32 to index
    %c0_138 = arith.constant 0 : index
    %c0_139 = arith.constant 0 : index
    %405 = vector.load %arg18[%404, %c0_138, %c0_139] : memref<8x8x128xf32, #tpu.memory_space<vmem>>, vector<1x8x128xf32>
    %406 = vector.shape_cast %405 : vector<1x8x128xf32> to vector<8x128xf32>
    %407 = arith.truncf %399 : vector<8x32xf32> to vector<8x32xbf16>
    %cst_140 = arith.constant dense<0.000000e+00> : vector<8x128xf32>
    %408 = tpu.matmul %407, %283, %cst_140 {dimension_numbers = #tpu.dot_dimension_numbers<[1], [0], [0], [1], [0, 0, 1, 1], [], []>} : vector<8x32xbf16>, vector<32x128xbf16>, vector<8x128xf32> -> vector<8x128xf32>
    %409 = arith.addf %406, %408 : vector<8x128xf32>
    %410 = vector.broadcast %11 : vector<1x128xf32> to vector<8x128xf32>
    %411 = arith.mulf %409, %410 : vector<8x128xf32>
    %412 = math.tanh %411 : vector<8x128xf32>
    %cst_141 = arith.constant 5.000000e-01 : f32
    %413 = vector.broadcast %cst_141 : f32 to vector<8x128xf32>
    %414 = arith.mulf %413, %412 : vector<8x128xf32>
    %cst_142 = arith.constant 5.000000e-01 : f32
    %415 = vector.broadcast %cst_142 : f32 to vector<8x128xf32>
    %416 = arith.addf %414, %415 : vector<8x128xf32>
    %417 = vector.shape_cast %8 : vector<1x128xi1> to vector<1x128xi1>
    %418 = vector.broadcast %417 : vector<1x128xi1> to vector<8x128xi1>
    %419 = arith.select %418, %412, %416 : vector<8x128xi1>, vector<8x128xf32>
    %420 = vector.extract_strided_slice %419 {offsets = [0, 0], sizes = [8, 32], strides = [1, 1]} : vector<8x128xf32> to vector<8x32xf32>
    %421 = vector.extract_strided_slice %419 {offsets = [0, 32], sizes = [8, 32], strides = [1, 1]} : vector<8x128xf32> to vector<8x32xf32>
    %422 = vector.extract_strided_slice %419 {offsets = [0, 64], sizes = [8, 32], strides = [1, 1]} : vector<8x128xf32> to vector<8x32xf32>
    %423 = vector.extract_strided_slice %419 {offsets = [0, 96], sizes = [8, 32], strides = [1, 1]} : vector<8x128xf32> to vector<8x32xf32>
    %424 = arith.mulf %421, %397 : vector<8x32xf32>
    %425 = arith.mulf %420, %422 : vector<8x32xf32>
    %426 = arith.addf %424, %425 : vector<8x32xf32>
    %427 = math.tanh %426 : vector<8x32xf32>
    %428 = arith.mulf %423, %427 : vector<8x32xf32>
    %429 = arith.index_cast %c4_i32_137 : i32 to index
    %c0_143 = arith.constant 0 : index
    %c0_144 = arith.constant 0 : index
    %430 = vector.load %arg17[%429, %c0_143, %c0_144] : memref<8x8x32xf32, #tpu.memory_space<vmem>>, vector<1x8x32xf32>
    %431 = vector.shape_cast %430 : vector<1x8x32xf32> to vector<8x32xf32>
    %432 = vector.shape_cast %428 : vector<8x32xf32> to vector<1x8x32xf32>
    tpu.vector_store %arg17[%429, %c0_143, %c0_144], %432 {strides = array<i32>} : memref<8x8x32xf32, #tpu.memory_space<vmem>>, vector<1x8x32xf32>,
    %c5_i32_145 = arith.constant 5 : i32
    %433 = arith.index_cast %c5_i32_145 : i32 to index
    %c0_146 = arith.constant 0 : index
    %c0_147 = arith.constant 0 : index
    %434 = vector.load %arg18[%433, %c0_146, %c0_147] : memref<8x8x128xf32, #tpu.memory_space<vmem>>, vector<1x8x128xf32>
    %435 = vector.shape_cast %434 : vector<1x8x128xf32> to vector<8x128xf32>
    %436 = arith.truncf %428 : vector<8x32xf32> to vector<8x32xbf16>
    %cst_148 = arith.constant dense<0.000000e+00> : vector<8x128xf32>
    %437 = tpu.matmul %436, %283, %cst_148 {dimension_numbers = #tpu.dot_dimension_numbers<[1], [0], [0], [1], [0, 0, 1, 1], [], []>} : vector<8x32xbf16>, vector<32x128xbf16>, vector<8x128xf32> -> vector<8x128xf32>
    %438 = arith.addf %435, %437 : vector<8x128xf32>
    %439 = vector.broadcast %11 : vector<1x128xf32> to vector<8x128xf32>
    %440 = arith.mulf %438, %439 : vector<8x128xf32>
    %441 = math.tanh %440 : vector<8x128xf32>
    %cst_149 = arith.constant 5.000000e-01 : f32
    %442 = vector.broadcast %cst_149 : f32 to vector<8x128xf32>
    %443 = arith.mulf %442, %441 : vector<8x128xf32>
    %cst_150 = arith.constant 5.000000e-01 : f32
    %444 = vector.broadcast %cst_150 : f32 to vector<8x128xf32>
    %445 = arith.addf %443, %444 : vector<8x128xf32>
    %446 = vector.shape_cast %8 : vector<1x128xi1> to vector<1x128xi1>
    %447 = vector.broadcast %446 : vector<1x128xi1> to vector<8x128xi1>
    %448 = arith.select %447, %441, %445 : vector<8x128xi1>, vector<8x128xf32>
    %449 = vector.extract_strided_slice %448 {offsets = [0, 0], sizes = [8, 32], strides = [1, 1]} : vector<8x128xf32> to vector<8x32xf32>
    %450 = vector.extract_strided_slice %448 {offsets = [0, 32], sizes = [8, 32], strides = [1, 1]} : vector<8x128xf32> to vector<8x32xf32>
    %451 = vector.extract_strided_slice %448 {offsets = [0, 64], sizes = [8, 32], strides = [1, 1]} : vector<8x128xf32> to vector<8x32xf32>
    %452 = vector.extract_strided_slice %448 {offsets = [0, 96], sizes = [8, 32], strides = [1, 1]} : vector<8x128xf32> to vector<8x32xf32>
    %453 = arith.mulf %450, %426 : vector<8x32xf32>
    %454 = arith.mulf %449, %451 : vector<8x32xf32>
    %455 = arith.addf %453, %454 : vector<8x32xf32>
    %456 = math.tanh %455 : vector<8x32xf32>
    %457 = arith.mulf %452, %456 : vector<8x32xf32>
    %458 = arith.index_cast %c5_i32_145 : i32 to index
    %c0_151 = arith.constant 0 : index
    %c0_152 = arith.constant 0 : index
    %459 = vector.load %arg17[%458, %c0_151, %c0_152] : memref<8x8x32xf32, #tpu.memory_space<vmem>>, vector<1x8x32xf32>
    %460 = vector.shape_cast %459 : vector<1x8x32xf32> to vector<8x32xf32>
    %461 = vector.shape_cast %457 : vector<8x32xf32> to vector<1x8x32xf32>
    tpu.vector_store %arg17[%458, %c0_151, %c0_152], %461 {strides = array<i32>} : memref<8x8x32xf32, #tpu.memory_space<vmem>>, vector<1x8x32xf32>,
    %c6_i32_153 = arith.constant 6 : i32
    %462 = arith.index_cast %c6_i32_153 : i32 to index
    %c0_154 = arith.constant 0 : index
    %c0_155 = arith.constant 0 : index
    %463 = vector.load %arg18[%462, %c0_154, %c0_155] : memref<8x8x128xf32, #tpu.memory_space<vmem>>, vector<1x8x128xf32>
    %464 = vector.shape_cast %463 : vector<1x8x128xf32> to vector<8x128xf32>
    %465 = arith.truncf %457 : vector<8x32xf32> to vector<8x32xbf16>
    %cst_156 = arith.constant dense<0.000000e+00> : vector<8x128xf32>
    %466 = tpu.matmul %465, %283, %cst_156 {dimension_numbers = #tpu.dot_dimension_numbers<[1], [0], [0], [1], [0, 0, 1, 1], [], []>} : vector<8x32xbf16>, vector<32x128xbf16>, vector<8x128xf32> -> vector<8x128xf32>
    %467 = arith.addf %464, %466 : vector<8x128xf32>
    %468 = vector.broadcast %11 : vector<1x128xf32> to vector<8x128xf32>
    %469 = arith.mulf %467, %468 : vector<8x128xf32>
    %470 = math.tanh %469 : vector<8x128xf32>
    %cst_157 = arith.constant 5.000000e-01 : f32
    %471 = vector.broadcast %cst_157 : f32 to vector<8x128xf32>
    %472 = arith.mulf %471, %470 : vector<8x128xf32>
    %cst_158 = arith.constant 5.000000e-01 : f32
    %473 = vector.broadcast %cst_158 : f32 to vector<8x128xf32>
    %474 = arith.addf %472, %473 : vector<8x128xf32>
    %475 = vector.shape_cast %8 : vector<1x128xi1> to vector<1x128xi1>
    %476 = vector.broadcast %475 : vector<1x128xi1> to vector<8x128xi1>
    %477 = arith.select %476, %470, %474 : vector<8x128xi1>, vector<8x128xf32>
    %478 = vector.extract_strided_slice %477 {offsets = [0, 0], sizes = [8, 32], strides = [1, 1]} : vector<8x128xf32> to vector<8x32xf32>
    %479 = vector.extract_strided_slice %477 {offsets = [0, 32], sizes = [8, 32], strides = [1, 1]} : vector<8x128xf32> to vector<8x32xf32>
    %480 = vector.extract_strided_slice %477 {offsets = [0, 64], sizes = [8, 32], strides = [1, 1]} : vector<8x128xf32> to vector<8x32xf32>
    %481 = vector.extract_strided_slice %477 {offsets = [0, 96], sizes = [8, 32], strides = [1, 1]} : vector<8x128xf32> to vector<8x32xf32>
    %482 = arith.mulf %479, %455 : vector<8x32xf32>
    %483 = arith.mulf %478, %480 : vector<8x32xf32>
    %484 = arith.addf %482, %483 : vector<8x32xf32>
    %485 = math.tanh %484 : vector<8x32xf32>
    %486 = arith.mulf %481, %485 : vector<8x32xf32>
    %487 = arith.index_cast %c6_i32_153 : i32 to index
    %c0_159 = arith.constant 0 : index
    %c0_160 = arith.constant 0 : index
    %488 = vector.load %arg17[%487, %c0_159, %c0_160] : memref<8x8x32xf32, #tpu.memory_space<vmem>>, vector<1x8x32xf32>
    %489 = vector.shape_cast %488 : vector<1x8x32xf32> to vector<8x32xf32>
    %490 = vector.shape_cast %486 : vector<8x32xf32> to vector<1x8x32xf32>
    tpu.vector_store %arg17[%487, %c0_159, %c0_160], %490 {strides = array<i32>} : memref<8x8x32xf32, #tpu.memory_space<vmem>>, vector<1x8x32xf32>,
    %c7_i32_161 = arith.constant 7 : i32
    %491 = arith.index_cast %c7_i32_161 : i32 to index
    %c0_162 = arith.constant 0 : index
    %c0_163 = arith.constant 0 : index
    %492 = vector.load %arg18[%491, %c0_162, %c0_163] : memref<8x8x128xf32, #tpu.memory_space<vmem>>, vector<1x8x128xf32>
    %493 = vector.shape_cast %492 : vector<1x8x128xf32> to vector<8x128xf32>
    %494 = arith.truncf %486 : vector<8x32xf32> to vector<8x32xbf16>
    %cst_164 = arith.constant dense<0.000000e+00> : vector<8x128xf32>
    %495 = tpu.matmul %494, %283, %cst_164 {dimension_numbers = #tpu.dot_dimension_numbers<[1], [0], [0], [1], [0, 0, 1, 1], [], []>} : vector<8x32xbf16>, vector<32x128xbf16>, vector<8x128xf32> -> vector<8x128xf32>
    %496 = arith.addf %493, %495 : vector<8x128xf32>
    %497 = vector.broadcast %11 : vector<1x128xf32> to vector<8x128xf32>
    %498 = arith.mulf %496, %497 : vector<8x128xf32>
    %499 = math.tanh %498 : vector<8x128xf32>
    %cst_165 = arith.constant 5.000000e-01 : f32
    %500 = vector.broadcast %cst_165 : f32 to vector<8x128xf32>
    %501 = arith.mulf %500, %499 : vector<8x128xf32>
    %cst_166 = arith.constant 5.000000e-01 : f32
    %502 = vector.broadcast %cst_166 : f32 to vector<8x128xf32>
    %503 = arith.addf %501, %502 : vector<8x128xf32>
    %504 = vector.shape_cast %8 : vector<1x128xi1> to vector<1x128xi1>
    %505 = vector.broadcast %504 : vector<1x128xi1> to vector<8x128xi1>
    %506 = arith.select %505, %499, %503 : vector<8x128xi1>, vector<8x128xf32>
    %507 = vector.extract_strided_slice %506 {offsets = [0, 0], sizes = [8, 32], strides = [1, 1]} : vector<8x128xf32> to vector<8x32xf32>
    %508 = vector.extract_strided_slice %506 {offsets = [0, 32], sizes = [8, 32], strides = [1, 1]} : vector<8x128xf32> to vector<8x32xf32>
    %509 = vector.extract_strided_slice %506 {offsets = [0, 64], sizes = [8, 32], strides = [1, 1]} : vector<8x128xf32> to vector<8x32xf32>
    %510 = vector.extract_strided_slice %506 {offsets = [0, 96], sizes = [8, 32], strides = [1, 1]} : vector<8x128xf32> to vector<8x32xf32>
    %511 = arith.mulf %508, %484 : vector<8x32xf32>
    %512 = arith.mulf %507, %509 : vector<8x32xf32>
    %513 = arith.addf %511, %512 : vector<8x32xf32>
    %514 = math.tanh %513 : vector<8x32xf32>
    %515 = arith.mulf %510, %514 : vector<8x32xf32>
    %516 = arith.index_cast %c7_i32_161 : i32 to index
    %c0_167 = arith.constant 0 : index
    %c0_168 = arith.constant 0 : index
    %517 = vector.load %arg17[%516, %c0_167, %c0_168] : memref<8x8x32xf32, #tpu.memory_space<vmem>>, vector<1x8x32xf32>
    %518 = vector.shape_cast %517 : vector<1x8x32xf32> to vector<8x32xf32>
    %519 = vector.shape_cast %515 : vector<8x32xf32> to vector<1x8x32xf32>
    tpu.vector_store %arg17[%516, %c0_167, %c0_168], %519 {strides = array<i32>} : memref<8x8x32xf32, #tpu.memory_space<vmem>>, vector<1x8x32xf32>,
    %c8_i32_169 = arith.constant 8 : i32
    %c1_170 = arith.constant 1 : index
    %c0_171 = arith.constant 0 : index
    %c0_172 = arith.constant 0 : index
    %520 = vector.load %arg15[%c1_170, %c0_171, %c0_172] : memref<3x8x32xf32, #tpu.memory_space<vmem>>, vector<1x8x32xf32>
    %521 = vector.shape_cast %520 : vector<1x8x32xf32> to vector<8x32xf32>
    %522 = vector.shape_cast %515 : vector<8x32xf32> to vector<1x8x32xf32>
    tpu.vector_store %arg15[%c1_170, %c0_171, %c0_172], %522 {strides = array<i32>} : memref<3x8x32xf32, #tpu.memory_space<vmem>>, vector<1x8x32xf32>,
    %c1_173 = arith.constant 1 : index
    %c0_174 = arith.constant 0 : index
    %c0_175 = arith.constant 0 : index
    %523 = vector.load %arg16[%c1_173, %c0_174, %c0_175] : memref<3x8x32xf32, #tpu.memory_space<vmem>>, vector<1x8x32xf32>
    %524 = vector.shape_cast %523 : vector<1x8x32xf32> to vector<8x32xf32>
    %525 = vector.shape_cast %513 : vector<8x32xf32> to vector<1x8x32xf32>
    tpu.vector_store %arg16[%c1_173, %c0_174, %c0_175], %525 {strides = array<i32>} : memref<3x8x32xf32, #tpu.memory_space<vmem>>, vector<1x8x32xf32>,
    %c0_176 = arith.constant 0 : index
    %c0_177 = arith.constant 0 : index
    %c0_178 = arith.constant 0 : index
    %526 = vector.load %arg17[%c0_176, %c0_177, %c0_178] : memref<8x8x32xf32, #tpu.memory_space<vmem>>, vector<8x8x32xf32>
    %527 = vector.shape_cast %526 : vector<8x8x32xf32> to vector<64x32xf32>
    %528 = arith.truncf %527 : vector<64x32xf32> to vector<64x32xbf16>
    %c0_179 = arith.constant 0 : index
    %c0_180 = arith.constant 0 : index
    %529 = vector.load %arg9[%c0_179, %c0_180] : memref<32x128xbf16, #tpu.memory_space<vmem>>, vector<32x128xbf16>
    %cst_181 = arith.constant dense<0.000000e+00> : vector<64x128xf32>
    %530 = tpu.matmul %528, %529, %cst_181 {dimension_numbers = #tpu.dot_dimension_numbers<[1], [0], [0], [1], [0, 0, 1, 1], [], []>} : vector<64x32xbf16>, vector<32x128xbf16>, vector<64x128xf32> -> vector<64x128xf32>
    %c0_182 = arith.constant 0 : index
    %c0_183 = arith.constant 0 : index
    %531 = vector.load %arg11[%c0_182, %c0_183] : memref<1x128xf32, #tpu.memory_space<vmem>>, vector<1x128xf32>
    %532 = vector.broadcast %531 : vector<1x128xf32> to vector<64x128xf32>
    %533 = arith.addf %530, %532 : vector<64x128xf32>
    %534 = vector.shape_cast %533 : vector<64x128xf32> to vector<8x8x128xf32>
    %c0_184 = arith.constant 0 : index
    %c0_185 = arith.constant 0 : index
    %c0_186 = arith.constant 0 : index
    %535 = vector.load %arg18[%c0_184, %c0_185, %c0_186] : memref<8x8x128xf32, #tpu.memory_space<vmem>>, vector<8x8x128xf32>
    tpu.vector_store %arg18[%c0_184, %c0_185, %c0_186], %534 {strides = array<i32>} : memref<8x8x128xf32, #tpu.memory_space<vmem>>, vector<8x8x128xf32>,
    %c0_187 = arith.constant 0 : index
    %c0_188 = arith.constant 0 : index
    %536 = vector.load %arg10[%c0_187, %c0_188] : memref<32x128xbf16, #tpu.memory_space<vmem>>, vector<32x128xbf16>
    %c2 = arith.constant 2 : index
    %c0_189 = arith.constant 0 : index
    %c0_190 = arith.constant 0 : index
    %537 = vector.load %arg15[%c2, %c0_189, %c0_190] : memref<3x8x32xf32, #tpu.memory_space<vmem>>, vector<1x8x32xf32>
    %538 = vector.shape_cast %537 : vector<1x8x32xf32> to vector<8x32xf32>
    %c2_191 = arith.constant 2 : index
    %c0_192 = arith.constant 0 : index
    %c0_193 = arith.constant 0 : index
    %539 = vector.load %arg16[%c2_191, %c0_192, %c0_193] : memref<3x8x32xf32, #tpu.memory_space<vmem>>, vector<1x8x32xf32>
    %540 = vector.shape_cast %539 : vector<1x8x32xf32> to vector<8x32xf32>
    %c0_i32_194 = arith.constant 0 : i32
    %541 = arith.index_cast %c0_i32_194 : i32 to index
    %c0_195 = arith.constant 0 : index
    %c0_196 = arith.constant 0 : index
    %542 = vector.load %arg18[%541, %c0_195, %c0_196] : memref<8x8x128xf32, #tpu.memory_space<vmem>>, vector<1x8x128xf32>
    %543 = vector.shape_cast %542 : vector<1x8x128xf32> to vector<8x128xf32>
    %544 = arith.truncf %538 : vector<8x32xf32> to vector<8x32xbf16>
    %cst_197 = arith.constant dense<0.000000e+00> : vector<8x128xf32>
    %545 = tpu.matmul %544, %536, %cst_197 {dimension_numbers = #tpu.dot_dimension_numbers<[1], [0], [0], [1], [0, 0, 1, 1], [], []>} : vector<8x32xbf16>, vector<32x128xbf16>, vector<8x128xf32> -> vector<8x128xf32>
    %546 = arith.addf %543, %545 : vector<8x128xf32>
    %547 = vector.broadcast %11 : vector<1x128xf32> to vector<8x128xf32>
    %548 = arith.mulf %546, %547 : vector<8x128xf32>
    %549 = math.tanh %548 : vector<8x128xf32>
    %cst_198 = arith.constant 5.000000e-01 : f32
    %550 = vector.broadcast %cst_198 : f32 to vector<8x128xf32>
    %551 = arith.mulf %550, %549 : vector<8x128xf32>
    %cst_199 = arith.constant 5.000000e-01 : f32
    %552 = vector.broadcast %cst_199 : f32 to vector<8x128xf32>
    %553 = arith.addf %551, %552 : vector<8x128xf32>
    %554 = vector.shape_cast %8 : vector<1x128xi1> to vector<1x128xi1>
    %555 = vector.broadcast %554 : vector<1x128xi1> to vector<8x128xi1>
    %556 = arith.select %555, %549, %553 : vector<8x128xi1>, vector<8x128xf32>
    %557 = vector.extract_strided_slice %556 {offsets = [0, 0], sizes = [8, 32], strides = [1, 1]} : vector<8x128xf32> to vector<8x32xf32>
    %558 = vector.extract_strided_slice %556 {offsets = [0, 32], sizes = [8, 32], strides = [1, 1]} : vector<8x128xf32> to vector<8x32xf32>
    %559 = vector.extract_strided_slice %556 {offsets = [0, 64], sizes = [8, 32], strides = [1, 1]} : vector<8x128xf32> to vector<8x32xf32>
    %560 = vector.extract_strided_slice %556 {offsets = [0, 96], sizes = [8, 32], strides = [1, 1]} : vector<8x128xf32> to vector<8x32xf32>
    %561 = arith.mulf %558, %540 : vector<8x32xf32>
    %562 = arith.mulf %557, %559 : vector<8x32xf32>
    %563 = arith.addf %561, %562 : vector<8x32xf32>
    %564 = math.tanh %563 : vector<8x32xf32>
    %565 = arith.mulf %560, %564 : vector<8x32xf32>
    %c1_i32_200 = arith.constant 1 : i32
    %566 = arith.index_cast %c1_i32_200 : i32 to index
    %c0_201 = arith.constant 0 : index
    %c0_202 = arith.constant 0 : index
    %567 = vector.load %arg18[%566, %c0_201, %c0_202] : memref<8x8x128xf32, #tpu.memory_space<vmem>>, vector<1x8x128xf32>
    %568 = vector.shape_cast %567 : vector<1x8x128xf32> to vector<8x128xf32>
    %569 = arith.truncf %565 : vector<8x32xf32> to vector<8x32xbf16>
    %cst_203 = arith.constant dense<0.000000e+00> : vector<8x128xf32>
    %570 = tpu.matmul %569, %536, %cst_203 {dimension_numbers = #tpu.dot_dimension_numbers<[1], [0], [0], [1], [0, 0, 1, 1], [], []>} : vector<8x32xbf16>, vector<32x128xbf16>, vector<8x128xf32> -> vector<8x128xf32>
    %571 = arith.addf %568, %570 : vector<8x128xf32>
    %572 = vector.broadcast %11 : vector<1x128xf32> to vector<8x128xf32>
    %573 = arith.mulf %571, %572 : vector<8x128xf32>
    %574 = math.tanh %573 : vector<8x128xf32>
    %cst_204 = arith.constant 5.000000e-01 : f32
    %575 = vector.broadcast %cst_204 : f32 to vector<8x128xf32>
    %576 = arith.mulf %575, %574 : vector<8x128xf32>
    %cst_205 = arith.constant 5.000000e-01 : f32
    %577 = vector.broadcast %cst_205 : f32 to vector<8x128xf32>
    %578 = arith.addf %576, %577 : vector<8x128xf32>
    %579 = vector.shape_cast %8 : vector<1x128xi1> to vector<1x128xi1>
    %580 = vector.broadcast %579 : vector<1x128xi1> to vector<8x128xi1>
    %581 = arith.select %580, %574, %578 : vector<8x128xi1>, vector<8x128xf32>
    %582 = vector.extract_strided_slice %581 {offsets = [0, 0], sizes = [8, 32], strides = [1, 1]} : vector<8x128xf32> to vector<8x32xf32>
    %583 = vector.extract_strided_slice %581 {offsets = [0, 32], sizes = [8, 32], strides = [1, 1]} : vector<8x128xf32> to vector<8x32xf32>
    %584 = vector.extract_strided_slice %581 {offsets = [0, 64], sizes = [8, 32], strides = [1, 1]} : vector<8x128xf32> to vector<8x32xf32>
    %585 = vector.extract_strided_slice %581 {offsets = [0, 96], sizes = [8, 32], strides = [1, 1]} : vector<8x128xf32> to vector<8x32xf32>
    %586 = arith.mulf %583, %563 : vector<8x32xf32>
    %587 = arith.mulf %582, %584 : vector<8x32xf32>
    %588 = arith.addf %586, %587 : vector<8x32xf32>
    %589 = math.tanh %588 : vector<8x32xf32>
    %590 = arith.mulf %585, %589 : vector<8x32xf32>
    %c2_i32_206 = arith.constant 2 : i32
    %591 = arith.index_cast %c2_i32_206 : i32 to index
    %c0_207 = arith.constant 0 : index
    %c0_208 = arith.constant 0 : index
    %592 = vector.load %arg18[%591, %c0_207, %c0_208] : memref<8x8x128xf32, #tpu.memory_space<vmem>>, vector<1x8x128xf32>
    %593 = vector.shape_cast %592 : vector<1x8x128xf32> to vector<8x128xf32>
    %594 = arith.truncf %590 : vector<8x32xf32> to vector<8x32xbf16>
    %cst_209 = arith.constant dense<0.000000e+00> : vector<8x128xf32>
    %595 = tpu.matmul %594, %536, %cst_209 {dimension_numbers = #tpu.dot_dimension_numbers<[1], [0], [0], [1], [0, 0, 1, 1], [], []>} : vector<8x32xbf16>, vector<32x128xbf16>, vector<8x128xf32> -> vector<8x128xf32>
    %596 = arith.addf %593, %595 : vector<8x128xf32>
    %597 = vector.broadcast %11 : vector<1x128xf32> to vector<8x128xf32>
    %598 = arith.mulf %596, %597 : vector<8x128xf32>
    %599 = math.tanh %598 : vector<8x128xf32>
    %cst_210 = arith.constant 5.000000e-01 : f32
    %600 = vector.broadcast %cst_210 : f32 to vector<8x128xf32>
    %601 = arith.mulf %600, %599 : vector<8x128xf32>
    %cst_211 = arith.constant 5.000000e-01 : f32
    %602 = vector.broadcast %cst_211 : f32 to vector<8x128xf32>
    %603 = arith.addf %601, %602 : vector<8x128xf32>
    %604 = vector.shape_cast %8 : vector<1x128xi1> to vector<1x128xi1>
    %605 = vector.broadcast %604 : vector<1x128xi1> to vector<8x128xi1>
    %606 = arith.select %605, %599, %603 : vector<8x128xi1>, vector<8x128xf32>
    %607 = vector.extract_strided_slice %606 {offsets = [0, 0], sizes = [8, 32], strides = [1, 1]} : vector<8x128xf32> to vector<8x32xf32>
    %608 = vector.extract_strided_slice %606 {offsets = [0, 32], sizes = [8, 32], strides = [1, 1]} : vector<8x128xf32> to vector<8x32xf32>
    %609 = vector.extract_strided_slice %606 {offsets = [0, 64], sizes = [8, 32], strides = [1, 1]} : vector<8x128xf32> to vector<8x32xf32>
    %610 = vector.extract_strided_slice %606 {offsets = [0, 96], sizes = [8, 32], strides = [1, 1]} : vector<8x128xf32> to vector<8x32xf32>
    %611 = arith.mulf %608, %588 : vector<8x32xf32>
    %612 = arith.mulf %607, %609 : vector<8x32xf32>
    %613 = arith.addf %611, %612 : vector<8x32xf32>
    %614 = math.tanh %613 : vector<8x32xf32>
    %615 = arith.mulf %610, %614 : vector<8x32xf32>
    %c3_i32_212 = arith.constant 3 : i32
    %616 = arith.index_cast %c3_i32_212 : i32 to index
    %c0_213 = arith.constant 0 : index
    %c0_214 = arith.constant 0 : index
    %617 = vector.load %arg18[%616, %c0_213, %c0_214] : memref<8x8x128xf32, #tpu.memory_space<vmem>>, vector<1x8x128xf32>
    %618 = vector.shape_cast %617 : vector<1x8x128xf32> to vector<8x128xf32>
    %619 = arith.truncf %615 : vector<8x32xf32> to vector<8x32xbf16>
    %cst_215 = arith.constant dense<0.000000e+00> : vector<8x128xf32>
    %620 = tpu.matmul %619, %536, %cst_215 {dimension_numbers = #tpu.dot_dimension_numbers<[1], [0], [0], [1], [0, 0, 1, 1], [], []>} : vector<8x32xbf16>, vector<32x128xbf16>, vector<8x128xf32> -> vector<8x128xf32>
    %621 = arith.addf %618, %620 : vector<8x128xf32>
    %622 = vector.broadcast %11 : vector<1x128xf32> to vector<8x128xf32>
    %623 = arith.mulf %621, %622 : vector<8x128xf32>
    %624 = math.tanh %623 : vector<8x128xf32>
    %cst_216 = arith.constant 5.000000e-01 : f32
    %625 = vector.broadcast %cst_216 : f32 to vector<8x128xf32>
    %626 = arith.mulf %625, %624 : vector<8x128xf32>
    %cst_217 = arith.constant 5.000000e-01 : f32
    %627 = vector.broadcast %cst_217 : f32 to vector<8x128xf32>
    %628 = arith.addf %626, %627 : vector<8x128xf32>
    %629 = vector.shape_cast %8 : vector<1x128xi1> to vector<1x128xi1>
    %630 = vector.broadcast %629 : vector<1x128xi1> to vector<8x128xi1>
    %631 = arith.select %630, %624, %628 : vector<8x128xi1>, vector<8x128xf32>
    %632 = vector.extract_strided_slice %631 {offsets = [0, 0], sizes = [8, 32], strides = [1, 1]} : vector<8x128xf32> to vector<8x32xf32>
    %633 = vector.extract_strided_slice %631 {offsets = [0, 32], sizes = [8, 32], strides = [1, 1]} : vector<8x128xf32> to vector<8x32xf32>
    %634 = vector.extract_strided_slice %631 {offsets = [0, 64], sizes = [8, 32], strides = [1, 1]} : vector<8x128xf32> to vector<8x32xf32>
    %635 = vector.extract_strided_slice %631 {offsets = [0, 96], sizes = [8, 32], strides = [1, 1]} : vector<8x128xf32> to vector<8x32xf32>
    %636 = arith.mulf %633, %613 : vector<8x32xf32>
    %637 = arith.mulf %632, %634 : vector<8x32xf32>
    %638 = arith.addf %636, %637 : vector<8x32xf32>
    %639 = math.tanh %638 : vector<8x32xf32>
    %640 = arith.mulf %635, %639 : vector<8x32xf32>
    %c4_i32_218 = arith.constant 4 : i32
    %641 = arith.index_cast %c4_i32_218 : i32 to index
    %c0_219 = arith.constant 0 : index
    %c0_220 = arith.constant 0 : index
    %642 = vector.load %arg18[%641, %c0_219, %c0_220] : memref<8x8x128xf32, #tpu.memory_space<vmem>>, vector<1x8x128xf32>
    %643 = vector.shape_cast %642 : vector<1x8x128xf32> to vector<8x128xf32>
    %644 = arith.truncf %640 : vector<8x32xf32> to vector<8x32xbf16>
    %cst_221 = arith.constant dense<0.000000e+00> : vector<8x128xf32>
    %645 = tpu.matmul %644, %536, %cst_221 {dimension_numbers = #tpu.dot_dimension_numbers<[1], [0], [0], [1], [0, 0, 1, 1], [], []>} : vector<8x32xbf16>, vector<32x128xbf16>, vector<8x128xf32> -> vector<8x128xf32>
    %646 = arith.addf %643, %645 : vector<8x128xf32>
    %647 = vector.broadcast %11 : vector<1x128xf32> to vector<8x128xf32>
    %648 = arith.mulf %646, %647 : vector<8x128xf32>
    %649 = math.tanh %648 : vector<8x128xf32>
    %cst_222 = arith.constant 5.000000e-01 : f32
    %650 = vector.broadcast %cst_222 : f32 to vector<8x128xf32>
    %651 = arith.mulf %650, %649 : vector<8x128xf32>
    %cst_223 = arith.constant 5.000000e-01 : f32
    %652 = vector.broadcast %cst_223 : f32 to vector<8x128xf32>
    %653 = arith.addf %651, %652 : vector<8x128xf32>
    %654 = vector.shape_cast %8 : vector<1x128xi1> to vector<1x128xi1>
    %655 = vector.broadcast %654 : vector<1x128xi1> to vector<8x128xi1>
    %656 = arith.select %655, %649, %653 : vector<8x128xi1>, vector<8x128xf32>
    %657 = vector.extract_strided_slice %656 {offsets = [0, 0], sizes = [8, 32], strides = [1, 1]} : vector<8x128xf32> to vector<8x32xf32>
    %658 = vector.extract_strided_slice %656 {offsets = [0, 32], sizes = [8, 32], strides = [1, 1]} : vector<8x128xf32> to vector<8x32xf32>
    %659 = vector.extract_strided_slice %656 {offsets = [0, 64], sizes = [8, 32], strides = [1, 1]} : vector<8x128xf32> to vector<8x32xf32>
    %660 = vector.extract_strided_slice %656 {offsets = [0, 96], sizes = [8, 32], strides = [1, 1]} : vector<8x128xf32> to vector<8x32xf32>
    %661 = arith.mulf %658, %638 : vector<8x32xf32>
    %662 = arith.mulf %657, %659 : vector<8x32xf32>
    %663 = arith.addf %661, %662 : vector<8x32xf32>
    %664 = math.tanh %663 : vector<8x32xf32>
    %665 = arith.mulf %660, %664 : vector<8x32xf32>
    %c5_i32_224 = arith.constant 5 : i32
    %666 = arith.index_cast %c5_i32_224 : i32 to index
    %c0_225 = arith.constant 0 : index
    %c0_226 = arith.constant 0 : index
    %667 = vector.load %arg18[%666, %c0_225, %c0_226] : memref<8x8x128xf32, #tpu.memory_space<vmem>>, vector<1x8x128xf32>
    %668 = vector.shape_cast %667 : vector<1x8x128xf32> to vector<8x128xf32>
    %669 = arith.truncf %665 : vector<8x32xf32> to vector<8x32xbf16>
    %cst_227 = arith.constant dense<0.000000e+00> : vector<8x128xf32>
    %670 = tpu.matmul %669, %536, %cst_227 {dimension_numbers = #tpu.dot_dimension_numbers<[1], [0], [0], [1], [0, 0, 1, 1], [], []>} : vector<8x32xbf16>, vector<32x128xbf16>, vector<8x128xf32> -> vector<8x128xf32>
    %671 = arith.addf %668, %670 : vector<8x128xf32>
    %672 = vector.broadcast %11 : vector<1x128xf32> to vector<8x128xf32>
    %673 = arith.mulf %671, %672 : vector<8x128xf32>
    %674 = math.tanh %673 : vector<8x128xf32>
    %cst_228 = arith.constant 5.000000e-01 : f32
    %675 = vector.broadcast %cst_228 : f32 to vector<8x128xf32>
    %676 = arith.mulf %675, %674 : vector<8x128xf32>
    %cst_229 = arith.constant 5.000000e-01 : f32
    %677 = vector.broadcast %cst_229 : f32 to vector<8x128xf32>
    %678 = arith.addf %676, %677 : vector<8x128xf32>
    %679 = vector.shape_cast %8 : vector<1x128xi1> to vector<1x128xi1>
    %680 = vector.broadcast %679 : vector<1x128xi1> to vector<8x128xi1>
    %681 = arith.select %680, %674, %678 : vector<8x128xi1>, vector<8x128xf32>
    %682 = vector.extract_strided_slice %681 {offsets = [0, 0], sizes = [8, 32], strides = [1, 1]} : vector<8x128xf32> to vector<8x32xf32>
    %683 = vector.extract_strided_slice %681 {offsets = [0, 32], sizes = [8, 32], strides = [1, 1]} : vector<8x128xf32> to vector<8x32xf32>
    %684 = vector.extract_strided_slice %681 {offsets = [0, 64], sizes = [8, 32], strides = [1, 1]} : vector<8x128xf32> to vector<8x32xf32>
    %685 = vector.extract_strided_slice %681 {offsets = [0, 96], sizes = [8, 32], strides = [1, 1]} : vector<8x128xf32> to vector<8x32xf32>
    %686 = arith.mulf %683, %663 : vector<8x32xf32>
    %687 = arith.mulf %682, %684 : vector<8x32xf32>
    %688 = arith.addf %686, %687 : vector<8x32xf32>
    %689 = math.tanh %688 : vector<8x32xf32>
    %690 = arith.mulf %685, %689 : vector<8x32xf32>
    %c6_i32_230 = arith.constant 6 : i32
    %691 = arith.index_cast %c6_i32_230 : i32 to index
    %c0_231 = arith.constant 0 : index
    %c0_232 = arith.constant 0 : index
    %692 = vector.load %arg18[%691, %c0_231, %c0_232] : memref<8x8x128xf32, #tpu.memory_space<vmem>>, vector<1x8x128xf32>
    %693 = vector.shape_cast %692 : vector<1x8x128xf32> to vector<8x128xf32>
    %694 = arith.truncf %690 : vector<8x32xf32> to vector<8x32xbf16>
    %cst_233 = arith.constant dense<0.000000e+00> : vector<8x128xf32>
    %695 = tpu.matmul %694, %536, %cst_233 {dimension_numbers = #tpu.dot_dimension_numbers<[1], [0], [0], [1], [0, 0, 1, 1], [], []>} : vector<8x32xbf16>, vector<32x128xbf16>, vector<8x128xf32> -> vector<8x128xf32>
    %696 = arith.addf %693, %695 : vector<8x128xf32>
    %697 = vector.broadcast %11 : vector<1x128xf32> to vector<8x128xf32>
    %698 = arith.mulf %696, %697 : vector<8x128xf32>
    %699 = math.tanh %698 : vector<8x128xf32>
    %cst_234 = arith.constant 5.000000e-01 : f32
    %700 = vector.broadcast %cst_234 : f32 to vector<8x128xf32>
    %701 = arith.mulf %700, %699 : vector<8x128xf32>
    %cst_235 = arith.constant 5.000000e-01 : f32
    %702 = vector.broadcast %cst_235 : f32 to vector<8x128xf32>
    %703 = arith.addf %701, %702 : vector<8x128xf32>
    %704 = vector.shape_cast %8 : vector<1x128xi1> to vector<1x128xi1>
    %705 = vector.broadcast %704 : vector<1x128xi1> to vector<8x128xi1>
    %706 = arith.select %705, %699, %703 : vector<8x128xi1>, vector<8x128xf32>
    %707 = vector.extract_strided_slice %706 {offsets = [0, 0], sizes = [8, 32], strides = [1, 1]} : vector<8x128xf32> to vector<8x32xf32>
    %708 = vector.extract_strided_slice %706 {offsets = [0, 32], sizes = [8, 32], strides = [1, 1]} : vector<8x128xf32> to vector<8x32xf32>
    %709 = vector.extract_strided_slice %706 {offsets = [0, 64], sizes = [8, 32], strides = [1, 1]} : vector<8x128xf32> to vector<8x32xf32>
    %710 = vector.extract_strided_slice %706 {offsets = [0, 96], sizes = [8, 32], strides = [1, 1]} : vector<8x128xf32> to vector<8x32xf32>
    %711 = arith.mulf %708, %688 : vector<8x32xf32>
    %712 = arith.mulf %707, %709 : vector<8x32xf32>
    %713 = arith.addf %711, %712 : vector<8x32xf32>
    %714 = math.tanh %713 : vector<8x32xf32>
    %715 = arith.mulf %710, %714 : vector<8x32xf32>
    %c7_i32_236 = arith.constant 7 : i32
    %716 = arith.index_cast %c7_i32_236 : i32 to index
    %c0_237 = arith.constant 0 : index
    %c0_238 = arith.constant 0 : index
    %717 = vector.load %arg18[%716, %c0_237, %c0_238] : memref<8x8x128xf32, #tpu.memory_space<vmem>>, vector<1x8x128xf32>
    %718 = vector.shape_cast %717 : vector<1x8x128xf32> to vector<8x128xf32>
    %719 = arith.truncf %715 : vector<8x32xf32> to vector<8x32xbf16>
    %cst_239 = arith.constant dense<0.000000e+00> : vector<8x128xf32>
    %720 = tpu.matmul %719, %536, %cst_239 {dimension_numbers = #tpu.dot_dimension_numbers<[1], [0], [0], [1], [0, 0, 1, 1], [], []>} : vector<8x32xbf16>, vector<32x128xbf16>, vector<8x128xf32> -> vector<8x128xf32>
    %721 = arith.addf %718, %720 : vector<8x128xf32>
    %722 = vector.broadcast %11 : vector<1x128xf32> to vector<8x128xf32>
    %723 = arith.mulf %721, %722 : vector<8x128xf32>
    %724 = math.tanh %723 : vector<8x128xf32>
    %cst_240 = arith.constant 5.000000e-01 : f32
    %725 = vector.broadcast %cst_240 : f32 to vector<8x128xf32>
    %726 = arith.mulf %725, %724 : vector<8x128xf32>
    %cst_241 = arith.constant 5.000000e-01 : f32
    %727 = vector.broadcast %cst_241 : f32 to vector<8x128xf32>
    %728 = arith.addf %726, %727 : vector<8x128xf32>
    %729 = vector.shape_cast %8 : vector<1x128xi1> to vector<1x128xi1>
    %730 = vector.broadcast %729 : vector<1x128xi1> to vector<8x128xi1>
    %731 = arith.select %730, %724, %728 : vector<8x128xi1>, vector<8x128xf32>
    %732 = vector.extract_strided_slice %731 {offsets = [0, 0], sizes = [8, 32], strides = [1, 1]} : vector<8x128xf32> to vector<8x32xf32>
    %733 = vector.extract_strided_slice %731 {offsets = [0, 32], sizes = [8, 32], strides = [1, 1]} : vector<8x128xf32> to vector<8x32xf32>
    %734 = vector.extract_strided_slice %731 {offsets = [0, 64], sizes = [8, 32], strides = [1, 1]} : vector<8x128xf32> to vector<8x32xf32>
    %735 = vector.extract_strided_slice %731 {offsets = [0, 96], sizes = [8, 32], strides = [1, 1]} : vector<8x128xf32> to vector<8x32xf32>
    %736 = arith.mulf %733, %713 : vector<8x32xf32>
    %737 = arith.mulf %732, %734 : vector<8x32xf32>
    %738 = arith.addf %736, %737 : vector<8x32xf32>
    %739 = math.tanh %738 : vector<8x32xf32>
    %740 = arith.mulf %735, %739 : vector<8x32xf32>
    %c8_i32_242 = arith.constant 8 : i32
    %c2_243 = arith.constant 2 : index
    %c0_244 = arith.constant 0 : index
    %c0_245 = arith.constant 0 : index
    %741 = vector.load %arg15[%c2_243, %c0_244, %c0_245] : memref<3x8x32xf32, #tpu.memory_space<vmem>>, vector<1x8x32xf32>
    %742 = vector.shape_cast %741 : vector<1x8x32xf32> to vector<8x32xf32>
    %743 = vector.shape_cast %740 : vector<8x32xf32> to vector<1x8x32xf32>
    tpu.vector_store %arg15[%c2_243, %c0_244, %c0_245], %743 {strides = array<i32>} : memref<3x8x32xf32, #tpu.memory_space<vmem>>, vector<1x8x32xf32>,
    %c2_246 = arith.constant 2 : index
    %c0_247 = arith.constant 0 : index
    %c0_248 = arith.constant 0 : index
    %744 = vector.load %arg16[%c2_246, %c0_247, %c0_248] : memref<3x8x32xf32, #tpu.memory_space<vmem>>, vector<1x8x32xf32>
    %745 = vector.shape_cast %744 : vector<1x8x32xf32> to vector<8x32xf32>
    %746 = vector.shape_cast %738 : vector<8x32xf32> to vector<1x8x32xf32>
    tpu.vector_store %arg16[%c2_246, %c0_247, %c0_248], %746 {strides = array<i32>} : memref<3x8x32xf32, #tpu.memory_space<vmem>>, vector<1x8x32xf32>,
    %c0_i32_249 = arith.constant 0 : i32
    %747 = arith.cmpi eq, %arg0, %c0_i32_249 : i32
    %748 = arith.extui %747 : i1 to i32
    %c0_i32_250 = arith.constant 0 : i32
    %749 = arith.cmpi ne, %748, %c0_i32_250 : i32
    scf.if %749 {
      %c0_251 = arith.constant 0 : index
      %c0_252 = arith.constant 0 : index
      %750 = vector.load %arg12[%c0_251, %c0_252] : memref<1x32xf32, #tpu.memory_space<vmem>>, vector<1x32xf32>
      %751 = vector.broadcast %750 : vector<1x32xf32> to vector<8x32xf32>
      %752 = arith.mulf %740, %751 : vector<8x32xf32>
      %cst_253 = arith.constant dense<0.000000e+00> : vector<8xf32>
      %753 = vector.multi_reduction <add>, %752, %cst_253 [1] : vector<8x32xf32> to vector<8xf32>
      %754 = vector.shape_cast %753 : vector<8xf32> to vector<8x1xf32>
      %c0_254 = arith.constant 0 : index
      %c0_255 = arith.constant 0 : index
      %755 = memref.load %arg13[%c0_254, %c0_255] : memref<1x1xf32, #tpu.memory_space<smem>>
      %756 = vector.broadcast %755 : f32 to vector<8x1xf32>
      %757 = arith.addf %754, %756 : vector<8x1xf32>
      %cst_256 = arith.constant 5.000000e-01 : f32
      %758 = vector.broadcast %cst_256 : f32 to vector<8x1xf32>
      %759 = arith.mulf %758, %757 : vector<8x1xf32>
      %760 = math.tanh %759 : vector<8x1xf32>
      %cst_257 = arith.constant 1.000000e+00 : f32
      %761 = vector.broadcast %cst_257 : f32 to vector<8x1xf32>
      %762 = arith.addf %760, %761 : vector<8x1xf32>
      %cst_258 = arith.constant 5.000000e-01 : f32
      %763 = vector.broadcast %cst_258 : f32 to vector<8x1xf32>
      %764 = arith.mulf %763, %762 : vector<8x1xf32>
      %c0_259 = arith.constant 0 : index
      %c0_260 = arith.constant 0 : index
      %765 = vector.load %arg14[%c0_259, %c0_260] : memref<8x1xf32, #tpu.memory_space<vmem>>, vector<8x1xf32>
      tpu.vector_store %arg14[%c0_259, %c0_260], %764 {strides = array<i32>} : memref<8x1xf32, #tpu.memory_space<vmem>>, vector<8x1xf32>,
    } else {
    }
    return
  }
  func.func @transform_0(%arg0: i32) -> (i32, i32) {
    %c0_i32 = arith.constant 0 : i32
    %c0_i32_0 = arith.constant 0 : i32
    return %arg0, %c0_i32 : i32, i32
  }
  func.func @transform_1(%arg0: i32) -> (i32, i32) {
    %c0_i32 = arith.constant 0 : i32
    %c0_i32_0 = arith.constant 0 : i32
    %c0_i32_1 = arith.constant 0 : i32
    return %c0_i32, %c0_i32_0 : i32, i32
  }
  func.func @transform_2(%arg0: i32) -> (i32, i32) {
    %c0_i32 = arith.constant 0 : i32
    %c0_i32_0 = arith.constant 0 : i32
    %c0_i32_1 = arith.constant 0 : i32
    return %c0_i32, %c0_i32_0 : i32, i32
  }
  func.func @transform_3(%arg0: i32) -> (i32, i32) {
    %c0_i32 = arith.constant 0 : i32
    %c0_i32_0 = arith.constant 0 : i32
    %c0_i32_1 = arith.constant 0 : i32
    return %c0_i32, %c0_i32_0 : i32, i32
  }
  func.func @transform_4(%arg0: i32) -> (i32, i32) {
    %c0_i32 = arith.constant 0 : i32
    %c0_i32_0 = arith.constant 0 : i32
    %c0_i32_1 = arith.constant 0 : i32
    return %c0_i32, %c0_i32_0 : i32, i32
  }
  func.func @transform_5(%arg0: i32) -> (i32, i32) {
    %c0_i32 = arith.constant 0 : i32
    %c0_i32_0 = arith.constant 0 : i32
    %c0_i32_1 = arith.constant 0 : i32
    return %c0_i32, %c0_i32_0 : i32, i32
  }
  func.func @transform_6(%arg0: i32) -> (i32, i32) {
    %c0_i32 = arith.constant 0 : i32
    %c0_i32_0 = arith.constant 0 : i32
    %c0_i32_1 = arith.constant 0 : i32
    return %c0_i32, %c0_i32_0 : i32, i32
  }
  func.func @transform_7(%arg0: i32) -> (i32, i32) {
    %c0_i32 = arith.constant 0 : i32
    %c0_i32_0 = arith.constant 0 : i32
    %c0_i32_1 = arith.constant 0 : i32
    return %c0_i32, %c0_i32_0 : i32, i32
  }
  func.func @transform_8(%arg0: i32) -> (i32, i32) {
    %c0_i32 = arith.constant 0 : i32
    %c0_i32_0 = arith.constant 0 : i32
    %c0_i32_1 = arith.constant 0 : i32
    return %c0_i32, %c0_i32_0 : i32, i32
  }
  func.func @transform_9(%arg0: i32) -> (i32, i32) {
    %c0_i32 = arith.constant 0 : i32
    %c0_i32_0 = arith.constant 0 : i32
    %c0_i32_1 = arith.constant 0 : i32
    return %c0_i32, %c0_i32_0 : i32, i32
  }
  func.func @transform_10(%arg0: i32) -> (i32, i32) {
    %c0_i32 = arith.constant 0 : i32
    %c0_i32_0 = arith.constant 0 : i32
    %c0_i32_1 = arith.constant 0 : i32
    return %c0_i32, %c0_i32_0 : i32, i32
  }
  func.func @transform_11(%arg0: i32) -> (i32, i32) {
    %c0_i32 = arith.constant 0 : i32
    %c0_i32_0 = arith.constant 0 : i32
    %c0_i32_1 = arith.constant 0 : i32
    return %c0_i32, %c0_i32_0 : i32, i32
  }
  func.func @transform_12(%arg0: i32) -> (i32, i32) {
    %c0_i32 = arith.constant 0 : i32
    %c0_i32_0 = arith.constant 0 : i32
    %c0_i32_1 = arith.constant 0 : i32
    return %c0_i32, %c0_i32_0 : i32, i32
  }
  func.func @transform_13(%arg0: i32) -> (i32, i32) {
    %c0_i32 = arith.constant 0 : i32
    %c0_i32_0 = arith.constant 0 : i32
    %c0_i32_1 = arith.constant 0 : i32
    return %c0_i32, %c0_i32_0 : i32, i32
  }
}

</mosaic_0001>

<bundles_post_ra>
// kernel: critic_forward.1
= control target key start
LH: loop header
LB: loop body
LE: loop exit
PB: predicated region body
PF: predicated region fallthrough
CT: control target
= control target key end

     0   :  { %v2980_v0 = vmov 0   ;;  %vm50_vm0 = vcmask 261120   ;;  %v2981_v9 = vmov 0.0   ;;  %v57_v12 = vlaneseq  ;;  %s2986_s30 = smov 96   ;;  %s3745_s0 = inlined_call_operand.vmem [shape: s32[64,1], index: 0, kind: input, shape index: {}]   ;;  %s3746_s1 = inlined_call_operand.vmem [shape: bf16[32,16], index: 1, kind: input, shape index: {}]   ;;  %s3747_s2 = inlined_call_operand.vmem [shape: bf16[16,128], index: 2, kind: input, shape index: {}]   ;;  %s3748_s3 = inlined_call_operand.vmem [shape: bf16[32,128], index: 3, kind: input, shape index: {}]   ;;  %s3749_s4 = inlined_call_operand.vmem [shape: f32[1,128], index: 4, kind: input, shape index: {}]   ;;  %s3750_s5 = inlined_call_operand.vmem [shape: bf16[32,128], index: 5, kind: input, shape index: {}]   ;;  %s3751_s6 = inlined_call_operand.vmem [shape: bf16[32,128], index: 6, kind: input, shape index: {}]   ;;  %s3752_s7 = inlined_call_operand.vmem [shape: f32[1,128], index: 7, kind: input, shape index: {}]   ;;  %s3753_s8 = inlined_call_operand.vmem [shape: bf16[32,128], index: 8, kind: input, shape index: {}]   ;;  %s3754_s9 = inlined_call_operand.vmem [shape: bf16[32,128], index: 9, kind: input, shape index: {}]   ;;  %s3755_s10 = inlined_call_operand.vmem [shape: f32[1,128], index: 10, kind: input, shape index: {}]   ;;  %s3756_s11 = inlined_call_operand.vmem [shape: f32[1,32], index: 11, kind: input, shape index: {}]   ;;  %s3757_s12 = inlined_call_operand.<no memory space> [shape: f32[1,1], index: 12, kind: input, shape index: {}]   ;;  %s3758_s13 = inlined_call_operand.vmem [shape: f32[8,1], index: 13, kind: output, shape index: {}]  }
   0x1   :  { %2868 = vset.pattern.permute.xlu1 %v2980_v0  ;;  %2867 = vset.pattern.permute.xlu0 %v2980_v0  ;;  %v65_v1 = vld [vmem:[%s3745_s0 + $0x10] sm:$0xff]  ;;  %v63_v2 = vld [vmem:[%s3745_s0] sm:$0xff]  ;;  %v66_v3 = vld [vmem:[%s3745_s0 + $0x18] sm:$0xff]  ;;  %51 = vst.msk [vmem:[#allocation2] sm:$0xff] %vm50_vm0, %v2981_v9  ;;  %vm2982_vm9 = vmmov 0   ;;  %vm228_vm10 = vcmask 130048  }
   0x2   :  { %78 = vperm.xlu1 %2868, %v65_v1   ;;  %72 = vperm.xlu0 %2867, %v63_v2   ;;  %v64_v4 = vld [vmem:[%s3745_s0 + $0x8] sm:$0xff]  ;;  %v2869_v5 = vld [vmem:[%s3746_s1] sm:$0xff]   ;;  %52 = vst.msk [vmem:[#allocation2 + $0x8] sm:$0xff] %vm50_vm0, %v2981_v9  ;;  %53 = vst.msk [vmem:[#allocation2 + $0x10] sm:$0xff] %vm50_vm0, %v2981_v9  ;;  %v3100_v13 = vand.u32 127, %v57_v12  ;;  %vm2464_vm14 = vcmask 7168  }
   0x3   :  { %v2870_v6 = vld [vmem:[%s3746_s1 + $0x8] sm:$0xff]   ;;  %v67_v8 = vld [vmem:[%s3745_s0 + $0x20] sm:$0xff]  ;;  %2622 = vmatprep.subr.bf16.mxu0 %v2869_v5  ;;  %54 = vst.msk [vmem:[#allocation3] sm:$0xff] %vm50_vm0, %v2981_v9  ;;  %55 = vst.msk [vmem:[#allocation3 + $0x8] sm:$0xff] %vm50_vm0, %v2981_v9 }
   0x4   :  { %v68_v7 = vld [vmem:[%s3745_s0 + $0x28] sm:$0xff]  ;;  %2623 = vmatpush3.bf16.msra.mxu0 %v2869_v5  ;;  %56 = vst.msk [vmem:[#allocation3 + $0x10] sm:$0xff] %vm50_vm0, %v2981_v9  ;;  %v70_v10 = vld [vmem:[%s3745_s0 + $0x38] sm:$0xff]  ;;  %v69_v11 = vld [vmem:[%s3745_s0 + $0x30] sm:$0xff]  ;;  %vm59_vm11 = vcmp.ge.s32.totalorder %v3100_v13, 64  ;;  %vm60_vm12 = vcmp.lt.s32.totalorder %v3100_v13, 96 }
   0x5   :  { %2624 = vmatprep.subr.bf16.mxu0 %v2870_v6  ;;  %v2871_v34 = vld [vmem:[%s3747_s2] sm:$0xff]   ;;  %v3136_v36 = vld [vmem:[%s3748_s3 + $0x8] sm:$0xff]   ;;  %s2983_s2 = smov 32   ;;  %vm3173_vm13 = vmand %vm59_vm11, %vm60_vm12 }
   0x6   :  { %81 = vperm.xlu1 %2868, %v66_v3   ;;  %75 = vperm.xlu0 %2867, %v64_v4   ;;  %v3129_v35 = vld [vmem:[%s3748_s3] sm:$0xff]  }
   0x7   :  { %2634 = vmatprep.subr.bf16.mxu1 %v2871_v34  ;;  %v2476_v52 = vld [vmem:[%s3749_s4] ss:$0 sm:$0xff]  ;;  %s2985_s4 = smov 64  }
   0x8   :  { %2625 = vmatpush3.bf16.msra.mxu0 %v2870_v6  ;;  %2635 = vmatpush3.bf16.msra.mxu1 %v2871_v34  ;;  %v318_v50 = vld [vmem:[#allocation2] sm:$0xff]  ;;  %v2984_v6 = vmov 0.5  }
   0x9   :  { %2652 = vmatprep.subr.bf16.mxu0 %v2981_v9  ;;  %2644 = vmatprep.subr.bf16.mxu1 %v2981_v9  ;;  %v321_v51 = vpack.c.bf16 %v318_v50, %v318_v50 }
   0xa   :  { %87 = vperm.xlu1 %2868, %v68_v7   ;;  %84 = vperm.xlu0 %2867, %v67_v8   ;;  %v319_v37 = vld [vmem:[#allocation3] sm:$0xff]  ;;  %v3179_v7 = vsel %vm3173_vm13, 1.0, %v2984_v6 }
   0xe   :  { %93 = vperm.xlu1 %2868, %v70_v10   ;;  %90 = vperm.xlu0 %2867, %v69_v11  }
  0x12   :  { %386 = vrot.lane.b32.xlu1 %v319_v37, %s2983_s2 }
  0x81   :  { %v79_v14 = vpop.permute.xlu1 %78  ;;  %v73_v15 = vpop.permute.xlu0 %72 }
  0x82   :  { %vm97_vm1 = vcmp.eq.s32.totalorder %v3100_v13, %v79_v14  ;;  %vm95_vm2 = vcmp.eq.s32.totalorder %v3100_v13, %v73_v15 }
  0x83   :  { %v105_v18 = vsel %vm97_vm1, 1.0, %v2981_v9  ;;  %v103_v20 = vsel %vm95_vm2, 1.0, %v2981_v9 }
  0x85   :  { %v82_v16 = vpop.permute.xlu1 %81  ;;  %v76_v17 = vpop.permute.xlu0 %75 }
  0x86   :  { %vm98_vm3 = vcmp.eq.s32.totalorder %v3100_v13, %v82_v16  ;;  %vm96_vm4 = vcmp.eq.s32.totalorder %v3100_v13, %v76_v17 }
  0x87   :  { %v106_v19 = vsel %vm98_vm3, 1.0, %v2981_v9  ;;  %v104_v21 = vsel %vm96_vm4, 1.0, %v2981_v9 }
  0x88   :  { %v112_v22 = vpack.c.bf16 %v106_v19, %v105_v18  ;;  %v111_v23 = vpack.c.bf16 %v104_v21, %v103_v20 }
  0x89   :  { %v88_v24 = vpop.permute.xlu1 %87  ;;  %v85_v25 = vpop.permute.xlu0 %84 }
  0x8a   :  { %vm100_vm5 = vcmp.eq.s32.totalorder %v3100_v13, %v88_v24  ;;  %vm99_vm6 = vcmp.eq.s32.totalorder %v3100_v13, %v85_v25  ;;  %2626 = vmatprep.mubr.msk.bf16.mxu0 %vm50_vm0, %v111_v23 }
  0x8b   :  { %v108_v26 = vsel %vm100_vm5, 1.0, %v2981_v9  ;;  %v107_v27 = vsel %vm99_vm6, 1.0, %v2981_v9  ;;  %2627 = vmatmul.mubr.msk.bf16.vlgmr.msra.gmra.mrb[0].mxu0 %vm50_vm0, %v112_v22 }
  0x8c   :  { %v113_v28 = vpack.c.bf16 %v108_v26, %v107_v27  ;;  %2653 = vmatpush3.bf16.msra.mxu0 %v3129_v35 }
  0x8d   :  { %v94_v29 = vpop.permute.xlu1 %93  ;;  %v91_v30 = vpop.permute.xlu0 %90  ;;  %2654 = vmatprep.subr.bf16.mxu0 %v2981_v9 }
  0x8e   :  { %vm102_vm7 = vcmp.eq.s32.totalorder %v3100_v13, %v94_v29  ;;  %vm101_vm8 = vcmp.eq.s32.totalorder %v3100_v13, %v91_v30  ;;  %2630 = vmatprep.mubr.msk.bf16.mxu0 %vm50_vm0, %v113_v28 }
  0x8f   :  { %v110_v31 = vsel %vm102_vm7, 1.0, %v2981_v9  ;;  %v109_v32 = vsel %vm101_vm8, 1.0, %v2981_v9 }
  0x90   :  { %v114_v33 = vpack.c.bf16 %v110_v31, %v109_v32  ;;  %2655 = vmatpush3.bf16.msra.mxu0 %v3136_v36 }
  0x91   :  { %2668 = vmatprep.subr.bf16.mxu0 %v2981_v9  ;;  %v387_v21 = vpop.permute.xlu1 %386 }
  0x93   :  { %2631 = vmatmul.mubr.msk.bf16.gmra.mrb[4].mxu0 %vm50_vm0, %v114_v33 }
  0x94   :  { %2656 = vmatprep.mubr.msk.bf16.mxu0 %vm2982_vm9, %v2981_v9 }
 0x15e   :  { %v2628_v38 = vpop.f32.mrb[0].mxu0 }
 0x15f   :  { %v178_v39 = vpop.f32.mrb[1].mxu0 }
 0x160   :  { %v2629_v40 = vpop.f32.mrb[2].mxu0 }
 0x161   :  { %v210_v41 = vpack.c.bf16 %v2629_v40, %v2628_v38  ;;  %v181_v42 = vpop.f32.mrb[3].mxu0 }
 0x162   :  { %v209_v43 = vpack.c.bf16 %v181_v42, %v178_v39 }
 0x164   :  { %2636 = vmatprep.mubr.msk.bf16.mxu1 %vm228_vm10, %v209_v43 }
 0x165   :  { %2637 = vmatmul.mubr.msk.bf16.vlgmr.msra.gmra.mrb[0].mxu1 %vm228_vm10, %v210_v41 }
 0x166   :  { %2645 = vmatpush3.bf16.msra.mxu1 %v3129_v35  ;;  %v2632_v44 = vpop.f32.mrb[4].mxu0 }
 0x167   :  { %v194_v45 = vpop.f32.mrb[5].mxu0  ;;  %2646 = vmatprep.subr.bf16.mxu1 %v2981_v9 }
 0x168   :  { %v2633_v46 = vpop.f32.mrb[6].mxu0 }
 0x169   :  { %v212_v47 = vpack.c.bf16 %v2633_v46, %v2632_v44  ;;  %v197_v48 = vpop.f32.mrb[7].mxu0 }
 0x16a   :  { %v211_v49 = vpack.c.bf16 %v197_v48, %v194_v45  ;;  %2647 = vmatpush3.bf16.msra.mxu1 %v3136_v36 }
 0x16b   :  { %2660 = vmatprep.subr.bf16.mxu1 %v2981_v9 }
 0x16c   :  { %2640 = vmatprep.mubr.msk.bf16.mxu1 %vm228_vm10, %v211_v49 }
 0x16d   :  { %2641 = vmatmul.mubr.msk.bf16.gmra.mrb[4].mxu1 %vm228_vm10, %v212_v47 }
 0x16e   :  { %2648 = vmatprep.mubr.msk.bf16.mxu1 %vm2982_vm9, %v2981_v9 }
 0x175   :  { %2649 = vmatmul.mubr.msk.bf16.vlgmr.msra.gmra.mrb[8].mxu1 %vm50_vm0, %v321_v51 }
 0x176   :  { %2661 = vmatpush3.bf16.msra.mxu1 %v3129_v35  ;;  %2664 = vmatprep.mubr.msk.bf16.mxu1 %vm2982_vm9, %v2981_v9 }
 0x177   :  { %2662 = vmatprep.subr.bf16.mxu1 %v2981_v9 }
 0x17a   :  { %2663 = vmatpush3.bf16.msra.mxu1 %v3136_v36 }
 0x17b   :  { %2676 = vmatprep.subr.bf16.mxu1 %v2981_v9 }
 0x238   :  { %v2638_v53 = vpop.f32.mrb[0].mxu1 }
 0x239   :  { %v3159_v54 = vadd.f32 %v2638_v53, %v2476_v52  ;;  %v275_v55 = vpop.f32.mrb[1].mxu1 }
 0x23a   :  { %v2639_v56 = vpop.f32.mrb[2].mxu1  ;;  %v276_v5 = vadd.f32 %v2476_v52, %v275_v55 }
 0x23b   :  { %v3161_v57 = vadd.f32 %v2639_v56, %v2476_v52  ;;  %v278_v58 = vpop.f32.mrb[3].mxu1 }
 0x23c   :  { %v279_v59 = vadd.f32 %v2476_v52, %v278_v58 }
 0x240   :  { %v2642_v60 = vpop.f32.mrb[4].mxu1 }
 0x241   :  { %v3163_v61 = vadd.f32 %v2642_v60, %v2476_v52  ;;  %v291_v62 = vpop.f32.mrb[5].mxu1 }
 0x242   :  { %v3167_v63 = vadd.f32 %v2476_v52, %v291_v62  ;;  %v2643_v0 = vpop.f32.mrb[6].mxu1 }
 0x243   :  { %v3169_v1 = vadd.f32 %v2643_v0, %v2476_v52  ;;  %v294_v2 = vpop.f32.mrb[7].mxu1 }
 0x244   :  { %v3171_v3 = vadd.f32 %v2476_v52, %v294_v2 }
 0x248   :  { %v371_v8 = vpop.f32.mrb[8].mxu1 }
 0x249   :  { %v377_v10 = vadd.f32 %v371_v8, %v276_v5  ;;  %v2650_v11 = vpop.f32.mrb[9].mxu1 }
 0x24a   :  { %v374_v12 = vpop.f32.mrb[10].mxu1 }
 0x24b   :  { %v378_v13 = vmul.f32 %v377_v10, %v3179_v7  ;;  %v2651_v14 = vpop.f32.mrb[11].mxu1 }
 0x24d   :  { %2882 = vtanh.f32 %v378_v13 }
 0x257   :  { %v2883_v15 = vpop.eup %2882 }
 0x258   :  { %v380_v16 = vmul.f32 0.5, %v2883_v15 }
 0x25a   :  { %v381_v17 = vadd.f32 0.5, %v380_v16 }
 0x25c   :  { %v384_v18 = vsel %vm3173_vm13, %v2883_v15, %v381_v17 }
 0x25d   :  { %391 = vrot.lane.b32.xlu0 %v384_v18, %s2985_s4  ;;  %v389_v22 = vmul.f32 %v387_v21, %v384_v18 }
 0x2cf   :  { %v392_v19 = vpop.permute.xlu0 %391 }
 0x2d0   :  { %v394_v20 = vmul.f32 %v392_v19, %v384_v18 }
 0x2d2   :  { %396 = vrot.lane.b32.xlu0 %v394_v20, %s2983_s2 }
 0x344   :  { %v397_v23 = vpop.permute.xlu0 %396 }
 0x345   :  { %v399_v24 = vadd.f32 %v397_v23, %v389_v22 }
 0x347   :  { %2884 = vtanh.f32 %v399_v24 }
 0x351   :  { %v2885_v25 = vpop.eup %2884 }
 0x352   :  { %402 = vrot.lane.b32.xlu1 %v2885_v25, %s2985_s4 }
 0x3c4   :  { %v403_v26 = vpop.permute.xlu1 %402 }
 0x3c5   :  { %v3187_v27 = vmul.f32 %v403_v26, %v384_v18 }
 0x3c7   :  { %v413_v28 = vpack.c.bf16 %v3187_v27, %v3187_v27 }
 0x3c9   :  { %415 = vrot.lane.b32.xlu0 %v413_v28, %s2983_s2 }
 0x43b   :  { %v416_v29 = vpop.permute.xlu0 %415 }
 0x43c   :  { %2657 = vmatmul.mubr.msk.bf16.vlgmr.msra.gmra.mrb[8].mxu0 %vm50_vm0, %v416_v29 }
 0x43d   :  { %2669 = vmatpush3.bf16.msra.mxu0 %v3129_v35  ;;  %2672 = vmatprep.mubr.msk.bf16.mxu0 %vm2982_vm9, %v2981_v9 }
 0x43e   :  { %2670 = vmatprep.subr.bf16.mxu0 %v2981_v9 }
 0x441   :  { %2671 = vmatpush3.bf16.msra.mxu0 %v3136_v36 }
 0x442   :  { %2684 = vmatprep.subr.bf16.mxu0 %v2981_v9 }
 0x50f   :  { %v454_v30 = vpop.f32.mrb[8].mxu0 }
 0x510   :  { %v460_v31 = vadd.f32 %v454_v30, %v279_v59  ;;  %v2658_v32 = vpop.f32.mrb[9].mxu0 }
 0x511   :  { %v457_v33 = vpop.f32.mrb[10].mxu0 }
 0x512   :  { %v461_v34 = vmul.f32 %v460_v31, %v3179_v7  ;;  %v2659_v37 = vpop.f32.mrb[11].mxu0 }
 0x514   :  { %2886 = vtanh.f32 %v461_v34 }
 0x51e   :  { %v2887_v38 = vpop.eup %2886 }
 0x51f   :  { %v463_v39 = vmul.f32 0.5, %v2887_v38 }
 0x521   :  { %v464_v40 = vadd.f32 0.5, %v463_v39 }
 0x523   :  { %v465_v41 = vsel %vm3173_vm13, %v2887_v38, %v464_v40 }
 0x524   :  { %468 = vrot.lane.b32.xlu1 %v465_v41, %s2985_s4  ;;  %v466_v44 = vmul.f32 %v465_v41, %v399_v24 }
 0x596   :  { %v469_v42 = vpop.permute.xlu1 %468 }
 0x597   :  { %v471_v43 = vmul.f32 %v469_v42, %v465_v41 }
 0x599   :  { %473 = vrot.lane.b32.xlu0 %v471_v43, %s2983_s2 }
 0x60b   :  { %v474_v45 = vpop.permute.xlu0 %473 }
 0x60c   :  { %v476_v46 = vadd.f32 %v474_v45, %v466_v44 }
 0x60e   :  { %2888 = vtanh.f32 %v476_v46 }
 0x618   :  { %v2889_v47 = vpop.eup %2888 }
 0x619   :  { %479 = vrot.lane.b32.xlu1 %v2889_v47, %s2985_s4 }
 0x68b   :  { %v480_v48 = vpop.permute.xlu1 %479 }
 0x68c   :  { %v3205_v49 = vmul.f32 %v480_v48, %v465_v41 }
 0x68e   :  { %v491_v50 = vpack.c.bf16 %v3205_v49, %v3205_v49 }
 0x690   :  { %493 = vrot.lane.b32.xlu0 %v491_v50, %s2983_s2 }
 0x702   :  { %v494_v51 = vpop.permute.xlu0 %493 }
 0x703   :  { %2665 = vmatmul.mubr.msk.bf16.vlgmr.msra.gmra.mrb[12].mxu1 %vm50_vm0, %v494_v51 }
 0x704   :  { %2677 = vmatpush3.bf16.msra.mxu1 %v3129_v35  ;;  %2680 = vmatprep.mubr.msk.bf16.mxu1 %vm2982_vm9, %v2981_v9 }
 0x705   :  { %2678 = vmatprep.subr.bf16.mxu1 %v2981_v9 }
 0x708   :  { %2679 = vmatpush3.bf16.msra.mxu1 %v3136_v36 }
 0x709   :  { %2692 = vmatprep.subr.bf16.mxu1 %v2981_v9 }
 0x7d6   :  { %v532_v52 = vpop.f32.mrb[12].mxu1 }
 0x7d7   :  { %v538_v53 = vadd.f32 %v532_v52, %v3159_v54  ;;  %v2666_v55 = vpop.f32.mrb[13].mxu1 }
 0x7d8   :  { %v535_v56 = vpop.f32.mrb[14].mxu1 }
 0x7d9   :  { %v539_v58 = vmul.f32 %v538_v53, %v3179_v7  ;;  %v2667_v59 = vpop.f32.mrb[15].mxu1 }
 0x7db   :  { %2890 = vtanh.f32 %v539_v58 }
 0x7e5   :  { %v2891_v60 = vpop.eup %2890 }
 0x7e6   :  { %v541_v62 = vmul.f32 0.5, %v2891_v60 }
 0x7e8   :  { %v542_v0 = vadd.f32 0.5, %v541_v62 }
 0x7ea   :  { %v543_v2 = vsel %vm3173_vm13, %v2891_v60, %v542_v0 }
 0x7eb   :  { %546 = vrot.lane.b32.xlu1 %v543_v2, %s2985_s4  ;;  %v544_v8 = vmul.f32 %v543_v2, %v476_v46 }
 0x85d   :  { %v547_v5 = vpop.permute.xlu1 %546 }
 0x85e   :  { %v549_v6 = vmul.f32 %v547_v5, %v543_v2 }
 0x860   :  { %551 = vrot.lane.b32.xlu0 %v549_v6, %s2983_s2 }
 0x8d2   :  { %v552_v54 = vpop.permute.xlu0 %551 }
 0x8d3   :  { %v554_v10 = vadd.f32 %v552_v54, %v544_v8 }
 0x8d5   :  { %2892 = vtanh.f32 %v554_v10 }
 0x8df   :  { %v2893_v11 = vpop.eup %2892 }
 0x8e0   :  { %557 = vrot.lane.b32.xlu1 %v2893_v11, %s2985_s4 }
 0x952   :  { %v558_v12 = vpop.permute.xlu1 %557 }
 0x953   :  { %v3224_v13 = vmul.f32 %v558_v12, %v543_v2 }
 0x955   :  { %v569_v14 = vpack.c.bf16 %v3224_v13, %v3224_v13 }
 0x957   :  { %571 = vrot.lane.b32.xlu0 %v569_v14, %s2983_s2 }
 0x9c9   :  { %v572_v15 = vpop.permute.xlu0 %571 }
 0x9ca   :  { %2673 = vmatmul.mubr.msk.bf16.vlgmr.msra.gmra.mrb[12].mxu0 %vm50_vm0, %v572_v15 }
 0x9cb   :  { %2685 = vmatpush3.bf16.msra.mxu0 %v3129_v35  ;;  %2688 = vmatprep.mubr.msk.bf16.mxu0 %vm2982_vm9, %v2981_v9 }
 0x9cc   :  { %2686 = vmatprep.subr.bf16.mxu0 %v2981_v9 }
 0x9cf   :  { %2687 = vmatpush3.bf16.msra.mxu0 %v3136_v36 }
 0x9d0   :  { %2700 = vmatprep.subr.bf16.mxu0 %v2981_v9 }
 0xa9d   :  { %v610_v16 = vpop.f32.mrb[12].mxu0 }
 0xa9e   :  { %v616_v17 = vadd.f32 %v610_v16, %v3161_v57  ;;  %v2674_v18 = vpop.f32.mrb[13].mxu0 }
 0xa9f   :  { %v613_v19 = vpop.f32.mrb[14].mxu0 }
 0xaa0   :  { %v617_v20 = vmul.f32 %v616_v17, %v3179_v7  ;;  %v2675_v21 = vpop.f32.mrb[15].mxu0 }
 0xaa2   :  { %2894 = vtanh.f32 %v617_v20 }
 0xaac   :  { %v2895_v22 = vpop.eup %2894 }
 0xaad   :  { %v619_v23 = vmul.f32 0.5, %v2895_v22 }
 0xaaf   :  { %v620_v24 = vadd.f32 0.5, %v619_v23 }
 0xab1   :  { %v621_v25 = vsel %vm3173_vm13, %v2895_v22, %v620_v24 }
 0xab2   :  { %624 = vrot.lane.b32.xlu1 %v621_v25, %s2985_s4  ;;  %v622_v29 = vmul.f32 %v621_v25, %v554_v10 }
 0xb24   :  { %v625_v26 = vpop.permute.xlu1 %624 }
 0xb25   :  { %v627_v28 = vmul.f32 %v625_v26, %v621_v25 }
 0xb27   :  { %629 = vrot.lane.b32.xlu0 %v627_v28, %s2983_s2 }
 0xb99   :  { %v630_v57 = vpop.permute.xlu0 %629 }
 0xb9a   :  { %v632_v30 = vadd.f32 %v630_v57, %v622_v29 }
 0xb9c   :  { %2896 = vtanh.f32 %v632_v30 }
 0xba6   :  { %v2897_v31 = vpop.eup %2896 }
 0xba7   :  { %635 = vrot.lane.b32.xlu1 %v2897_v31, %s2985_s4 }
 0xc19   :  { %v636_v32 = vpop.permute.xlu1 %635 }
 0xc1a   :  { %v3243_v33 = vmul.f32 %v636_v32, %v621_v25 }
 0xc1c   :  { %v647_v34 = vpack.c.bf16 %v3243_v33, %v3243_v33 }
 0xc1e   :  { %649 = vrot.lane.b32.xlu0 %v647_v34, %s2983_s2 }
 0xc90   :  { %v650_v37 = vpop.permute.xlu0 %649 }
 0xc91   :  { %2681 = vmatmul.mubr.msk.bf16.vlgmr.msra.gmra.mrb[16].mxu1 %vm50_vm0, %v650_v37 }
 0xc92   :  { %2693 = vmatpush3.bf16.msra.mxu1 %v3129_v35  ;;  %2696 = vmatprep.mubr.msk.bf16.mxu1 %vm2982_vm9, %v2981_v9 }
 0xc93   :  { %2694 = vmatprep.subr.bf16.mxu1 %v2981_v9 }
 0xc96   :  { %2695 = vmatpush3.bf16.msra.mxu1 %v3136_v36 }
 0xd64   :  { %v688_v38 = vpop.f32.mrb[16].mxu1 }
 0xd65   :  { %v694_v39 = vadd.f32 %v688_v38, %v3167_v63  ;;  %v2682_v40 = vpop.f32.mrb[17].mxu1 }
 0xd66   :  { %v691_v41 = vpop.f32.mrb[18].mxu1 }
 0xd67   :  { %v695_v42 = vmul.f32 %v694_v39, %v3179_v7  ;;  %v2683_v43 = vpop.f32.mrb[19].mxu1  ;;  %v2874_v39 = vld [vmem:[%s3750_s5] sm:$0xff]  }
 0xd68   :  { %2708 = vmatprep.subr.bf16.mxu1 %v2874_v39 }
 0xd69   :  { %2898 = vtanh.f32 %v695_v42 }
 0xd73   :  { %v2899_v44 = vpop.eup %2898 }
 0xd74   :  { %v697_v45 = vmul.f32 0.5, %v2899_v44 }
 0xd76   :  { %v698_v46 = vadd.f32 0.5, %v697_v45 }
 0xd78   :  { %v699_v47 = vsel %vm3173_vm13, %v2899_v44, %v698_v46 }
 0xd79   :  { %702 = vrot.lane.b32.xlu1 %v699_v47, %s2985_s4  ;;  %v700_v51 = vmul.f32 %v699_v47, %v632_v30 }
 0xdeb   :  { %v703_v48 = vpop.permute.xlu1 %702 }
 0xdec   :  { %v705_v50 = vmul.f32 %v703_v48, %v699_v47 }
 0xdee   :  { %707 = vrot.lane.b32.xlu0 %v705_v50, %s2983_s2  ;;  %v3324_v50 = vld [vmem:[%s3751_s6] sm:$0xff]  }
 0xe60   :  { %v708_v63 = vpop.permute.xlu0 %707 }
 0xe61   :  { %v710_v52 = vadd.f32 %v708_v63, %v700_v51  ;;  %v3332_v51 = vld [vmem:[%s3751_s6 + $0x8] sm:$0xff]   ;;  %v1090_v63 = vld [vmem:[#allocation3 + $0x8] sm:$0xff] }
 0xe63   :  { %2900 = vtanh.f32 %v710_v52 }
 0xe6d   :  { %v2901_v53 = vpop.eup %2900 }
 0xe6e   :  { %713 = vrot.lane.b32.xlu1 %v2901_v53, %s2985_s4  ;;  %v1088_v53 = vld [vmem:[#allocation2 + $0x8] sm:$0xff] }
 0xee0   :  { %v714_v55 = vpop.permute.xlu1 %713 }
 0xee1   :  { %v3261_v56 = vmul.f32 %v714_v55, %v699_v47  ;;  %v1092_v55 = vpack.c.bf16 %v1088_v53, %v1088_v53 }
 0xee3   :  { %v725_v58 = vpack.c.bf16 %v3261_v56, %v3261_v56 }
 0xee5   :  { %727 = vrot.lane.b32.xlu0 %v725_v58, %s2983_s2 }
 0xf57   :  { %v728_v59 = vpop.permute.xlu0 %727 }
 0xf58   :  { %2689 = vmatmul.mubr.msk.bf16.vlgmr.msra.gmra.mrb[16].mxu0 %vm50_vm0, %v728_v59 }
 0xf59   :  { %2701 = vmatpush3.bf16.msra.mxu0 %v3129_v35  ;;  %2704 = vmatprep.mubr.msk.bf16.mxu0 %vm2982_vm9, %v2981_v9 }
 0xf5a   :  { %2702 = vmatprep.subr.bf16.mxu0 %v2981_v9 }
 0xf5d   :  { %2703 = vmatpush3.bf16.msra.mxu0 %v3136_v36 }
 0xf5e   :  { %2720 = vmatprep.subr.bf16.mxu0 %v2981_v9 }
0x102b   :  { %v766_v60 = vpop.f32.mrb[16].mxu0 }
0x102c   :  { %v772_v62 = vadd.f32 %v766_v60, %v3171_v3  ;;  %v2690_v0 = vpop.f32.mrb[17].mxu0 }
0x102d   :  { %v769_v2 = vpop.f32.mrb[18].mxu0 }
0x102e   :  { %v773_v5 = vmul.f32 %v772_v62, %v3179_v7  ;;  %v2691_v6 = vpop.f32.mrb[19].mxu0 }
0x1030   :  { %2902 = vtanh.f32 %v773_v5 }
0x103a   :  { %v2903_v8 = vpop.eup %2902 }
0x103b   :  { %v775_v35 = vmul.f32 0.5, %v2903_v8 }
0x103d   :  { %v776_v54 = vadd.f32 0.5, %v775_v35  ;;  %v3361_v35 = vld [vmem:[%s3752_s7] ss:$0 sm:$0xff] }
0x103f   :  { %v777_v10 = vsel %vm3173_vm13, %v2903_v8, %v776_v54 }
0x1040   :  { %780 = vrot.lane.b32.xlu1 %v777_v10, %s2985_s4  ;;  %v778_v12 = vmul.f32 %v777_v10, %v710_v52 }
0x10b2   :  { %v781_v36 = vpop.permute.xlu1 %780 }
0x10b3   :  { %v783_v11 = vmul.f32 %v781_v36, %v777_v10 }
0x10b5   :  { %785 = vrot.lane.b32.xlu0 %v783_v11, %s2983_s2 }
0x1127   :  { %v786_v3 = vpop.permute.xlu0 %785 }
0x1128   :  { %v788_v14 = vadd.f32 %v786_v3, %v778_v12 }
0x112a   :  { %2904 = vtanh.f32 %v788_v14 }
0x1134   :  { %v2905_v15 = vpop.eup %2904 }
0x1135   :  { %791 = vrot.lane.b32.xlu1 %v2905_v15, %s2985_s4 }
0x11a7   :  { %v792_v16 = vpop.permute.xlu1 %791 }
0x11a8   :  { %v3280_v17 = vmul.f32 %v792_v16, %v777_v10 }
0x11aa   :  { %v803_v18 = vpack.c.bf16 %v3280_v17, %v3280_v17 }
0x11ac   :  { %805 = vrot.lane.b32.xlu0 %v803_v18, %s2983_s2 }
0x121e   :  { %v806_v19 = vpop.permute.xlu0 %805 }
0x121f   :  { %2697 = vmatmul.mubr.msk.bf16.vlgmr.msra.gmra.mrb[20].mxu1 %vm50_vm0, %v806_v19 }
0x1220   :  { %2709 = vmatpush3.bf16.msra.mxu1 %v2874_v39 }
0x12f2   :  { %v844_v20 = vpop.f32.mrb[20].mxu1 }
0x12f3   :  { %v850_v21 = vadd.f32 %v844_v20, %v3163_v61  ;;  %v2698_v22 = vpop.f32.mrb[21].mxu1 }
0x12f4   :  { %v847_v23 = vpop.f32.mrb[22].mxu1 }
0x12f5   :  { %v851_v24 = vmul.f32 %v850_v21, %v3179_v7  ;;  %v2699_v25 = vpop.f32.mrb[23].mxu1 }
0x12f7   :  { %2906 = vtanh.f32 %v851_v24 }
0x1301   :  { %v2907_v26 = vpop.eup %2906 }
0x1302   :  { %v853_v28 = vmul.f32 0.5, %v2907_v26 }
0x1304   :  { %v854_v29 = vadd.f32 0.5, %v853_v28 }
0x1306   :  { %v855_v57 = vsel %vm3173_vm13, %v2907_v26, %v854_v29 }
0x1307   :  { %858 = vrot.lane.b32.xlu1 %v855_v57, %s2985_s4  ;;  %v856_v61 = vmul.f32 %v855_v57, %v788_v14 }
0x1379   :  { %v859_v30 = vpop.permute.xlu1 %858 }
0x137a   :  { %v861_v31 = vmul.f32 %v859_v30, %v855_v57 }
0x137c   :  { %863 = vrot.lane.b32.xlu0 %v861_v31, %s2983_s2 }
0x1380   :  { %407 = vrot.lane.b32.xlu0 %v3187_v27, %s2983_s2  ;;  %v2875_v27 = vld [vmem:[%s3750_s5 + $0x8] sm:$0xff]  }
0x1381   :  { %2710 = vmatprep.subr.bf16.mxu1 %v2875_v27 }
0x1382   :  { %2711 = vmatpush3.bf16.msra.mxu1 %v2875_v27 }
0x1383   :  { %2736 = vmatprep.subr.bf16.mxu1 %v2981_v9 }
0x1384   :  { %562 = vrot.lane.b32.xlu0 %v3224_v13, %s2983_s2 }
0x13ee   :  { %v864_v32 = vpop.permute.xlu0 %863 }
0x13ef   :  { %v3296_v34 = vadd.f32 %v864_v32, %v856_v61 }
0x13f1   :  { %2908 = vtanh.f32 %v3296_v34 }
0x13f2   :  { %v408_v37 = vpop.permute.xlu0 %407 }
0x13f3   :  { %410 = vst.msk [vmem:[#allocation4] sm:$0xff] %vm50_vm0, %v408_v37 }
0x13f6   :  { %v563_v38 = vpop.permute.xlu0 %562 }
0x13f7   :  { %566 = vst.msk [vmem:[#allocation4 + $0x10] sm:$0xff] %vm50_vm0, %v563_v38 }
0x13fa   :  { %v963_v45 = vld [vmem:[#allocation4] sm:$0xff] }
0x13fb   :  { %v2909_v13 = vpop.eup %2908 }
0x13fc   :  { %869 = vrot.lane.b32.xlu1 %v2909_v13, %s2985_s4 }
0x1400   :  { %484 = vrot.lane.b32.xlu1 %v3205_v49, %s2983_s2 }
0x1404   :  { %640 = vrot.lane.b32.xlu1 %v3243_v33, %s2983_s2  ;;  %v965_v33 = vld [vmem:[#allocation4 + $0x10] sm:$0xff] }
0x146e   :  { %v870_v40 = vpop.permute.xlu1 %869 }
0x146f   :  { %v3313_v41 = vmul.f32 %v870_v40, %v855_v57 }
0x1471   :  { %v881_v42 = vpack.c.bf16 %v3313_v41, %v3313_v41 }
0x1472   :  { %v485_v43 = vpop.permute.xlu1 %484 }
0x1473   :  { %488 = vst.msk [vmem:[#allocation4 + $0x8] sm:$0xff] %vm50_vm0, %v485_v43  ;;  %883 = vrot.lane.b32.xlu0 %v881_v42, %s2983_s2 }
0x1476   :  { %v641_v44 = vpop.permute.xlu1 %640 }
0x1477   :  { %644 = vst.msk [vmem:[#allocation4 + $0x18] sm:$0xff] %vm50_vm0, %v641_v44  ;;  %1155 = vrot.lane.b32.xlu0 %v1090_v63, %s2983_s2 }
0x147a   :  { %v964_v46 = vld [vmem:[#allocation4 + $0x8] sm:$0xff] }
0x147b   :  { %v971_v49 = vpack.c.bf16 %v964_v46, %v963_v45 }
0x147d   :  { %2712 = vmatprep.mubr.msk.bf16.mxu1 %vm50_vm0, %v971_v49 }
0x147e   :  { %v966_v47 = vld [vmem:[#allocation4 + $0x18] sm:$0xff] }
0x147f   :  { %v972_v48 = vpack.c.bf16 %v966_v47, %v965_v33 }
0x1481   :  { %2713 = vmatmul.mubr.msk.bf16.vlgmr.msra.gmra.mrb[24].mxu1 %vm50_vm0, %v972_v48 }
0x1482   :  { %2737 = vmatpush3.bf16.msra.mxu1 %v3324_v50 }
0x1483   :  { %2738 = vmatprep.subr.bf16.mxu1 %v2981_v9 }
0x1486   :  { %2739 = vmatpush3.bf16.msra.mxu1 %v3332_v51 }
0x1487   :  { %2752 = vmatprep.subr.bf16.mxu1 %v2981_v9 }
0x14e5   :  { %v884_v52 = vpop.permute.xlu0 %883 }
0x14e6   :  { %2705 = vmatmul.mubr.msk.bf16.vlgmr.msra.gmra.mrb[20].mxu0 %vm50_vm0, %v884_v52 }
0x14e7   :  { %2721 = vmatpush3.bf16.msra.mxu0 %v3324_v50  ;;  %2724 = vmatprep.mubr.msk.bf16.mxu0 %vm2982_vm9, %v2981_v9 }
0x14e8   :  { %2722 = vmatprep.subr.bf16.mxu0 %v2981_v9 }
0x14e9   :  { %v1156_v22 = vpop.permute.xlu0 %1155 }
0x14eb   :  { %2723 = vmatpush3.bf16.msra.mxu0 %v3332_v51 }
0x14ec   :  { %2728 = vmatprep.subr.bf16.mxu0 %v2981_v9 }
0x14ee   :  { %2725 = vmatmul.mubr.msk.bf16.vlgmr.msra.gmra.mrb[24].mxu0 %vm50_vm0, %v1092_v55 }
0x14ef   :  { %2729 = vmatpush3.bf16.msra.mxu0 %v3324_v50  ;;  %2732 = vmatprep.mubr.msk.bf16.mxu0 %vm2982_vm9, %v2981_v9 }
0x14f0   :  { %2730 = vmatprep.subr.bf16.mxu0 %v2981_v9 }
0x14f3   :  { %2731 = vmatpush3.bf16.msra.mxu0 %v3332_v51 }
0x14f4   :  { %2744 = vmatprep.subr.bf16.mxu0 %v2981_v9 }
0x1554   :  { %v3351_v58 = vpop.f32.mrb[24].mxu1 }
0x1555   :  { %v1044_v59 = vpop.f32.mrb[25].mxu1 }
0x1556   :  { %v3353_v60 = vpop.f32.mrb[26].mxu1  ;;  %v1045_v54 = vadd.f32 %v3361_v35, %v1044_v59 }
0x1557   :  { %v3355_v62 = vpop.f32.mrb[27].mxu1 }
0x1558   :  { %v1048_v45 = vadd.f32 %v3361_v35, %v3355_v62 }
0x15b9   :  { %v922_v0 = vpop.f32.mrb[20].mxu0 }
0x15ba   :  { %v928_v2 = vadd.f32 %v922_v0, %v3169_v1  ;;  %v2706_v5 = vpop.f32.mrb[21].mxu0 }
0x15bb   :  { %v925_v6 = vpop.f32.mrb[22].mxu0 }
0x15bc   :  { %v2707_v8 = vpop.f32.mrb[23].mxu0  ;;  %v929_v21 = vmul.f32 %v928_v2, %v3179_v7 }
0x15c1   :  { %v1142_v10 = vpop.f32.mrb[24].mxu0 }
0x15c2   :  { %v1148_v36 = vadd.f32 %v1142_v10, %v1045_v54  ;;  %v2726_v11 = vpop.f32.mrb[25].mxu0 }
0x15c3   :  { %v1145_v12 = vpop.f32.mrb[26].mxu0 }
0x15c4   :  { %v1149_v3 = vmul.f32 %v1148_v36, %v3179_v7  ;;  %v2727_v14 = vpop.f32.mrb[27].mxu0 }
0x15c6   :  { %2910 = vtanh.f32 %v1149_v3 }
0x15c7   :  { %2912 = vtanh.f32 %v929_v21 }
0x15d0   :  { %v2911_v15 = vpop.eup %2910 }
0x15d1   :  { %v1151_v1 = vmul.f32 0.5, %v2911_v15  ;;  %v2913_v26 = vpop.eup %2912 }
0x15d2   :  { %v931_v28 = vmul.f32 0.5, %v2913_v26 }
0x15d3   :  { %v1152_v16 = vadd.f32 0.5, %v1151_v1 }
0x15d4   :  { %v932_v57 = vadd.f32 0.5, %v931_v28 }
0x15d5   :  { %v1153_v18 = vsel %vm3173_vm13, %v2911_v15, %v1152_v16 }
0x15d6   :  { %1160 = vrot.lane.b32.xlu1 %v1153_v18, %s2985_s4  ;;  %v1158_v23 = vmul.f32 %v1156_v22, %v1153_v18  ;;  %v933_v30 = vsel %vm3173_vm13, %v2913_v26, %v932_v57  ;;  %v1053_v22 = vadd.f32 %v3351_v58, %v3361_v35 }
0x15d7   :  { %v934_v27 = vmul.f32 %v933_v30, %v3296_v34 }
0x1648   :  { %v1161_v19 = vpop.permute.xlu1 %1160 }
0x1649   :  { %v1163_v20 = vmul.f32 %v1161_v19, %v1153_v18 }
0x164b   :  { %1165 = vrot.lane.b32.xlu1 %v1163_v20, %s2983_s2 }
0x16bd   :  { %v1166_v24 = vpop.permute.xlu1 %1165 }
0x16be   :  { %v1168_v25 = vadd.f32 %v1166_v24, %v1158_v23 }
0x16c0   :  { %2914 = vtanh.f32 %v1168_v25 }
0x16ca   :  { %v2915_v29 = vpop.eup %2914 }
0x16cb   :  { %1171 = vrot.lane.b32.xlu0 %v2915_v29, %s2985_s4 }
0x16cf   :  { %936 = vrot.lane.b32.xlu0 %v933_v30, %s2985_s4 }
0x173d   :  { %v1172_v31 = vpop.permute.xlu0 %1171 }
0x173e   :  { %v3374_v61 = vmul.f32 %v1172_v31, %v1153_v18 }
0x1740   :  { %v1181_v32 = vpack.c.bf16 %v3374_v61, %v3374_v61 }
0x1741   :  { %v937_v37 = vpop.permute.xlu0 %936 }
0x1742   :  { %v939_v38 = vmul.f32 %v937_v37, %v933_v30  ;;  %1183 = vrot.lane.b32.xlu1 %v1181_v32, %s2983_s2 }
0x1744   :  { %941 = vrot.lane.b32.xlu0 %v939_v38, %s2983_s2 }
0x17b4   :  { %v1184_v39 = vpop.permute.xlu1 %1183 }
0x17b5   :  { %2733 = vmatmul.mubr.msk.bf16.vlgmr.msra.gmra.mrb[28].mxu0 %vm50_vm0, %v1184_v39 }
0x17b6   :  { %v942_v13 = vpop.permute.xlu0 %941  ;;  %2745 = vmatpush3.bf16.msra.mxu0 %v3324_v50  ;;  %2748 = vmatprep.mubr.msk.bf16.mxu0 %vm2982_vm9, %v2981_v9 }
0x17b7   :  { %v3385_v40 = vadd.f32 %v942_v13, %v934_v27  ;;  %2746 = vmatprep.subr.bf16.mxu0 %v2981_v9 }
0x17b9   :  { %2916 = vtanh.f32 %v3385_v40 }
0x17ba   :  { %2747 = vmatpush3.bf16.msra.mxu0 %v3332_v51 }
0x17bb   :  { %2760 = vmatprep.subr.bf16.mxu0 %v2981_v9 }
0x17c3   :  { %v2917_v42 = vpop.eup %2916 }
0x17c4   :  { %947 = vrot.lane.b32.xlu0 %v2917_v42, %s2985_s4 }
0x17c8   :  { %718 = vrot.lane.b32.xlu0 %v3261_v56, %s2983_s2 }
0x17cc   :  { %874 = vrot.lane.b32.xlu0 %v3313_v41, %s2983_s2 }
0x1836   :  { %v948_v34 = vpop.permute.xlu0 %947 }
0x1837   :  { %v950_v6 = vmul.f32 %v948_v34, %v933_v30 }
0x183a   :  { %v719_v43 = vpop.permute.xlu0 %718 }
0x183b   :  { %722 = vst.msk [vmem:[#allocation4 + $0x20] sm:$0xff] %vm50_vm0, %v719_v43 }
0x183e   :  { %v875_v44 = vpop.permute.xlu0 %874 }
0x183f   :  { %878 = vst.msk [vmem:[#allocation4 + $0x30] sm:$0xff] %vm50_vm0, %v875_v44 }
0x1846   :  { %v969_v14 = vld [vmem:[#allocation4 + $0x30] sm:$0xff] }
0x1888   :  { %v1222_v46 = vpop.f32.mrb[28].mxu0 }
0x1889   :  { %v1228_v49 = vadd.f32 %v1222_v46, %v1048_v45  ;;  %v2734_v33 = vpop.f32.mrb[29].mxu0  ;;  %v1056_v45 = vadd.f32 %v3353_v60, %v3361_v35 }
0x188a   :  { %v1225_v47 = vpop.f32.mrb[30].mxu0 }
0x188b   :  { %v1229_v48 = vmul.f32 %v1228_v49, %v3179_v7  ;;  %v2735_v56 = vpop.f32.mrb[31].mxu0 }
0x188d   :  { %2918 = vtanh.f32 %v1229_v48 }
0x1897   :  { %v2919_v63 = vpop.eup %2918 }
0x1898   :  { %v1231_v41 = vmul.f32 0.5, %v2919_v63 }
0x189a   :  { %v1232_v52 = vadd.f32 0.5, %v1231_v41 }
0x189c   :  { %v1233_v53 = vsel %vm3173_vm13, %v2919_v63, %v1232_v52 }
0x189d   :  { %1236 = vrot.lane.b32.xlu1 %v1233_v53, %s2985_s4  ;;  %v1234_v62 = vmul.f32 %v1233_v53, %v1168_v25 }
0x190f   :  { %v1237_v55 = vpop.permute.xlu1 %1236 }
0x1910   :  { %v1239_v59 = vmul.f32 %v1237_v55, %v1233_v53 }
0x1912   :  { %1241 = vrot.lane.b32.xlu1 %v1239_v59, %s2983_s2 }
0x1984   :  { %v1242_v0 = vpop.permute.xlu1 %1241 }
0x1985   :  { %v1244_v2 = vadd.f32 %v1242_v0, %v1234_v62 }
0x1987   :  { %2920 = vtanh.f32 %v1244_v2 }
0x1991   :  { %v2921_v5 = vpop.eup %2920 }
0x1992   :  { %1247 = vrot.lane.b32.xlu1 %v2921_v5, %s2985_s4 }
0x1996   :  { %796 = vrot.lane.b32.xlu1 %v3280_v17, %s2983_s2  ;;  %v967_v17 = vld [vmem:[#allocation4 + $0x20] sm:$0xff] }
0x199a   :  { %952 = vrot.lane.b32.xlu1 %v950_v6, %s2983_s2 }
0x1a04   :  { %v1248_v8 = vpop.permute.xlu1 %1247 }
0x1a05   :  { %v3409_v54 = vmul.f32 %v1248_v8, %v1233_v53 }
0x1a07   :  { %v1257_v10 = vpack.c.bf16 %v3409_v54, %v3409_v54 }
0x1a08   :  { %v797_v36 = vpop.permute.xlu1 %796 }
0x1a09   :  { %800 = vst.msk [vmem:[#allocation4 + $0x28] sm:$0xff] %vm50_vm0, %v797_v36  ;;  %1259 = vrot.lane.b32.xlu0 %v1257_v10, %s2983_s2 }
0x1a0c   :  { %v953_v11 = vpop.permute.xlu1 %952 }
0x1a0d   :  { %956 = vst.msk [vmem:[#allocation4 + $0x38] sm:$0xff] %vm50_vm0, %v953_v11  ;;  %957 = vst.msk [vmem:[#allocation2] sm:$0xff] %vm50_vm0, %v953_v11 }
0x1a10   :  { %v968_v12 = vld [vmem:[#allocation4 + $0x28] sm:$0xff] }
0x1a11   :  { %v973_v3 = vpack.c.bf16 %v968_v12, %v967_v17 }
0x1a13   :  { %2716 = vmatprep.mubr.msk.bf16.mxu1 %vm50_vm0, %v973_v3 }
0x1a14   :  { %v970_v15 = vld [vmem:[#allocation4 + $0x38] sm:$0xff] }
0x1a15   :  { %v974_v1 = vpack.c.bf16 %v970_v15, %v969_v14 }
0x1a17   :  { %2717 = vmatmul.mubr.msk.bf16.gmra.mrb[28].mxu1 %vm50_vm0, %v974_v1 }
0x1a18   :  { %2740 = vmatprep.mubr.msk.bf16.mxu1 %vm2982_vm9, %v2981_v9 }
0x1a7b   :  { %v1260_v16 = vpop.permute.xlu0 %1259 }
0x1a7c   :  { %2741 = vmatmul.mubr.msk.bf16.vlgmr.msra.gmra.mrb[32].mxu1 %vm50_vm0, %v1260_v16 }
0x1a7d   :  { %2753 = vmatpush3.bf16.msra.mxu1 %v3324_v50  ;;  %2756 = vmatprep.mubr.msk.bf16.mxu1 %vm2982_vm9, %v2981_v9 }
0x1a7e   :  { %2754 = vmatprep.subr.bf16.mxu1 %v2981_v9 }
0x1a81   :  { %2755 = vmatpush3.bf16.msra.mxu1 %v3332_v51 }
0x1a82   :  { %2768 = vmatprep.subr.bf16.mxu1 %v2981_v9 }
0x1aea   :  { %v3428_v18 = vpop.f32.mrb[28].mxu1 }
0x1aeb   :  { %v3430_v19 = vpop.f32.mrb[29].mxu1 }
0x1aec   :  { %v3432_v20 = vpop.f32.mrb[30].mxu1  ;;  %v1061_v36 = vadd.f32 %v3361_v35, %v3430_v19 }
0x1aed   :  { %v3434_v21 = vpop.f32.mrb[31].mxu1 }
0x1b4f   :  { %v1298_v23 = vpop.f32.mrb[32].mxu1 }
0x1b50   :  { %v1304_v24 = vadd.f32 %v1298_v23, %v1053_v22  ;;  %v2742_v25 = vpop.f32.mrb[33].mxu1 }
0x1b51   :  { %v1301_v26 = vpop.f32.mrb[34].mxu1 }
0x1b52   :  { %v1305_v28 = vmul.f32 %v1304_v24, %v3179_v7  ;;  %v2743_v29 = vpop.f32.mrb[35].mxu1 }
0x1b54   :  { %2922 = vtanh.f32 %v1305_v28 }
0x1b5e   :  { %v2923_v57 = vpop.eup %2922 }
0x1b5f   :  { %v1307_v30 = vmul.f32 0.5, %v2923_v57 }
0x1b61   :  { %v1308_v31 = vadd.f32 0.5, %v1307_v30 }
0x1b63   :  { %v1309_v32 = vsel %vm3173_vm13, %v2923_v57, %v1308_v31 }
0x1b64   :  { %1312 = vrot.lane.b32.xlu1 %v1309_v32, %s2985_s4  ;;  %v1310_v58 = vmul.f32 %v1309_v32, %v1244_v2 }
0x1bd6   :  { %v1313_v37 = vpop.permute.xlu1 %1312 }
0x1bd7   :  { %v1315_v38 = vmul.f32 %v1313_v37, %v1309_v32  ;;  %v1064_v37 = vadd.f32 %v3361_v35, %v3434_v21 }
0x1bd9   :  { %1317 = vrot.lane.b32.xlu0 %v1315_v38, %s2983_s2 }
0x1c4b   :  { %v1318_v39 = vpop.permute.xlu0 %1317 }
0x1c4c   :  { %v1320_v27 = vadd.f32 %v1318_v39, %v1310_v58 }
0x1c4e   :  { %2924 = vtanh.f32 %v1320_v27 }
0x1c58   :  { %v2925_v13 = vpop.eup %2924 }
0x1c59   :  { %1323 = vrot.lane.b32.xlu1 %v2925_v13, %s2985_s4 }
0x1ccb   :  { %v1324_v42 = vpop.permute.xlu1 %1323 }
0x1ccc   :  { %v3444_v34 = vmul.f32 %v1324_v42, %v1309_v32 }
0x1cce   :  { %v1333_v43 = vpack.c.bf16 %v3444_v34, %v3444_v34 }
0x1cd0   :  { %1335 = vrot.lane.b32.xlu0 %v1333_v43, %s2983_s2 }
0x1d42   :  { %v1336_v44 = vpop.permute.xlu0 %1335 }
0x1d43   :  { %2749 = vmatmul.mubr.msk.bf16.vlgmr.msra.gmra.mrb[32].mxu0 %vm50_vm0, %v1336_v44 }
0x1d44   :  { %2761 = vmatpush3.bf16.msra.mxu0 %v3324_v50  ;;  %2764 = vmatprep.mubr.msk.bf16.mxu0 %vm2982_vm9, %v2981_v9 }
0x1d45   :  { %2762 = vmatprep.subr.bf16.mxu0 %v2981_v9 }
0x1d48   :  { %2763 = vmatpush3.bf16.msra.mxu0 %v3332_v51 }
0x1d49   :  { %2776 = vmatprep.subr.bf16.mxu0 %v2981_v9 }
0x1e16   :  { %v1374_v46 = vpop.f32.mrb[32].mxu0 }
0x1e17   :  { %v1380_v49 = vadd.f32 %v1374_v46, %v1056_v45  ;;  %v2750_v33 = vpop.f32.mrb[33].mxu0 }
0x1e18   :  { %v1377_v47 = vpop.f32.mrb[34].mxu0 }
0x1e19   :  { %v1381_v48 = vmul.f32 %v1380_v49, %v3179_v7  ;;  %v2751_v56 = vpop.f32.mrb[35].mxu0 }
0x1e1b   :  { %2926 = vtanh.f32 %v1381_v48 }
0x1e25   :  { %v2927_v63 = vpop.eup %2926 }
0x1e26   :  { %v1383_v41 = vmul.f32 0.5, %v2927_v63 }
0x1e28   :  { %v1384_v52 = vadd.f32 0.5, %v1383_v41 }
0x1e2a   :  { %v1385_v53 = vsel %vm3173_vm13, %v2927_v63, %v1384_v52  ;;  %v1069_v52 = vadd.f32 %v3428_v18, %v3361_v35 }
0x1e2b   :  { %1388 = vrot.lane.b32.xlu1 %v1385_v53, %s2985_s4  ;;  %v1386_v60 = vmul.f32 %v1385_v53, %v1320_v27 }
0x1e9d   :  { %v1389_v55 = vpop.permute.xlu1 %1388 }
0x1e9e   :  { %v1391_v59 = vmul.f32 %v1389_v55, %v1385_v53 }
0x1ea0   :  { %1393 = vrot.lane.b32.xlu0 %v1391_v59, %s2983_s2 }
0x1f12   :  { %v1394_v62 = vpop.permute.xlu0 %1393 }
0x1f13   :  { %v1396_v0 = vadd.f32 %v1394_v62, %v1386_v60 }
0x1f15   :  { %2928 = vtanh.f32 %v1396_v0 }
0x1f1f   :  { %v2929_v2 = vpop.eup %2928 }
0x1f20   :  { %1399 = vrot.lane.b32.xlu1 %v2929_v2, %s2985_s4 }
0x1f92   :  { %v1400_v5 = vpop.permute.xlu1 %1399 }
0x1f93   :  { %v3464_v6 = vmul.f32 %v1400_v5, %v1385_v53 }
0x1f95   :  { %v1409_v8 = vpack.c.bf16 %v3464_v6, %v3464_v6 }
0x1f97   :  { %1411 = vrot.lane.b32.xlu0 %v1409_v8, %s2983_s2 }
0x2009   :  { %v1412_v10 = vpop.permute.xlu0 %1411 }
0x200a   :  { %2757 = vmatmul.mubr.msk.bf16.vlgmr.msra.gmra.mrb[36].mxu1 %vm50_vm0, %v1412_v10 }
0x200b   :  { %2769 = vmatpush3.bf16.msra.mxu1 %v3324_v50  ;;  %2772 = vmatprep.mubr.msk.bf16.mxu1 %vm2982_vm9, %v2981_v9 }
0x200c   :  { %2770 = vmatprep.subr.bf16.mxu1 %v2981_v9 }
0x200f   :  { %2771 = vmatpush3.bf16.msra.mxu1 %v3332_v51 }
0x20dd   :  { %v1450_v11 = vpop.f32.mrb[36].mxu1 }
0x20de   :  { %v1456_v17 = vadd.f32 %v1450_v11, %v1061_v36  ;;  %v2758_v12 = vpop.f32.mrb[37].mxu1 }
0x20df   :  { %v1453_v3 = vpop.f32.mrb[38].mxu1 }
0x20e0   :  { %v1457_v14 = vmul.f32 %v1456_v17, %v3179_v7  ;;  %v2759_v15 = vpop.f32.mrb[39].mxu1 }
0x20e1   :  { %v2878_v15 = vld [vmem:[%s3753_s8] sm:$0xff]  }
0x20e2   :  { %2930 = vtanh.f32 %v1457_v14  ;;  %2784 = vmatprep.subr.bf16.mxu1 %v2878_v15 }
0x20ec   :  { %v2931_v1 = vpop.eup %2930 }
0x20ed   :  { %v1459_v16 = vmul.f32 0.5, %v2931_v1 }
0x20ef   :  { %v1460_v22 = vadd.f32 0.5, %v1459_v16 }
0x20f1   :  { %v1461_v23 = vsel %vm3173_vm13, %v2931_v1, %v1460_v22 }
0x20f2   :  { %1464 = vrot.lane.b32.xlu1 %v1461_v23, %s2985_s4  ;;  %v1462_v19 = vmul.f32 %v1461_v23, %v1396_v0 }
0x2164   :  { %v1465_v24 = vpop.permute.xlu1 %1464 }
0x2165   :  { %v1467_v25 = vmul.f32 %v1465_v24, %v1461_v23 }
0x2167   :  { %1469 = vrot.lane.b32.xlu0 %v1467_v25, %s2983_s2 }
0x21d9   :  { %v1470_v26 = vpop.permute.xlu0 %1469 }
0x21da   :  { %v1472_v28 = vadd.f32 %v1470_v26, %v1462_v19 }
0x21dc   :  { %2932 = vtanh.f32 %v1472_v28 }
0x21e6   :  { %v2933_v29 = vpop.eup %2932 }
0x21e7   :  { %1475 = vrot.lane.b32.xlu1 %v2933_v29, %s2985_s4  ;;  %v3548_v29 = vld [vmem:[%s3754_s9] sm:$0xff]  }
0x2259   :  { %v1476_v57 = vpop.permute.xlu1 %1475 }
0x225a   :  { %v3483_v30 = vmul.f32 %v1476_v57, %v1461_v23  ;;  %v3556_v57 = vld [vmem:[%s3754_s9 + $0x8] sm:$0xff]  }
0x225c   :  { %v1485_v31 = vpack.c.bf16 %v3483_v30, %v3483_v30 }
0x225e   :  { %1487 = vrot.lane.b32.xlu0 %v1485_v31, %s2983_s2  ;;  %v1845_v31 = vld [vmem:[#allocation3 + $0x10] sm:$0xff] }
0x22d0   :  { %v1488_v32 = vpop.permute.xlu0 %1487 }
0x22d1   :  { %2765 = vmatmul.mubr.msk.bf16.vlgmr.msra.gmra.mrb[36].mxu0 %vm50_vm0, %v1488_v32 }
0x22d2   :  { %2777 = vmatpush3.bf16.msra.mxu0 %v3324_v50  ;;  %2780 = vmatprep.mubr.msk.bf16.mxu0 %vm2982_vm9, %v2981_v9 }
0x22d3   :  { %2778 = vmatprep.subr.bf16.mxu0 %v2981_v9 }
0x22d6   :  { %2779 = vmatpush3.bf16.msra.mxu0 %v3332_v51 }
0x22d7   :  { %2796 = vmatprep.subr.bf16.mxu0 %v2981_v9 }
0x23a4   :  { %v1526_v38 = vpop.f32.mrb[36].mxu0 }
0x23a5   :  { %v1532_v58 = vadd.f32 %v1526_v38, %v1064_v37  ;;  %v2766_v39 = vpop.f32.mrb[37].mxu0  ;;  %v1843_v37 = vld [vmem:[#allocation2 + $0x10] sm:$0xff] }
0x23a6   :  { %v1529_v27 = vpop.f32.mrb[38].mxu0  ;;  %v1847_v38 = vpack.c.bf16 %v1843_v37, %v1843_v37 }
0x23a7   :  { %v1533_v13 = vmul.f32 %v1532_v58, %v3179_v7  ;;  %v2767_v42 = vpop.f32.mrb[39].mxu0 }
0x23a8   :  { %v1072_v42 = vadd.f32 %v3432_v20, %v3361_v35 }
0x23a9   :  { %2934 = vtanh.f32 %v1533_v13 }
0x23b3   :  { %v2935_v50 = vpop.eup %2934 }
0x23b4   :  { %v1535_v43 = vmul.f32 0.5, %v2935_v50 }
0x23b6   :  { %v1536_v44 = vadd.f32 0.5, %v1535_v43 }
0x23b8   :  { %v1537_v45 = vsel %vm3173_vm13, %v2935_v50, %v1536_v44 }
0x23b9   :  { %1540 = vrot.lane.b32.xlu1 %v1537_v45, %s2985_s4  ;;  %v1538_v21 = vmul.f32 %v1537_v45, %v1472_v28 }
0x242b   :  { %v1541_v51 = vpop.permute.xlu1 %1540 }
0x242c   :  { %v1543_v46 = vmul.f32 %v1541_v51, %v1537_v45 }
0x242e   :  { %1545 = vrot.lane.b32.xlu0 %v1543_v46, %s2983_s2  ;;  %v3586_v46 = vld [vmem:[%s3755_s10] ss:$0 sm:$0xff] }
0x24a0   :  { %v1546_v49 = vpop.permute.xlu0 %1545 }
0x24a1   :  { %v1548_v33 = vadd.f32 %v1546_v49, %v1538_v21 }
0x24a3   :  { %2936 = vtanh.f32 %v1548_v33 }
0x24ad   :  { %v2937_v47 = vpop.eup %2936 }
0x24ae   :  { %1551 = vrot.lane.b32.xlu1 %v2937_v47, %s2985_s4 }
0x2520   :  { %v1552_v48 = vpop.permute.xlu1 %1551 }
0x2521   :  { %v3503_v56 = vmul.f32 %v1552_v48, %v1537_v45 }
0x2523   :  { %v1561_v63 = vpack.c.bf16 %v3503_v56, %v3503_v56 }
0x2525   :  { %1563 = vrot.lane.b32.xlu0 %v1561_v63, %s2983_s2 }
0x2597   :  { %v1564_v41 = vpop.permute.xlu0 %1563 }
0x2598   :  { %2773 = vmatmul.mubr.msk.bf16.vlgmr.msra.gmra.mrb[40].mxu1 %vm50_vm0, %v1564_v41 }
0x2599   :  { %2785 = vmatpush3.bf16.msra.mxu1 %v2878_v15 }
0x266b   :  { %v1602_v53 = vpop.f32.mrb[40].mxu1 }
0x266c   :  { %v1608_v55 = vadd.f32 %v1602_v53, %v1069_v52  ;;  %v2774_v59 = vpop.f32.mrb[41].mxu1 }
0x266d   :  { %v1605_v60 = vpop.f32.mrb[42].mxu1 }
0x266e   :  { %v1609_v62 = vmul.f32 %v1608_v55, %v3179_v7  ;;  %v2775_v0 = vpop.f32.mrb[43].mxu1 }
0x2670   :  { %2938 = vtanh.f32 %v1609_v62 }
0x267a   :  { %v2939_v2 = vpop.eup %2938 }
0x267b   :  { %v1611_v5 = vmul.f32 0.5, %v2939_v2 }
0x267d   :  { %v1612_v8 = vadd.f32 0.5, %v1611_v5 }
0x267f   :  { %v1613_v10 = vsel %vm3173_vm13, %v2939_v2, %v1612_v8 }
0x2680   :  { %1616 = vrot.lane.b32.xlu1 %v1613_v10, %s2985_s4  ;;  %v1614_v18 = vmul.f32 %v1613_v10, %v1548_v33 }
0x26f2   :  { %v1617_v36 = vpop.permute.xlu1 %1616 }
0x26f3   :  { %v1619_v11 = vmul.f32 %v1617_v36, %v1613_v10 }
0x26f5   :  { %1621 = vrot.lane.b32.xlu0 %v1619_v11, %s2983_s2 }
0x26f9   :  { %1176 = vrot.lane.b32.xlu0 %v3374_v61, %s2983_s2  ;;  %v2879_v61 = vld [vmem:[%s3753_s8 + $0x8] sm:$0xff]  }
0x26fa   :  { %2786 = vmatprep.subr.bf16.mxu1 %v2879_v61 }
0x26fb   :  { %2787 = vmatpush3.bf16.msra.mxu1 %v2879_v61 }
0x26fc   :  { %2812 = vmatprep.subr.bf16.mxu1 %v2981_v9 }
0x26fd   :  { %1328 = vrot.lane.b32.xlu0 %v3444_v34, %s2983_s2 }
0x2767   :  { %v1622_v17 = vpop.permute.xlu0 %1621 }
0x2768   :  { %v3520_v12 = vadd.f32 %v1622_v17, %v1614_v18 }
0x276a   :  { %2940 = vtanh.f32 %v3520_v12 }
0x276b   :  { %v1177_v3 = vpop.permute.xlu0 %1176 }
0x276c   :  { %1179 = vst.msk [vmem:[#allocation4] sm:$0xff] %vm50_vm0, %v1177_v3 }
0x276f   :  { %v1329_v14 = vpop.permute.xlu0 %1328 }
0x2770   :  { %1331 = vst.msk [vmem:[#allocation4 + $0x10] sm:$0xff] %vm50_vm0, %v1329_v14 }
0x2773   :  { %v1718_v25 = vld [vmem:[#allocation4] sm:$0xff] }
0x2774   :  { %v2941_v34 = vpop.eup %2940 }
0x2775   :  { %1627 = vrot.lane.b32.xlu1 %v2941_v34, %s2985_s4 }
0x2779   :  { %1252 = vrot.lane.b32.xlu1 %v3409_v54, %s2983_s2 }
0x277d   :  { %1404 = vrot.lane.b32.xlu1 %v3464_v6, %s2983_s2  ;;  %v1720_v6 = vld [vmem:[#allocation4 + $0x10] sm:$0xff] }
0x27e7   :  { %v1628_v1 = vpop.permute.xlu1 %1627 }
0x27e8   :  { %v3537_v16 = vmul.f32 %v1628_v1, %v1613_v10 }
0x27ea   :  { %v1637_v22 = vpack.c.bf16 %v3537_v16, %v3537_v16 }
0x27eb   :  { %v1253_v23 = vpop.permute.xlu1 %1252 }
0x27ec   :  { %1255 = vst.msk [vmem:[#allocation4 + $0x8] sm:$0xff] %vm50_vm0, %v1253_v23  ;;  %1639 = vrot.lane.b32.xlu0 %v1637_v22, %s2983_s2 }
0x27ef   :  { %v1405_v24 = vpop.permute.xlu1 %1404 }
0x27f0   :  { %1407 = vst.msk [vmem:[#allocation4 + $0x18] sm:$0xff] %vm50_vm0, %v1405_v24  ;;  %1910 = vrot.lane.b32.xlu0 %v1845_v31, %s2983_s2 }
0x27f3   :  { %v1719_v19 = vld [vmem:[#allocation4 + $0x8] sm:$0xff] }
0x27f4   :  { %v1726_v54 = vpack.c.bf16 %v1719_v19, %v1718_v25 }
0x27f6   :  { %2788 = vmatprep.mubr.msk.bf16.mxu1 %vm50_vm0, %v1726_v54 }
0x27f7   :  { %v1721_v26 = vld [vmem:[#allocation4 + $0x18] sm:$0xff] }
0x27f8   :  { %v1727_v28 = vpack.c.bf16 %v1721_v26, %v1720_v6 }
0x27fa   :  { %2789 = vmatmul.mubr.msk.bf16.vlgmr.msra.gmra.mrb[44].mxu1 %vm50_vm0, %v1727_v28 }
0x27fb   :  { %2813 = vmatpush3.bf16.msra.mxu1 %v3548_v29 }
0x27fc   :  { %2814 = vmatprep.subr.bf16.mxu1 %v2981_v9 }
0x27ff   :  { %2815 = vmatpush3.bf16.msra.mxu1 %v3556_v57 }
0x2800   :  { %2828 = vmatprep.subr.bf16.mxu1 %v2981_v9 }
0x285e   :  { %v1640_v32 = vpop.permute.xlu0 %1639 }
0x285f   :  { %2781 = vmatmul.mubr.msk.bf16.vlgmr.msra.gmra.mrb[40].mxu0 %vm50_vm0, %v1640_v32 }
0x2860   :  { %2797 = vmatpush3.bf16.msra.mxu0 %v3548_v29  ;;  %2800 = vmatprep.mubr.msk.bf16.mxu0 %vm2982_vm9, %v2981_v9 }
0x2861   :  { %2798 = vmatprep.subr.bf16.mxu0 %v2981_v9 }
0x2862   :  { %v1911_v62 = vpop.permute.xlu0 %1910 }
0x2864   :  { %2799 = vmatpush3.bf16.msra.mxu0 %v3556_v57 }
0x2865   :  { %2804 = vmatprep.subr.bf16.mxu0 %v2981_v9 }
0x2867   :  { %2801 = vmatmul.mubr.msk.bf16.vlgmr.msra.gmra.mrb[44].mxu0 %vm50_vm0, %v1847_v38 }
0x2868   :  { %2805 = vmatpush3.bf16.msra.mxu0 %v3548_v29  ;;  %2808 = vmatprep.mubr.msk.bf16.mxu0 %vm2982_vm9, %v2981_v9 }
0x2869   :  { %2806 = vmatprep.subr.bf16.mxu0 %v2981_v9 }
0x286c   :  { %2807 = vmatpush3.bf16.msra.mxu0 %v3556_v57 }
0x286d   :  { %2820 = vmatprep.subr.bf16.mxu0 %v2981_v9 }
0x28cd   :  { %v3575_v58 = vpop.f32.mrb[44].mxu1 }
0x28ce   :  { %v1799_v39 = vpop.f32.mrb[45].mxu1 }
0x28cf   :  { %v3577_v27 = vpop.f32.mrb[46].mxu1  ;;  %v1800_v21 = vadd.f32 %v3586_v46, %v1799_v39 }
0x28d0   :  { %v3579_v13 = vpop.f32.mrb[47].mxu1 }
0x28d1   :  { %v1803_v54 = vadd.f32 %v3586_v46, %v3579_v13 }
0x2932   :  { %v1678_v50 = vpop.f32.mrb[40].mxu0 }
0x2933   :  { %v1684_v43 = vadd.f32 %v1678_v50, %v1072_v42  ;;  %v2782_v44 = vpop.f32.mrb[41].mxu0 }
0x2934   :  { %v1681_v45 = vpop.f32.mrb[42].mxu0 }
0x2935   :  { %v2783_v51 = vpop.f32.mrb[43].mxu0  ;;  %v1685_v60 = vmul.f32 %v1684_v43, %v3179_v7 }
0x293a   :  { %v1897_v49 = vpop.f32.mrb[44].mxu0 }
0x293b   :  { %v1903_v33 = vadd.f32 %v1897_v49, %v1800_v21  ;;  %v2802_v47 = vpop.f32.mrb[45].mxu0 }
0x293c   :  { %v1900_v48 = vpop.f32.mrb[46].mxu0 }
0x293d   :  { %v1904_v63 = vmul.f32 %v1903_v33, %v3179_v7  ;;  %v2803_v41 = vpop.f32.mrb[47].mxu0 }
0x293f   :  { %2942 = vtanh.f32 %v1904_v63 }
0x2940   :  { %2944 = vtanh.f32 %v1685_v60 }
0x2949   :  { %v2943_v35 = vpop.eup %2942 }
0x294a   :  { %v1906_v20 = vmul.f32 0.5, %v2943_v35  ;;  %v2945_v8 = vpop.eup %2944 }
0x294b   :  { %v1687_v10 = vmul.f32 0.5, %v2945_v8 }
0x294c   :  { %v1907_v52 = vadd.f32 0.5, %v1906_v20 }
0x294d   :  { %v1688_v11 = vadd.f32 0.5, %v1687_v10 }
0x294e   :  { %v1908_v53 = vsel %vm3173_vm13, %v2943_v35, %v1907_v52 }
0x294f   :  { %1915 = vrot.lane.b32.xlu1 %v1908_v53, %s2985_s4  ;;  %v1913_v0 = vmul.f32 %v1911_v62, %v1908_v53  ;;  %v1689_v18 = vsel %vm3173_vm13, %v2945_v8, %v1688_v11 }
0x2950   :  { %v1690_v1 = vmul.f32 %v1689_v18, %v3520_v12 }
0x29c1   :  { %v1916_v55 = vpop.permute.xlu1 %1915 }
0x29c2   :  { %v1918_v59 = vmul.f32 %v1916_v55, %v1908_v53 }
0x29c4   :  { %1920 = vrot.lane.b32.xlu1 %v1918_v59, %s2983_s2 }
0x2a36   :  { %v1921_v2 = vpop.permute.xlu1 %1920 }
0x2a37   :  { %v1923_v5 = vadd.f32 %v1921_v2, %v1913_v0  ;;  %v1808_v0 = vadd.f32 %v3575_v58, %v3586_v46 }
0x2a39   :  { %2946 = vtanh.f32 %v1923_v5 }
0x2a43   :  { %v2947_v36 = vpop.eup %2946 }
0x2a44   :  { %1926 = vrot.lane.b32.xlu0 %v2947_v36, %s2985_s4 }
0x2a48   :  { %1692 = vrot.lane.b32.xlu0 %v1689_v18, %s2985_s4 }
0x2ab6   :  { %v1927_v17 = vpop.permute.xlu0 %1926 }
0x2ab7   :  { %v1929_v3 = vmul.f32 %v1927_v17, %v1908_v53 }
0x2ab9   :  { %v1931_v14 = vpack.c.bf16 %v1929_v3, %v1929_v3 }
0x2aba   :  { %v1693_v15 = vpop.permute.xlu0 %1692 }
0x2abb   :  { %v1695_v61 = vmul.f32 %v1693_v15, %v1689_v18  ;;  %1933 = vrot.lane.b32.xlu1 %v1931_v14, %s2983_s2 }
0x2abd   :  { %1697 = vrot.lane.b32.xlu0 %v1695_v61, %s2983_s2 }
0x2b2d   :  { %v1934_v34 = vpop.permute.xlu1 %1933 }
0x2b2e   :  { %2809 = vmatmul.mubr.msk.bf16.vlgmr.msra.gmra.mrb[48].mxu0 %vm50_vm0, %v1934_v34 }
0x2b2f   :  { %v1698_v22 = vpop.permute.xlu0 %1697  ;;  %2821 = vmatpush3.bf16.msra.mxu0 %v3548_v29  ;;  %2824 = vmatprep.mubr.msk.bf16.mxu0 %vm2982_vm9, %v2981_v9 }
0x2b30   :  { %v3606_v23 = vadd.f32 %v1698_v22, %v1690_v1  ;;  %2822 = vmatprep.subr.bf16.mxu0 %v2981_v9 }
0x2b32   :  { %2948 = vtanh.f32 %v3606_v23 }
0x2b33   :  { %2823 = vmatpush3.bf16.msra.mxu0 %v3556_v57 }
0x2b34   :  { %2836 = vmatprep.subr.bf16.mxu0 %v2981_v9 }
0x2b3c   :  { %v2949_v24 = vpop.eup %2948 }
0x2b3d   :  { %1703 = vrot.lane.b32.xlu0 %v2949_v24, %s2985_s4 }
0x2b41   :  { %1480 = vrot.lane.b32.xlu0 %v3483_v30, %s2983_s2 }
0x2b45   :  { %1632 = vrot.lane.b32.xlu0 %v3537_v16, %s2983_s2 }
0x2baf   :  { %v1704_v12 = vpop.permute.xlu0 %1703 }
0x2bb0   :  { %v1706_v51 = vmul.f32 %v1704_v12, %v1689_v18 }
0x2bb3   :  { %v1481_v25 = vpop.permute.xlu0 %1480 }
0x2bb4   :  { %1483 = vst.msk [vmem:[#allocation4 + $0x20] sm:$0xff] %vm50_vm0, %v1481_v25 }
0x2bb7   :  { %v1633_v19 = vpop.permute.xlu0 %1632 }
0x2bb8   :  { %1635 = vst.msk [vmem:[#allocation4 + $0x30] sm:$0xff] %vm50_vm0, %v1633_v19 }
0x2bbb   :  { %v1722_v63 = vld [vmem:[#allocation4 + $0x20] sm:$0xff] }
0x2c01   :  { %v1972_v6 = vpop.f32.mrb[48].mxu0 }
0x2c02   :  { %v1978_v26 = vadd.f32 %v1972_v6, %v1803_v54  ;;  %v2810_v28 = vpop.f32.mrb[49].mxu0  ;;  %v1811_v54 = vadd.f32 %v3577_v27, %v3586_v46 }
0x2c03   :  { %v1975_v31 = vpop.f32.mrb[50].mxu0 }
0x2c04   :  { %v1979_v32 = vmul.f32 %v1978_v26, %v3179_v7  ;;  %v2811_v30 = vpop.f32.mrb[51].mxu0 }
0x2c06   :  { %2950 = vtanh.f32 %v1979_v32 }
0x2c10   :  { %v2951_v37 = vpop.eup %2950 }
0x2c11   :  { %v1981_v16 = vmul.f32 0.5, %v2951_v37 }
0x2c13   :  { %v1982_v38 = vadd.f32 0.5, %v1981_v16 }
0x2c15   :  { %v1983_v39 = vsel %vm3173_vm13, %v2951_v37, %v1982_v38 }
0x2c16   :  { %1986 = vrot.lane.b32.xlu1 %v1983_v39, %s2985_s4  ;;  %v1984_v13 = vmul.f32 %v1983_v39, %v1923_v5 }
0x2c88   :  { %v1987_v42 = vpop.permute.xlu1 %1986 }
0x2c89   :  { %v1989_v50 = vmul.f32 %v1987_v42, %v1983_v39 }
0x2c8b   :  { %1991 = vrot.lane.b32.xlu1 %v1989_v50, %s2983_s2 }
0x2cfd   :  { %v1992_v43 = vpop.permute.xlu1 %1991 }
0x2cfe   :  { %v1994_v44 = vadd.f32 %v1992_v43, %v1984_v13 }
0x2d00   :  { %2952 = vtanh.f32 %v1994_v44 }
0x2d0a   :  { %v2953_v45 = vpop.eup %2952 }
0x2d0b   :  { %1997 = vrot.lane.b32.xlu1 %v2953_v45, %s2985_s4 }
0x2d0f   :  { %1556 = vrot.lane.b32.xlu1 %v3503_v56, %s2983_s2  ;;  %v1724_v56 = vld [vmem:[#allocation4 + $0x30] sm:$0xff] }
0x2d13   :  { %1708 = vrot.lane.b32.xlu1 %v1706_v51, %s2983_s2 }
0x2d7d   :  { %v1998_v21 = vpop.permute.xlu1 %1997 }
0x2d7e   :  { %v2000_v49 = vmul.f32 %v1998_v21, %v1983_v39 }
0x2d80   :  { %v2002_v33 = vpack.c.bf16 %v2000_v49, %v2000_v49 }
0x2d81   :  { %v1557_v47 = vpop.permute.xlu1 %1556 }
0x2d82   :  { %1559 = vst.msk [vmem:[#allocation4 + $0x28] sm:$0xff] %vm50_vm0, %v1557_v47  ;;  %2004 = vrot.lane.b32.xlu0 %v2002_v33, %s2983_s2 }
0x2d85   :  { %v1709_v48 = vpop.permute.xlu1 %1708 }
0x2d86   :  { %1711 = vst.msk [vmem:[#allocation4 + $0x38] sm:$0xff] %vm50_vm0, %v1709_v48  ;;  %1712 = vst.msk [vmem:[#allocation2 + $0x8] sm:$0xff] %vm50_vm0, %v1709_v48 }
0x2d89   :  { %v1723_v41 = vld [vmem:[#allocation4 + $0x28] sm:$0xff] }
0x2d8a   :  { %v1728_v35 = vpack.c.bf16 %v1723_v41, %v1722_v63 }
0x2d8c   :  { %2792 = vmatprep.mubr.msk.bf16.mxu1 %vm50_vm0, %v1728_v35 }
0x2d8d   :  { %v1725_v20 = vld [vmem:[#allocation4 + $0x38] sm:$0xff] }
0x2d8e   :  { %v1729_v52 = vpack.c.bf16 %v1725_v20, %v1724_v56 }
0x2d90   :  { %2793 = vmatmul.mubr.msk.bf16.gmra.mrb[48].mxu1 %vm50_vm0, %v1729_v52 }
0x2d91   :  { %2816 = vmatprep.mubr.msk.bf16.mxu1 %vm2982_vm9, %v2981_v9 }
0x2df4   :  { %v2005_v53 = vpop.permute.xlu0 %2004 }
0x2df5   :  { %2817 = vmatmul.mubr.msk.bf16.vlgmr.msra.gmra.mrb[52].mxu1 %vm50_vm0, %v2005_v53 }
0x2df6   :  { %2829 = vmatpush3.bf16.msra.mxu1 %v3548_v29  ;;  %2832 = vmatprep.mubr.msk.bf16.mxu1 %vm2982_vm9, %v2981_v9 }
0x2df7   :  { %2830 = vmatprep.subr.bf16.mxu1 %v2981_v9 }
0x2dfa   :  { %2831 = vmatpush3.bf16.msra.mxu1 %v3556_v57 }
0x2dfb   :  { %2844 = vmatprep.subr.bf16.mxu1 %v2981_v9 }
0x2e63   :  { %v3645_v55 = vpop.f32.mrb[48].mxu1 }
0x2e64   :  { %v3647_v59 = vpop.f32.mrb[49].mxu1 }
0x2e65   :  { %v3649_v60 = vpop.f32.mrb[50].mxu1  ;;  %v1816_v33 = vadd.f32 %v3586_v46, %v3647_v59 }
0x2e66   :  { %v3651_v62 = vpop.f32.mrb[51].mxu1 }
0x2ec8   :  { %v2043_v2 = vpop.f32.mrb[52].mxu1 }
0x2ec9   :  { %v2049_v5 = vadd.f32 %v2043_v2, %v1808_v0  ;;  %v2818_v8 = vpop.f32.mrb[53].mxu1 }
0x2eca   :  { %v2046_v10 = vpop.f32.mrb[54].mxu1 }
0x2ecb   :  { %v2050_v36 = vmul.f32 %v2049_v5, %v3179_v7  ;;  %v2819_v11 = vpop.f32.mrb[55].mxu1 }
0x2ecd   :  { %2954 = vtanh.f32 %v2050_v36 }
0x2ed7   :  { %v2955_v18 = vpop.eup %2954 }
0x2ed8   :  { %v2052_v17 = vmul.f32 0.5, %v2955_v18 }
0x2eda   :  { %v2053_v3 = vadd.f32 0.5, %v2052_v17 }
0x2edc   :  { %v2054_v14 = vsel %vm3173_vm13, %v2955_v18, %v2053_v3 }
0x2edd   :  { %2057 = vrot.lane.b32.xlu1 %v2054_v14, %s2985_s4  ;;  %v2055_v58 = vmul.f32 %v2054_v14, %v1994_v44 }
0x2f4f   :  { %v2058_v15 = vpop.permute.xlu1 %2057 }
0x2f50   :  { %v2060_v61 = vmul.f32 %v2058_v15, %v2054_v14 }
0x2f52   :  { %2062 = vrot.lane.b32.xlu0 %v2060_v61, %s2983_s2 }
0x2fc4   :  { %v2063_v34 = vpop.permute.xlu0 %2062 }
0x2fc5   :  { %v2065_v1 = vadd.f32 %v2063_v34, %v2055_v58 }
0x2fc7   :  { %2956 = vtanh.f32 %v2065_v1 }
0x2fd1   :  { %v2957_v22 = vpop.eup %2956 }
0x2fd2   :  { %2068 = vrot.lane.b32.xlu1 %v2957_v22, %s2985_s4 }
0x3044   :  { %v2069_v24 = vpop.permute.xlu1 %2068 }
0x3045   :  { %v2071_v12 = vmul.f32 %v2069_v24, %v2054_v14  ;;  %v1819_v14 = vadd.f32 %v3586_v46, %v3651_v62 }
0x3047   :  { %v2073_v25 = vpack.c.bf16 %v2071_v12, %v2071_v12 }
0x3049   :  { %2075 = vrot.lane.b32.xlu0 %v2073_v25, %s2983_s2 }
0x30bb   :  { %v2076_v19 = vpop.permute.xlu0 %2075 }
0x30bc   :  { %2825 = vmatmul.mubr.msk.bf16.vlgmr.msra.gmra.mrb[52].mxu0 %vm50_vm0, %v2076_v19 }
0x30bd   :  { %2837 = vmatpush3.bf16.msra.mxu0 %v3548_v29  ;;  %2840 = vmatprep.mubr.msk.bf16.mxu0 %vm2982_vm9, %v2981_v9 }
0x30be   :  { %2838 = vmatprep.subr.bf16.mxu0 %v2981_v9 }
0x30c1   :  { %2839 = vmatpush3.bf16.msra.mxu0 %v3556_v57 }
0x30c2   :  { %2852 = vmatprep.subr.bf16.mxu0 %v2981_v9 }
0x318f   :  { %v2114_v6 = vpop.f32.mrb[52].mxu0 }
0x3190   :  { %v2120_v26 = vadd.f32 %v2114_v6, %v1811_v54  ;;  %v2826_v28 = vpop.f32.mrb[53].mxu0 }
0x3191   :  { %v2117_v31 = vpop.f32.mrb[54].mxu0 }
0x3192   :  { %v2121_v32 = vmul.f32 %v2120_v26, %v3179_v7  ;;  %v2827_v30 = vpop.f32.mrb[55].mxu0 }
0x3193   :  { %v1824_v30 = vadd.f32 %v3645_v55, %v3586_v46 }
0x3194   :  { %2958 = vtanh.f32 %v2121_v32 }
0x319e   :  { %v2959_v37 = vpop.eup %2958 }
0x319f   :  { %v2123_v16 = vmul.f32 0.5, %v2959_v37 }
0x31a1   :  { %v2124_v38 = vadd.f32 0.5, %v2123_v16 }
0x31a3   :  { %v2125_v39 = vsel %vm3173_vm13, %v2959_v37, %v2124_v38 }
0x31a4   :  { %2128 = vrot.lane.b32.xlu1 %v2125_v39, %s2985_s4  ;;  %v2126_v27 = vmul.f32 %v2125_v39, %v2065_v1 }
0x3216   :  { %v2129_v42 = vpop.permute.xlu1 %2128 }
0x3217   :  { %v2131_v50 = vmul.f32 %v2129_v42, %v2125_v39 }
0x3219   :  { %2133 = vrot.lane.b32.xlu0 %v2131_v50, %s2983_s2 }
0x328b   :  { %v2134_v13 = vpop.permute.xlu0 %2133 }
0x328c   :  { %v2136_v43 = vadd.f32 %v2134_v13, %v2126_v27 }
0x328e   :  { %2960 = vtanh.f32 %v2136_v43 }
0x3298   :  { %v2961_v44 = vpop.eup %2960 }
0x3299   :  { %2139 = vrot.lane.b32.xlu1 %v2961_v44, %s2985_s4 }
0x330b   :  { %v2140_v45 = vpop.permute.xlu1 %2139 }
0x330c   :  { %v2142_v51 = vmul.f32 %v2140_v45, %v2125_v39 }
0x330e   :  { %v2144_v21 = vpack.c.bf16 %v2142_v51, %v2142_v51 }
0x3310   :  { %2146 = vrot.lane.b32.xlu0 %v2144_v21, %s2983_s2 }
0x3382   :  { %v2147_v49 = vpop.permute.xlu0 %2146 }
0x3383   :  { %2833 = vmatmul.mubr.msk.bf16.vlgmr.msra.gmra.mrb[56].mxu1 %vm50_vm0, %v2147_v49 }
0x3384   :  { %2845 = vmatpush3.bf16.msra.mxu1 %v3548_v29  ;;  %2848 = vmatprep.mubr.msk.bf16.mxu1 %vm2982_vm9, %v2981_v9 }
0x3385   :  { %2846 = vmatprep.subr.bf16.mxu1 %v2981_v9 }
0x3388   :  { %2847 = vmatpush3.bf16.msra.mxu1 %v3556_v57 }
0x3456   :  { %v2185_v47 = vpop.f32.mrb[56].mxu1 }
0x3457   :  { %v2191_v48 = vadd.f32 %v2185_v47, %v1816_v33  ;;  %v2834_v63 = vpop.f32.mrb[57].mxu1 }
0x3458   :  { %v2188_v41 = vpop.f32.mrb[58].mxu1 }
0x3459   :  { %v2192_v35 = vmul.f32 %v2191_v48, %v3179_v7  ;;  %v2835_v56 = vpop.f32.mrb[59].mxu1 }
0x345b   :  { %2962 = vtanh.f32 %v2192_v35  ;;  %v1827_v35 = vadd.f32 %v3649_v60, %v3586_v46  ;;  %v2526_v46 = vld [vmem:[%s3756_s11] ss:$0 sm:$0xff] }
0x3465   :  { %v2963_v20 = vpop.eup %2962 }
0x3466   :  { %v2194_v52 = vmul.f32 0.5, %v2963_v20 }
0x3468   :  { %v2195_v53 = vadd.f32 0.5, %v2194_v52 }
0x346a   :  { %v2196_v0 = vsel %vm3173_vm13, %v2963_v20, %v2195_v53 }
0x346b   :  { %2199 = vrot.lane.b32.xlu1 %v2196_v0, %s2985_s4  ;;  %v2197_v59 = vmul.f32 %v2196_v0, %v2136_v43 }
0x34dd   :  { %v2200_v2 = vpop.permute.xlu1 %2199 }
0x34de   :  { %v2202_v5 = vmul.f32 %v2200_v2, %v2196_v0 }
0x34e0   :  { %2204 = vrot.lane.b32.xlu0 %v2202_v5, %s2983_s2 }
0x3552   :  { %v2205_v8 = vpop.permute.xlu0 %2204 }
0x3553   :  { %v2207_v10 = vadd.f32 %v2205_v8, %v2197_v59 }
0x3555   :  { %2964 = vtanh.f32 %v2207_v10 }
0x355f   :  { %v2965_v36 = vpop.eup %2964 }
0x3560   :  { %2210 = vrot.lane.b32.xlu1 %v2965_v36, %s2985_s4 }
0x35d2   :  { %v2211_v11 = vpop.permute.xlu1 %2210 }
0x35d3   :  { %v2213_v18 = vmul.f32 %v2211_v11, %v2196_v0 }
0x35d5   :  { %v2215_v17 = vpack.c.bf16 %v2213_v18, %v2213_v18 }
0x35d7   :  { %2217 = vrot.lane.b32.xlu0 %v2215_v17, %s2983_s2 }
0x3649   :  { %v2218_v3 = vpop.permute.xlu0 %2217 }
0x364a   :  { %2841 = vmatmul.mubr.msk.bf16.vlgmr.msra.gmra.mrb[56].mxu0 %vm50_vm0, %v2218_v3 }
0x364b   :  { %2853 = vmatpush3.bf16.msra.mxu0 %v3548_v29  ;;  %2856 = vmatprep.mubr.msk.bf16.mxu0 %vm2982_vm9, %v2981_v9 }
0x364c   :  { %2854 = vmatprep.subr.bf16.mxu0 %v2981_v9 }
0x364f   :  { %2855 = vmatpush3.bf16.msra.mxu0 %v3556_v57 }
0x371d   :  { %v2256_v15 = vpop.f32.mrb[56].mxu0 }
0x371e   :  { %v2262_v61 = vadd.f32 %v2256_v15, %v1819_v14  ;;  %v2842_v58 = vpop.f32.mrb[57].mxu0 }
0x371f   :  { %v2259_v34 = vpop.f32.mrb[58].mxu0 }
0x3720   :  { %v2263_v1 = vmul.f32 %v2262_v61, %v3179_v7  ;;  %v2843_v22 = vpop.f32.mrb[59].mxu0 }
0x3722   :  { %2966 = vtanh.f32 %v2263_v1 }
0x372c   :  { %v2967_v24 = vpop.eup %2966 }
0x372d   :  { %v2265_v29 = vmul.f32 0.5, %v2967_v24 }
0x372f   :  { %v2266_v12 = vadd.f32 0.5, %v2265_v29 }
0x3731   :  { %v2267_v25 = vsel %vm3173_vm13, %v2967_v24, %v2266_v12 }
0x3732   :  { %2270 = vrot.lane.b32.xlu1 %v2267_v25, %s2985_s4  ;;  %v2268_v62 = vmul.f32 %v2267_v25, %v2207_v10 }
0x37a4   :  { %v2271_v9 = vpop.permute.xlu1 %2270 }
0x37a5   :  { %v2273_v57 = vmul.f32 %v2271_v9, %v2267_v25 }
0x37a7   :  { %2275 = vrot.lane.b32.xlu0 %v2273_v57, %s2983_s2 }
0x3819   :  { %v2276_v19 = vpop.permute.xlu0 %2275 }
0x381a   :  { %v2278_v54 = vadd.f32 %v2276_v19, %v2268_v62 }
0x381c   :  { %2968 = vtanh.f32 %v2278_v54 }
0x3826   :  { %v2969_v6 = vpop.eup %2968 }
0x3827   :  { %2281 = vrot.lane.b32.xlu1 %v2969_v6, %s2985_s4 }
0x3899   :  { %v2282_v26 = vpop.permute.xlu1 %2281 }
0x389a   :  { %v2284_v28 = vmul.f32 %v2282_v26, %v2267_v25 }
0x389c   :  { %v2286_v31 = vpack.c.bf16 %v2284_v28, %v2284_v28 }
0x389e   :  { %2288 = vrot.lane.b32.xlu0 %v2286_v31, %s2983_s2 }
0x3910   :  { %v2289_v32 = vpop.permute.xlu0 %2288 }
0x3911   :  { %2849 = vmatmul.mubr.msk.bf16.vlgmr.msra.gmra.mrb[60].mxu1 %vm50_vm0, %v2289_v32 }
0x39e4   :  { %v2327_v37 = vpop.f32.mrb[60].mxu1 }
0x39e5   :  { %v2333_v16 = vadd.f32 %v2327_v37, %v1824_v30  ;;  %v2850_v38 = vpop.f32.mrb[61].mxu1 }
0x39e6   :  { %v2330_v39 = vpop.f32.mrb[62].mxu1 }
0x39e7   :  { %v2334_v42 = vmul.f32 %v2333_v16, %v3179_v7  ;;  %v2851_v50 = vpop.f32.mrb[63].mxu1 }
0x39e9   :  { %2970 = vtanh.f32 %v2334_v42 }
0x39f3   :  { %v2971_v27 = vpop.eup %2970 }
0x39f4   :  { %v2336_v13 = vmul.f32 0.5, %v2971_v27 }
0x39f6   :  { %v2337_v43 = vadd.f32 0.5, %v2336_v13 }
0x39f8   :  { %v2338_v44 = vsel %vm3173_vm13, %v2971_v27, %v2337_v43 }
0x39f9   :  { %2341 = vrot.lane.b32.xlu1 %v2338_v44, %s2985_s4  ;;  %v2339_v55 = vmul.f32 %v2338_v44, %v2278_v54 }
0x3a6b   :  { %v2342_v45 = vpop.permute.xlu1 %2341 }
0x3a6c   :  { %v2344_v51 = vmul.f32 %v2342_v45, %v2338_v44 }
0x3a6e   :  { %2346 = vrot.lane.b32.xlu0 %v2344_v51, %s2983_s2 }
0x3ae0   :  { %v2347_v21 = vpop.permute.xlu0 %2346 }
0x3ae1   :  { %v2349_v49 = vadd.f32 %v2347_v21, %v2339_v55 }
0x3ae3   :  { %2972 = vtanh.f32 %v2349_v49 }
0x3aed   :  { %v2973_v33 = vpop.eup %2972 }
0x3aee   :  { %2352 = vrot.lane.b32.xlu1 %v2973_v33, %s2985_s4 }
0x3b60   :  { %v2353_v47 = vpop.permute.xlu1 %2352 }
0x3b61   :  { %v2355_v48 = vmul.f32 %v2353_v47, %v2338_v44 }
0x3b63   :  { %v2357_v63 = vpack.c.bf16 %v2355_v48, %v2355_v48 }
0x3b65   :  { %2359 = vrot.lane.b32.xlu0 %v2357_v63, %s2983_s2 }
0x3bd7   :  { %v2360_v41 = vpop.permute.xlu0 %2359 }
0x3bd8   :  { %2857 = vmatmul.mubr.msk.bf16.vlgmr.msra.gmra.mrb[60].mxu0 %vm50_vm0, %v2360_v41 }
0x3cab   :  { %v2398_v56 = vpop.f32.mrb[60].mxu0 }
0x3cac   :  { %v2404_v20 = vadd.f32 %v2398_v56, %v1827_v35  ;;  %v2858_v52 = vpop.f32.mrb[61].mxu0 }
0x3cad   :  { %v2401_v53 = vpop.f32.mrb[62].mxu0 }
0x3cae   :  { %v2405_v0 = vmul.f32 %v2404_v20, %v3179_v7  ;;  %v2859_v2 = vpop.f32.mrb[63].mxu0 }
0x3cb0   :  { %2974 = vtanh.f32 %v2405_v0 }
0x3cba   :  { %v2975_v5 = vpop.eup %2974 }
0x3cbb   :  { %v2407_v59 = vmul.f32 0.5, %v2975_v5 }
0x3cbd   :  { %v2408_v8 = vadd.f32 0.5, %v2407_v59 }
0x3cbf   :  { %v2409_v10 = vsel %vm3173_vm13, %v2975_v5, %v2408_v8 }
0x3cc0   :  { %2412 = vrot.lane.b32.xlu1 %v2409_v10, %s2985_s4  ;;  %v2410_v7 = vmul.f32 %v2409_v10, %v2349_v49 }
0x3d32   :  { %v2413_v36 = vpop.permute.xlu1 %2412 }
0x3d33   :  { %v2415_v11 = vmul.f32 %v2413_v36, %v2409_v10 }
0x3d35   :  { %2417 = vrot.lane.b32.xlu0 %v2415_v11, %s2983_s2 }
0x3d39   :  { %2446 = vrot.lane.b32.xlu0 %v2526_v46, %s2986_s30 }
0x3da7   :  { %v2418_v60 = vpop.permute.xlu0 %2417 }
0x3da8   :  { %v2420_v18 = vadd.f32 %v2418_v60, %v2410_v7 }
0x3daa   :  { %2976 = vtanh.f32 %v2420_v18 }
0x3dab   :  { %v2447_v3 = vpop.permute.xlu0 %2446 }
0x3db4   :  { %v2977_v17 = vpop.eup %2976 }
0x3db5   :  { %2423 = vrot.lane.b32.xlu1 %v2977_v17, %s2985_s4 }
0x3e27   :  { %v2424_v4 = vpop.permute.xlu1 %2423 }
0x3e28   :  { %v2426_v14 = vmul.f32 %v2424_v4, %v2409_v10 }
0x3e2a   :  { %v2449_v15 = vmul.f32 %v2447_v3, %v2426_v14 }
0x3e2c   :  { %2451 = vrot.lane.b32.xlu1 %v2449_v15, %s2983_s2 }
0x3e30   :  { %959 = vrot.lane.b32.xlu1 %v3385_v40, %s2986_s30  ;;  %v2458_v40 = vstv %s3757_s12 }
0x3e34   :  { %1714 = vrot.lane.b32.xlu1 %v3606_v23, %s2986_s30 }
0x3e38   :  { %2428 = vrot.lane.b32.xlu1 %v2426_v14, %s2983_s2 }
0x3e3c   :  { %2433 = vrot.lane.b32.xlu1 %v2420_v18, %s2986_s30 }
0x3e9e   :  { %v2452_v61 = vpop.permute.xlu1 %2451 }
0x3e9f   :  { %v2454_v58 = vsel %vm50_vm0, %v2452_v61, 0.0 }
0x3ea0   :  { %2455 = vadd.xlane.f32.xlu0 %v2454_v58 }
0x3ea2   :  { %v960_v34 = vpop.permute.xlu1 %959 }
0x3ea3   :  { %962 = vst.msk [vmem:[#allocation3] sm:$0xff] %vm50_vm0, %v960_v34 }
0x3ea6   :  { %v1715_v1 = vpop.permute.xlu1 %1714 }
0x3ea7   :  { %1717 = vst.msk [vmem:[#allocation3 + $0x8] sm:$0xff] %vm50_vm0, %v1715_v1 }
0x3eaa   :  { %v2429_v22 = vpop.permute.xlu1 %2428 }
0x3eab   :  { %2431 = vst.msk [vmem:[#allocation2 + $0x10] sm:$0xff] %vm50_vm0, %v2429_v22 }
0x3eae   :  { %v2434_v24 = vpop.permute.xlu1 %2433 }
0x3eaf   :  { %2436 = vst.msk [vmem:[#allocation3 + $0x10] sm:$0xff] %vm50_vm0, %v2434_v24 }
0x3f2d   :  { %v2456_v23 = vpop.xlane.xlu0 %2455 }
0x3f2e   :  { %v2459_v29 = vadd.f32 %v2458_v40, %v2456_v23 }
0x3f30   :  { %v2460_v12 = vmul.f32 0.5, %v2459_v29 }
0x3f32   :  { %2978 = vtanh.f32 %v2460_v12 }
0x3f3c   :  { %v2979_v25 = vpop.eup %2978 }
0x3f3d   :  { %v2462_v9 = vadd.f32 1.0, %v2979_v25 }
0x3f3f   :  { %v2463_v57 = vmul.f32 0.5, %v2462_v9 }
0x3f41   :  { %2465 = vst.msk [vmem:[%s3758_s13] sm:$0xff] %vm2464_vm14, %v2463_v57 }

</bundles_post_ra>
